<compile_context>
chip_gen: v7x
topology: tpu7x:2x2x1
jax: 0.10.0
libtpu: 0.0.40
codegen_flags: <defaults>
</compile_context>

<pallas_src>
import functools

import jax
import jax.numpy as jnp
from jax.experimental import pallas as pl
from jax.experimental.pallas import tpu as pltpu


def _encoder_block_kernel(x_ref, w_ref, g_ref, b_ref, o_ref, xpad_ref, *, eps):
    # x_ref   : (N, H, W, Cin)      input, channels-last
    # w_ref   : (Cout, 9*Cin)       conv weights, columns ordered (ky, kx, cin)
    # g_ref   : (Cout, 1)           BN gamma
    # b_ref   : (Cout, 1)           BN beta
    # o_ref   : (N, Cout, H*W)      output, NCHW-flat (lane-dense, transpose-free)
    # xpad_ref: (N, H+2, W+2, Cin)  VMEM scratch: zero-padded input
    N, H, W, Cin = x_ref.shape
    M = H * W

    # "same" padding folded into the kernel: zero the scratch, drop the image inside.
    xpad_ref[...] = jnp.zeros(xpad_ref.shape, xpad_ref.dtype)
    xpad_ref[:, 1:H + 1, 1:W + 1, :] = x_ref[...]

    # im2col built in registers: 9 shifted patches concatenated along the last axis,
    # batches concatenated along rows  ->  col[(n,h,w), (ky,kx,cin)].
    cols = []
    for n in range(N):                      # static unroll; N is small
        taps = []
        for ky in range(3):
            for kx in range(3):
                patch = xpad_ref[n, ky:ky + H, kx:kx + W, :]          # (H, W, Cin)
                taps.append(patch.reshape(M, Cin))
        cols.append(jnp.concatenate(taps, axis=1))                    # (M, 9*Cin)
    col = jnp.concatenate(cols, axis=0)                               # (N*M, 9*Cin)

    # Conv as ONE MXU matmul, computed directly in channel-major orientation:
    #   accT[c, p] = sum_k w[c, k] * col[p, k]   (trans-B dot, no explicit transpose).
    accT = jax.lax.dot_general(
        w_ref[...], col, (((1,), (1,)), ((), ())),
        preferred_element_type=jnp.float32)                           # (Cout, N*M)

    # Train-mode BatchNorm: exact centered statistics over all N*H*W positions
    # (whole conv result is resident, so no partial-sum plumbing is needed).
    inv_count = 1.0 / float(N * M)
    mean = jnp.sum(accT, axis=1, keepdims=True) * inv_count           # (Cout, 1)
    d = accT - mean
    var = jnp.sum(d * d, axis=1, keepdims=True) * inv_count           # (Cout, 1)
    scale = g_ref[...] * jax.lax.rsqrt(var + eps)                     # (Cout, 1)
    y = jnp.maximum(d * scale + b_ref[...], 0.0)                      # (Cout, N*M)

    # Lane-dense, 128-aligned stores straight into the NCHW-flat output.
    for n in range(N):
        o_ref[n] = y[:, n * M:(n + 1) * M]


def encoder_block(x_nchw, weight, bias, gamma, beta, *, eps=1e-5):
    """Conv2d(3x3, stride=1, pad=1, dilation=1) + BatchNorm2d (training-mode batch
    statistics) + ReLU, fused into a single Pallas TPU kernel.

    x_nchw: (N, Cin, H, W); weight: (Cout, Cin, 3, 3). Returns (N, Cout, H, W).
    """
    N, Cin, H, W = x_nchw.shape
    Cout = weight.shape[0]
    M = H * W

    # NCHW -> NHWC at the boundary (channels-last inside the kernel for im2col).
    # TODO(synk): fold this input transpose into the kernel (strided DMA); the output
    # side is already transpose-free.
    x = jnp.transpose(x_nchw, (0, 2, 3, 1)).astype(jnp.float32)       # (N, H, W, Cin)

    # (Cout, Cin, 3, 3) -> (Cout, 9*Cin), column index = (ky*3 + kx)*Cin + cin.
    w2 = jnp.transpose(weight, (0, 2, 3, 1)).reshape(Cout, 9 * Cin).astype(jnp.float32)
    g2 = gamma.reshape(Cout, 1).astype(jnp.float32)
    b2 = beta.reshape(Cout, 1).astype(jnp.float32)
    # Conv bias is intentionally not used: a per-channel constant shift cancels exactly
    # through train-mode BatchNorm, so the forward output is unchanged.
    del bias
    # TODO(synk): nn.BatchNorm2d also updates running_mean/running_var in training
    # mode; that state update is not emitted (forward output is unaffected).

    kernel = functools.partial(_encoder_block_kernel, eps=float(eps))

    out_flat = pl.pallas_call(
        kernel,
        grid=(1,),   # whole problem per step; everything stays resident in VMEM
        in_specs=[
            pl.BlockSpec((N, H, W, Cin), lambda i: (0, 0, 0, 0)),
            pl.BlockSpec((Cout, 9 * Cin), lambda i: (0, 0)),
            pl.BlockSpec((Cout, 1), lambda i: (0, 0)),
            pl.BlockSpec((Cout, 1), lambda i: (0, 0)),
        ],
        out_specs=pl.BlockSpec((N, Cout, M), lambda i: (0, 0, 0)),
        out_shape=jax.ShapeDtypeStruct((N, Cout, M), jnp.float32),
        scratch_shapes=[pltpu.VMEM((N, H + 2, W + 2, Cin), jnp.float32)],
        compiler_params=pltpu.CompilerParams(dimension_semantics=("arbitrary",)),
    )(x, w2, g2, b2)
    # TODO(synk): for shapes where N*H*W*max(Cin, Cout)*4B exceeds the per-core VMEM
    # budget (64 MiB on v7x), fall back to a tiled two-pass variant
    # (conv + per-tile BN partials, then BN-apply + ReLU).

    # (N, Cout, H*W) -> (N, Cout, H, W) is a free contiguous view (no transpose).
    return out_flat.reshape(N, Cout, H, W)


def _reference(x_nchw, weight, bias, gamma, beta, eps=1e-5):
    # pure-JAX reference: conv2d (NCHW) + train-mode BN + ReLU
    y = jax.lax.conv_general_dilated(
        x_nchw.astype(jnp.float32), weight.astype(jnp.float32),
        window_strides=(1, 1), padding=((1, 1), (1, 1)),
        dimension_numbers=("NCHW", "OIHW", "NCHW"),
        precision=jax.lax.Precision.HIGHEST)
    y = y + bias.reshape(1, -1, 1, 1)
    mean = jnp.mean(y, axis=(0, 2, 3), keepdims=True)
    var = jnp.mean((y - mean) ** 2, axis=(0, 2, 3), keepdims=True)
    y = (y - mean) * jax.lax.rsqrt(var + eps)
    y = y * gamma.reshape(1, -1, 1, 1) + beta.reshape(1, -1, 1, 1)
    return jnp.maximum(y, 0.0)


if __name__ == "__main__":
    key = jax.random.PRNGKey(0)
    k_x, k_w, k_b, k_g, k_be = jax.random.split(key, 5)

    N, Cin, H, W = 2, 4, 16, 16
    Cout = 8

    x = jax.random.normal(k_x, (N, Cin, H, W), jnp.float32)
    weight = 0.1 * jax.random.normal(k_w, (Cout, Cin, 3, 3), jnp.float32)
    bias = 0.1 * jax.random.normal(k_b, (Cout,), jnp.float32)
    gamma = 1.0 + 0.1 * jax.random.normal(k_g, (Cout,), jnp.float32)
    beta = 0.1 * jax.random.normal(k_be, (Cout,), jnp.float32)

    out = jax.block_until_ready(jax.jit(encoder_block)(x, weight, bias, gamma, beta))
    ref = jax.block_until_ready(_reference(x, weight, bias, gamma, beta))

    assert out.shape == (N, Cout, H, W)
    assert bool(jnp.allclose(out, ref, atol=2e-3, rtol=2e-3)), (
        "mismatch vs reference: max abs err = "
        f"{float(jnp.max(jnp.abs(out - ref)))}")
    print("KERNEL_OK")
</pallas_src>

<mosaic_0001>
module attributes {stable_mosaic.version = 11 : i64} {
  func.func @_encoder_block_kernel(%arg0: i32, %arg1: memref<2x16x16x4xf32, #tpu.memory_space<vmem>>, %arg2: memref<8x36xf32, #tpu.memory_space<vmem>>, %arg3: memref<8x1xf32, #tpu.memory_space<vmem>>, %arg4: memref<8x1xf32, #tpu.memory_space<vmem>>, %arg5: memref<2x8x256xf32, #tpu.memory_space<vmem>>, %arg6: memref<2x18x18x4xf32, #tpu.memory_space<vmem>>) attributes {dimension_semantics = [#tpu.dimension_semantics<arbitrary>], iteration_bounds = array<i64: 1>, scalar_prefetch = 0 : i64, scratch_operands = 1 : i64, tpu.core_type = #tpu.core_type<tc>, window_params = [{pipeline_mode = #tpu.pipeline_mode<synchronous>, transform_indices = @transform_0, window_bounds = array<i64: 2, 16, 16, 4>}, {pipeline_mode = #tpu.pipeline_mode<synchronous>, transform_indices = @transform_1, window_bounds = array<i64: 8, 36>}, {pipeline_mode = #tpu.pipeline_mode<synchronous>, transform_indices = @transform_2, window_bounds = array<i64: 8, 1>}, {pipeline_mode = #tpu.pipeline_mode<synchronous>, transform_indices = @transform_3, window_bounds = array<i64: 8, 1>}, {pipeline_mode = #tpu.pipeline_mode<synchronous>, transform_indices = @transform_4, window_bounds = array<i64: 2, 8, 256>}]} {
    %cst = arith.constant 0.000000e+00 : f32
    %0 = vector.broadcast %cst : f32 to vector<2x18x18x4xf32>
    %c0 = arith.constant 0 : index
    %c0_0 = arith.constant 0 : index
    %c0_1 = arith.constant 0 : index
    %c0_2 = arith.constant 0 : index
    %1 = vector.load %arg6[%c0, %c0_0, %c0_1, %c0_2] : memref<2x18x18x4xf32, #tpu.memory_space<vmem>>, vector<2x18x18x4xf32>
    tpu.vector_store %arg6[%c0, %c0_0, %c0_1, %c0_2], %0 {strides = array<i32>} : memref<2x18x18x4xf32, #tpu.memory_space<vmem>>, vector<2x18x18x4xf32>,
    %c0_3 = arith.constant 0 : index
    %c0_4 = arith.constant 0 : index
    %c0_5 = arith.constant 0 : index
    %c0_6 = arith.constant 0 : index
    %2 = vector.load %arg1[%c0_3, %c0_4, %c0_5, %c0_6] : memref<2x16x16x4xf32, #tpu.memory_space<vmem>>, vector<2x16x16x4xf32>
    %c0_7 = arith.constant 0 : index
    %c1 = arith.constant 1 : index
    %c1_8 = arith.constant 1 : index
    %c0_9 = arith.constant 0 : index
    %3 = vector.load %arg6[%c0_7, %c1, %c1_8, %c0_9] : memref<2x18x18x4xf32, #tpu.memory_space<vmem>>, vector<2x16x16x4xf32>
    tpu.vector_store %arg6[%c0_7, %c1, %c1_8, %c0_9], %2 {strides = array<i32>} : memref<2x18x18x4xf32, #tpu.memory_space<vmem>>, vector<2x16x16x4xf32>,
    %c0_10 = arith.constant 0 : index
    %c0_11 = arith.constant 0 : index
    %c0_12 = arith.constant 0 : index
    %c0_13 = arith.constant 0 : index
    %4 = vector.load %arg6[%c0_10, %c0_11, %c0_12, %c0_13] : memref<2x18x18x4xf32, #tpu.memory_space<vmem>>, vector<1x16x16x4xf32>
    %5 = vector.shape_cast %4 : vector<1x16x16x4xf32> to vector<16x16x4xf32>
    %6 = vector.shape_cast %5 : vector<16x16x4xf32> to vector<256x4xf32>
    %c0_14 = arith.constant 0 : index
    %c0_15 = arith.constant 0 : index
    %c1_16 = arith.constant 1 : index
    %c0_17 = arith.constant 0 : index
    %7 = vector.load %arg6[%c0_14, %c0_15, %c1_16, %c0_17] : memref<2x18x18x4xf32, #tpu.memory_space<vmem>>, vector<1x16x16x4xf32>
    %8 = vector.shape_cast %7 : vector<1x16x16x4xf32> to vector<16x16x4xf32>
    %9 = vector.shape_cast %8 : vector<16x16x4xf32> to vector<256x4xf32>
    %c0_18 = arith.constant 0 : index
    %c0_19 = arith.constant 0 : index
    %c2 = arith.constant 2 : index
    %c0_20 = arith.constant 0 : index
    %10 = vector.load %arg6[%c0_18, %c0_19, %c2, %c0_20] : memref<2x18x18x4xf32, #tpu.memory_space<vmem>>, vector<1x16x16x4xf32>
    %11 = vector.shape_cast %10 : vector<1x16x16x4xf32> to vector<16x16x4xf32>
    %12 = vector.shape_cast %11 : vector<16x16x4xf32> to vector<256x4xf32>
    %c0_21 = arith.constant 0 : index
    %c1_22 = arith.constant 1 : index
    %c0_23 = arith.constant 0 : index
    %c0_24 = arith.constant 0 : index
    %13 = vector.load %arg6[%c0_21, %c1_22, %c0_23, %c0_24] : memref<2x18x18x4xf32, #tpu.memory_space<vmem>>, vector<1x16x16x4xf32>
    %14 = vector.shape_cast %13 : vector<1x16x16x4xf32> to vector<16x16x4xf32>
    %15 = vector.shape_cast %14 : vector<16x16x4xf32> to vector<256x4xf32>
    %c0_25 = arith.constant 0 : index
    %c1_26 = arith.constant 1 : index
    %c1_27 = arith.constant 1 : index
    %c0_28 = arith.constant 0 : index
    %16 = vector.load %arg6[%c0_25, %c1_26, %c1_27, %c0_28] : memref<2x18x18x4xf32, #tpu.memory_space<vmem>>, vector<1x16x16x4xf32>
    %17 = vector.shape_cast %16 : vector<1x16x16x4xf32> to vector<16x16x4xf32>
    %18 = vector.shape_cast %17 : vector<16x16x4xf32> to vector<256x4xf32>
    %c0_29 = arith.constant 0 : index
    %c1_30 = arith.constant 1 : index
    %c2_31 = arith.constant 2 : index
    %c0_32 = arith.constant 0 : index
    %19 = vector.load %arg6[%c0_29, %c1_30, %c2_31, %c0_32] : memref<2x18x18x4xf32, #tpu.memory_space<vmem>>, vector<1x16x16x4xf32>
    %20 = vector.shape_cast %19 : vector<1x16x16x4xf32> to vector<16x16x4xf32>
    %21 = vector.shape_cast %20 : vector<16x16x4xf32> to vector<256x4xf32>
    %c0_33 = arith.constant 0 : index
    %c2_34 = arith.constant 2 : index
    %c0_35 = arith.constant 0 : index
    %c0_36 = arith.constant 0 : index
    %22 = vector.load %arg6[%c0_33, %c2_34, %c0_35, %c0_36] : memref<2x18x18x4xf32, #tpu.memory_space<vmem>>, vector<1x16x16x4xf32>
    %23 = vector.shape_cast %22 : vector<1x16x16x4xf32> to vector<16x16x4xf32>
    %24 = vector.shape_cast %23 : vector<16x16x4xf32> to vector<256x4xf32>
    %c0_37 = arith.constant 0 : index
    %c2_38 = arith.constant 2 : index
    %c1_39 = arith.constant 1 : index
    %c0_40 = arith.constant 0 : index
    %25 = vector.load %arg6[%c0_37, %c2_38, %c1_39, %c0_40] : memref<2x18x18x4xf32, #tpu.memory_space<vmem>>, vector<1x16x16x4xf32>
    %26 = vector.shape_cast %25 : vector<1x16x16x4xf32> to vector<16x16x4xf32>
    %27 = vector.shape_cast %26 : vector<16x16x4xf32> to vector<256x4xf32>
    %c0_41 = arith.constant 0 : index
    %c2_42 = arith.constant 2 : index
    %c2_43 = arith.constant 2 : index
    %c0_44 = arith.constant 0 : index
    %28 = vector.load %arg6[%c0_41, %c2_42, %c2_43, %c0_44] : memref<2x18x18x4xf32, #tpu.memory_space<vmem>>, vector<1x16x16x4xf32>
    %29 = vector.shape_cast %28 : vector<1x16x16x4xf32> to vector<16x16x4xf32>
    %30 = vector.shape_cast %29 : vector<16x16x4xf32> to vector<256x4xf32>
    %31 = tpu.concatenate %6, %9, %12, %15, %18, %21, %24, %27, %30 in 1 : vector<256x4xf32>, vector<256x4xf32>, vector<256x4xf32>, vector<256x4xf32>, vector<256x4xf32>, vector<256x4xf32>, vector<256x4xf32>, vector<256x4xf32>, vector<256x4xf32> -> vector<256x36xf32>
    %c1_45 = arith.constant 1 : index
    %c0_46 = arith.constant 0 : index
    %c0_47 = arith.constant 0 : index
    %c0_48 = arith.constant 0 : index
    %32 = vector.load %arg6[%c1_45, %c0_46, %c0_47, %c0_48] : memref<2x18x18x4xf32, #tpu.memory_space<vmem>>, vector<1x16x16x4xf32>
    %33 = vector.shape_cast %32 : vector<1x16x16x4xf32> to vector<16x16x4xf32>
    %34 = vector.shape_cast %33 : vector<16x16x4xf32> to vector<256x4xf32>
    %c1_49 = arith.constant 1 : index
    %c0_50 = arith.constant 0 : index
    %c1_51 = arith.constant 1 : index
    %c0_52 = arith.constant 0 : index
    %35 = vector.load %arg6[%c1_49, %c0_50, %c1_51, %c0_52] : memref<2x18x18x4xf32, #tpu.memory_space<vmem>>, vector<1x16x16x4xf32>
    %36 = vector.shape_cast %35 : vector<1x16x16x4xf32> to vector<16x16x4xf32>
    %37 = vector.shape_cast %36 : vector<16x16x4xf32> to vector<256x4xf32>
    %c1_53 = arith.constant 1 : index
    %c0_54 = arith.constant 0 : index
    %c2_55 = arith.constant 2 : index
    %c0_56 = arith.constant 0 : index
    %38 = vector.load %arg6[%c1_53, %c0_54, %c2_55, %c0_56] : memref<2x18x18x4xf32, #tpu.memory_space<vmem>>, vector<1x16x16x4xf32>
    %39 = vector.shape_cast %38 : vector<1x16x16x4xf32> to vector<16x16x4xf32>
    %40 = vector.shape_cast %39 : vector<16x16x4xf32> to vector<256x4xf32>
    %c1_57 = arith.constant 1 : index
    %c1_58 = arith.constant 1 : index
    %c0_59 = arith.constant 0 : index
    %c0_60 = arith.constant 0 : index
    %41 = vector.load %arg6[%c1_57, %c1_58, %c0_59, %c0_60] : memref<2x18x18x4xf32, #tpu.memory_space<vmem>>, vector<1x16x16x4xf32>
    %42 = vector.shape_cast %41 : vector<1x16x16x4xf32> to vector<16x16x4xf32>
    %43 = vector.shape_cast %42 : vector<16x16x4xf32> to vector<256x4xf32>
    %c1_61 = arith.constant 1 : index
    %c1_62 = arith.constant 1 : index
    %c1_63 = arith.constant 1 : index
    %c0_64 = arith.constant 0 : index
    %44 = vector.load %arg6[%c1_61, %c1_62, %c1_63, %c0_64] : memref<2x18x18x4xf32, #tpu.memory_space<vmem>>, vector<1x16x16x4xf32>
    %45 = vector.shape_cast %44 : vector<1x16x16x4xf32> to vector<16x16x4xf32>
    %46 = vector.shape_cast %45 : vector<16x16x4xf32> to vector<256x4xf32>
    %c1_65 = arith.constant 1 : index
    %c1_66 = arith.constant 1 : index
    %c2_67 = arith.constant 2 : index
    %c0_68 = arith.constant 0 : index
    %47 = vector.load %arg6[%c1_65, %c1_66, %c2_67, %c0_68] : memref<2x18x18x4xf32, #tpu.memory_space<vmem>>, vector<1x16x16x4xf32>
    %48 = vector.shape_cast %47 : vector<1x16x16x4xf32> to vector<16x16x4xf32>
    %49 = vector.shape_cast %48 : vector<16x16x4xf32> to vector<256x4xf32>
    %c1_69 = arith.constant 1 : index
    %c2_70 = arith.constant 2 : index
    %c0_71 = arith.constant 0 : index
    %c0_72 = arith.constant 0 : index
    %50 = vector.load %arg6[%c1_69, %c2_70, %c0_71, %c0_72] : memref<2x18x18x4xf32, #tpu.memory_space<vmem>>, vector<1x16x16x4xf32>
    %51 = vector.shape_cast %50 : vector<1x16x16x4xf32> to vector<16x16x4xf32>
    %52 = vector.shape_cast %51 : vector<16x16x4xf32> to vector<256x4xf32>
    %c1_73 = arith.constant 1 : index
    %c2_74 = arith.constant 2 : index
    %c1_75 = arith.constant 1 : index
    %c0_76 = arith.constant 0 : index
    %53 = vector.load %arg6[%c1_73, %c2_74, %c1_75, %c0_76] : memref<2x18x18x4xf32, #tpu.memory_space<vmem>>, vector<1x16x16x4xf32>
    %54 = vector.shape_cast %53 : vector<1x16x16x4xf32> to vector<16x16x4xf32>
    %55 = vector.shape_cast %54 : vector<16x16x4xf32> to vector<256x4xf32>
    %c1_77 = arith.constant 1 : index
    %c2_78 = arith.constant 2 : index
    %c2_79 = arith.constant 2 : index
    %c0_80 = arith.constant 0 : index
    %56 = vector.load %arg6[%c1_77, %c2_78, %c2_79, %c0_80] : memref<2x18x18x4xf32, #tpu.memory_space<vmem>>, vector<1x16x16x4xf32>
    %57 = vector.shape_cast %56 : vector<1x16x16x4xf32> to vector<16x16x4xf32>
    %58 = vector.shape_cast %57 : vector<16x16x4xf32> to vector<256x4xf32>
    %59 = tpu.concatenate %34, %37, %40, %43, %46, %49, %52, %55, %58 in 1 : vector<256x4xf32>, vector<256x4xf32>, vector<256x4xf32>, vector<256x4xf32>, vector<256x4xf32>, vector<256x4xf32>, vector<256x4xf32>, vector<256x4xf32>, vector<256x4xf32> -> vector<256x36xf32>
    %60 = tpu.concatenate %31, %59 in 0 : vector<256x36xf32>, vector<256x36xf32> -> vector<512x36xf32>
    %c0_81 = arith.constant 0 : index
    %c0_82 = arith.constant 0 : index
    %61 = vector.load %arg2[%c0_81, %c0_82] : memref<8x36xf32, #tpu.memory_space<vmem>>, vector<8x36xf32>
    %cst_83 = arith.constant dense<0.000000e+00> : vector<8x512xf32>
    %62 = tpu.matmul %61, %60, %cst_83 {dimension_numbers = #tpu.dot_dimension_numbers<[1], [1], [0], [0], [0, 0, 1, 0], [], []>} : vector<8x36xf32>, vector<512x36xf32>, vector<8x512xf32> -> vector<8x512xf32>
    %cst_84 = arith.constant dense<0.000000e+00> : vector<8xf32>
    %63 = vector.multi_reduction <add>, %62, %cst_84 [1] : vector<8x512xf32> to vector<8xf32>
    %64 = vector.shape_cast %63 : vector<8xf32> to vector<8x1xf32>
    %cst_85 = arith.constant 0.001953125 : f32
    %65 = vector.broadcast %cst_85 : f32 to vector<8x1xf32>
    %66 = arith.mulf %64, %65 : vector<8x1xf32>
    %67 = vector.broadcast %66 : vector<8x1xf32> to vector<8x512xf32>
    %68 = arith.subf %62, %67 : vector<8x512xf32>
    %69 = arith.mulf %68, %68 : vector<8x512xf32>
    %cst_86 = arith.constant dense<0.000000e+00> : vector<8xf32>
    %70 = vector.multi_reduction <add>, %69, %cst_86 [1] : vector<8x512xf32> to vector<8xf32>
    %71 = vector.shape_cast %70 : vector<8xf32> to vector<8x1xf32>
    %cst_87 = arith.constant 0.001953125 : f32
    %72 = vector.broadcast %cst_87 : f32 to vector<8x1xf32>
    %73 = arith.mulf %71, %72 : vector<8x1xf32>
    %c0_88 = arith.constant 0 : index
    %c0_89 = arith.constant 0 : index
    %74 = vector.load %arg3[%c0_88, %c0_89] : memref<8x1xf32, #tpu.memory_space<vmem>>, vector<8x1xf32>
    %cst_90 = arith.constant 9.99999974E-6 : f32
    %75 = vector.broadcast %cst_90 : f32 to vector<8x1xf32>
    %76 = arith.addf %73, %75 : vector<8x1xf32>
    %77 = math.rsqrt %76 : vector<8x1xf32>
    %78 = arith.mulf %74, %77 : vector<8x1xf32>
    %79 = vector.broadcast %78 : vector<8x1xf32> to vector<8x512xf32>
    %80 = arith.mulf %68, %79 : vector<8x512xf32>
    %c0_91 = arith.constant 0 : index
    %c0_92 = arith.constant 0 : index
    %81 = vector.load %arg4[%c0_91, %c0_92] : memref<8x1xf32, #tpu.memory_space<vmem>>, vector<8x1xf32>
    %82 = vector.broadcast %81 : vector<8x1xf32> to vector<8x512xf32>
    %83 = arith.addf %80, %82 : vector<8x512xf32>
    %cst_93 = arith.constant 0.000000e+00 : f32
    %84 = vector.broadcast %cst_93 : f32 to vector<8x512xf32>
    %85 = arith.maximumf %83, %84 : vector<8x512xf32>
    %86 = vector.extract_strided_slice %85 {offsets = [0, 0], sizes = [8, 256], strides = [1, 1]} : vector<8x512xf32> to vector<8x256xf32>
    %c0_94 = arith.constant 0 : index
    %c0_95 = arith.constant 0 : index
    %c0_96 = arith.constant 0 : index
    %87 = vector.load %arg5[%c0_94, %c0_95, %c0_96] : memref<2x8x256xf32, #tpu.memory_space<vmem>>, vector<1x8x256xf32>
    %88 = vector.shape_cast %87 : vector<1x8x256xf32> to vector<8x256xf32>
    %89 = vector.shape_cast %86 : vector<8x256xf32> to vector<1x8x256xf32>
    tpu.vector_store %arg5[%c0_94, %c0_95, %c0_96], %89 {strides = array<i32>} : memref<2x8x256xf32, #tpu.memory_space<vmem>>, vector<1x8x256xf32>,
    %90 = vector.extract_strided_slice %85 {offsets = [0, 256], sizes = [8, 256], strides = [1, 1]} : vector<8x512xf32> to vector<8x256xf32>
    %c1_97 = arith.constant 1 : index
    %c0_98 = arith.constant 0 : index
    %c0_99 = arith.constant 0 : index
    %91 = vector.load %arg5[%c1_97, %c0_98, %c0_99] : memref<2x8x256xf32, #tpu.memory_space<vmem>>, vector<1x8x256xf32>
    %92 = vector.shape_cast %91 : vector<1x8x256xf32> to vector<8x256xf32>
    %93 = vector.shape_cast %90 : vector<8x256xf32> to vector<1x8x256xf32>
    tpu.vector_store %arg5[%c1_97, %c0_98, %c0_99], %93 {strides = array<i32>} : memref<2x8x256xf32, #tpu.memory_space<vmem>>, vector<1x8x256xf32>,
    return
  }
  func.func @transform_0(%arg0: i32) -> (i32, i32, i32, i32) {
    %c0_i32 = arith.constant 0 : i32
    %c0_i32_0 = arith.constant 0 : i32
    %c0_i32_1 = arith.constant 0 : i32
    %c0_i32_2 = arith.constant 0 : i32
    %c0_i32_3 = arith.constant 0 : i32
    return %c0_i32, %c0_i32_0, %c0_i32_1, %c0_i32_2 : i32, i32, i32, i32
  }
  func.func @transform_1(%arg0: i32) -> (i32, i32) {
    %c0_i32 = arith.constant 0 : i32
    %c0_i32_0 = arith.constant 0 : i32
    %c0_i32_1 = arith.constant 0 : i32
    return %c0_i32, %c0_i32_0 : i32, i32
  }
  func.func @transform_2(%arg0: i32) -> (i32, i32) {
    %c0_i32 = arith.constant 0 : i32
    %c0_i32_0 = arith.constant 0 : i32
    %c0_i32_1 = arith.constant 0 : i32
    return %c0_i32, %c0_i32_0 : i32, i32
  }
  func.func @transform_3(%arg0: i32) -> (i32, i32) {
    %c0_i32 = arith.constant 0 : i32
    %c0_i32_0 = arith.constant 0 : i32
    %c0_i32_1 = arith.constant 0 : i32
    return %c0_i32, %c0_i32_0 : i32, i32
  }
  func.func @transform_4(%arg0: i32) -> (i32, i32, i32) {
    %c0_i32 = arith.constant 0 : i32
    %c0_i32_0 = arith.constant 0 : i32
    %c0_i32_1 = arith.constant 0 : i32
    %c0_i32_2 = arith.constant 0 : i32
    return %c0_i32, %c0_i32_0, %c0_i32_1 : i32, i32, i32
  }
}

</mosaic_0001>

<bundles_post_ra>
// kernel: encoder_block.1
= control target key start
LH: loop header
LB: loop body
LE: loop exit
PB: predicated region body
PF: predicated region fallthrough
CT: control target
= control target key end

     0   :  { %vm17_vm0 = vcmask 31744   ;;  %vm20_vm1 = vcmask 25600   ;;  %v5355_v0 = vmov 0.0   ;;  %s5356_s7 = smov 4   ;;  %s5357_s28 = smov 8   ;;  %vm1601_vm2 = vcmask 64512   ;;  %s8023_s0 = inlined_call_operand.vmem [shape: f32[2,16,16,4], index: 0, kind: input, shape index: {}]   ;;  %s8024_s1 = inlined_call_operand.vmem [shape: f32[8,36], index: 1, kind: input, shape index: {}]   ;;  %s8025_s3 = inlined_call_operand.vmem [shape: f32[8,1], index: 3, kind: input, shape index: {}]   ;;  %s8026_s2 = inlined_call_operand.vmem [shape: f32[8,1], index: 2, kind: input, shape index: {}]   ;;  %s8027_s4 = inlined_call_operand.vmem [shape: f32[2,8,256], index: 4, kind: output, shape index: {}]  }
   0x1   :  { %18 = vst.msk [vmem:[#allocation2] sm:$0xff] %vm17_vm0, %v5355_v0  ;;  %19 = vst.msk [vmem:[#allocation2 + $0x8] sm:$0xff] %vm17_vm0, %v5355_v0  ;;  %v129_v1 = vld [vmem:[%s8023_s0 + $0x10] sm:$0xff]  ;;  %v130_v2 = vld [vmem:[%s8023_s0 + $0x18] sm:$0xff]  ;;  %s5358_s29 = smov 12   ;;  %s5359_s30 = smov 16  }
   0x2   :  { %21 = vst.msk [vmem:[#allocation2 + $0x10] sm:$0x3] %vm20_vm1, %v5355_v0  ;;  %24 = vst.msk [vmem:[#allocation2 + $0x28] sm:$0x3] %vm20_vm1, %v5355_v0  ;;  %v127_v3 = vld [vmem:[%s8023_s0] sm:$0xff]  ;;  %v128_v4 = vld [vmem:[%s8023_s0 + $0x8] sm:$0xff] }
   0x3   :  { %22 = vst.msk [vmem:[#allocation2 + $0x18] sm:$0xff] %vm17_vm0, %v5355_v0  ;;  %23 = vst.msk [vmem:[#allocation2 + $0x20] sm:$0xff] %vm17_vm0, %v5355_v0  ;;  %v131_v5 = vld [vmem:[%s8023_s0 + $0x20] sm:$0xff]  ;;  %v132_v6 = vld [vmem:[%s8023_s0 + $0x28] sm:$0xff]  ;;  %s5360_s26 = smov 20   ;;  %s5361_s13 = smov 24  }
   0x4   :  { %25 = vst.msk [vmem:[#allocation2 + $0x30] sm:$0xff] %vm17_vm0, %v5355_v0  ;;  %26 = vst.msk [vmem:[#allocation2 + $0x38] sm:$0xff] %vm17_vm0, %v5355_v0  ;;  %v133_v7 = vld [vmem:[%s8023_s0 + $0x30] sm:$0xff]  ;;  %v134_v8 = vld [vmem:[%s8023_s0 + $0x38] sm:$0xff]  ;;  %s5362_s22 = smov 28   ;;  %s5363_s5 = smov 32  }
   0x5   :  { %27 = vst.msk [vmem:[#allocation2 + $0x40] sm:$0x3] %vm20_vm1, %v5355_v0  ;;  %30 = vst.msk [vmem:[#allocation2 + $0x58] sm:$0x3] %vm20_vm1, %v5355_v0  ;;  %v135_v9 = vld [vmem:[%s8023_s0 + $0x40] sm:$0xff]  ;;  %v136_v10 = vld [vmem:[%s8023_s0 + $0x48] sm:$0xff] }
   0x6   :  { %28 = vst.msk [vmem:[#allocation2 + $0x48] sm:$0xff] %vm17_vm0, %v5355_v0  ;;  %29 = vst.msk [vmem:[#allocation2 + $0x50] sm:$0xff] %vm17_vm0, %v5355_v0  ;;  %v137_v11 = vld [vmem:[%s8023_s0 + $0x50] sm:$0xff]  ;;  %v138_v12 = vld [vmem:[%s8023_s0 + $0x58] sm:$0xff]  ;;  %vm1634_vm3 = vcmask 97280   ;;  %vm1667_vm4 = vcmask 130048  }
   0x7   :  { %31 = vst.msk [vmem:[#allocation2 + $0x60] sm:$0xff] %vm17_vm0, %v5355_v0  ;;  %32 = vst.msk [vmem:[#allocation2 + $0x68] sm:$0xff] %vm17_vm0, %v5355_v0  ;;  %v139_v13 = vld [vmem:[%s8023_s0 + $0x60] sm:$0xff]  ;;  %v140_v14 = vld [vmem:[%s8023_s0 + $0x68] sm:$0xff]  ;;  %vm1700_vm5 = vcmask 162816   ;;  %vm1733_vm6 = vcmask 195584  }
   0x8   :  { %33 = vst.msk [vmem:[#allocation2 + $0x70] sm:$0x3] %vm20_vm1, %v5355_v0  ;;  %36 = vst.msk [vmem:[#allocation2 + $0x88] sm:$0x3] %vm20_vm1, %v5355_v0  ;;  %v141_v15 = vld [vmem:[%s8023_s0 + $0x70] sm:$0xff]  ;;  %v142_v16 = vld [vmem:[%s8023_s0 + $0x78] sm:$0xff] }
   0x9   :  { %34 = vst.msk [vmem:[#allocation2 + $0x78] sm:$0xff] %vm17_vm0, %v5355_v0  ;;  %35 = vst.msk [vmem:[#allocation2 + $0x80] sm:$0xff] %vm17_vm0, %v5355_v0  ;;  %v143_v17 = vld [vmem:[%s8023_s0 + $0x80] sm:$0xff]  ;;  %v144_v18 = vld [vmem:[%s8023_s0 + $0x88] sm:$0xff]  ;;  %vm1766_vm7 = vcmask 228352   ;;  %vm1799_vm8 = vcmask 261120  }
   0xa   :  { %37 = vst.msk [vmem:[#allocation2 + $0x90] sm:$0xff] %vm17_vm0, %v5355_v0  ;;  %38 = vst.msk [vmem:[#allocation2 + $0x98] sm:$0xff] %vm17_vm0, %v5355_v0  ;;  %v145_v19 = vld [vmem:[%s8023_s0 + $0x90] sm:$0xff]  ;;  %v146_v20 = vld [vmem:[%s8023_s0 + $0x98] sm:$0xff]  ;;  %vm3404_vm9 = vcmask 293888  }
   0xb   :  { %39 = vst.msk [vmem:[#allocation2 + $0xa0] sm:$0x3] %vm20_vm1, %v5355_v0  ;;  %42 = vst.msk [vmem:[#allocation2 + $0xb8] sm:$0x3] %vm20_vm1, %v5355_v0  ;;  %v147_v21 = vld [vmem:[%s8023_s0 + $0xa0] sm:$0xff]  ;;  %v289_v23 = vld [vmem:[#allocation2 + $0x9] sm:$0xff] }
   0xc   :  { %40 = vst.msk [vmem:[#allocation2 + $0xa8] sm:$0xff] %vm17_vm0, %v5355_v0  ;;  %41 = vst.msk [vmem:[#allocation2 + $0xb0] sm:$0xff] %vm17_vm0, %v5355_v0  ;;  %v288_v22 = vld [vmem:[#allocation2 + $0x1] sm:$0xff]  ;;  %v149_v45 = vld [vmem:[%s8023_s0 + $0xb0] sm:$0xff] }
   0xd   :  { %43 = vst.msk [vmem:[#allocation2 + $0xc0] sm:$0xff] %vm17_vm0, %v5355_v0  ;;  %44 = vst.msk [vmem:[#allocation2 + $0xc8] sm:$0xff] %vm17_vm0, %v5355_v0  ;;  %v148_v24 = vld [vmem:[%s8023_s0 + $0xa8] sm:$0xff]  ;;  %v4040_v25 = vpack.i.bf16 %v289_v23, %v288_v22  ;;  %v150_v46 = vld [vmem:[%s8023_s0 + $0xb8] sm:$0xff] }
   0xe   :  { %45 = vst.msk [vmem:[#allocation2 + $0xd0] sm:$0x3] %vm20_vm1, %v5355_v0  ;;  %48 = vst.msk [vmem:[#allocation2 + $0xe8] sm:$0x3] %vm20_vm1, %v5355_v0  ;;  %v151_v47 = vld [vmem:[%s8023_s0 + $0xc0] sm:$0xff]  ;;  %v152_v48 = vld [vmem:[%s8023_s0 + $0xc8] sm:$0xff] }
   0xf   :  { %46 = vst.msk [vmem:[#allocation2 + $0xd8] sm:$0xff] %vm17_vm0, %v5355_v0  ;;  %47 = vst.msk [vmem:[#allocation2 + $0xe0] sm:$0xff] %vm17_vm0, %v5355_v0  ;;  %4041 = vrot.lane.b32.xlu0 %v4040_v25, %s5356_s7  ;;  %v153_v49 = vld [vmem:[%s8023_s0 + $0xd0] sm:$0xff]  ;;  %v154_v50 = vld [vmem:[%s8023_s0 + $0xd8] sm:$0xff] }
  0x10   :  { %49 = vst.msk [vmem:[#allocation2 + $0xf0] sm:$0xff] %vm17_vm0, %v5355_v0  ;;  %50 = vst.msk [vmem:[#allocation2 + $0xf8] sm:$0xff] %vm17_vm0, %v5355_v0  ;;  %v155_v51 = vld [vmem:[%s8023_s0 + $0xe0] sm:$0xff]  ;;  %v156_v52 = vld [vmem:[%s8023_s0 + $0xe8] sm:$0xff] }
  0x11   :  { %51 = vst.msk [vmem:[#allocation2 + $0x100] sm:$0x3] %vm20_vm1, %v5355_v0  ;;  %54 = vst.msk [vmem:[#allocation2 + $0x118] sm:$0x3] %vm20_vm1, %v5355_v0  ;;  %v157_v25 = vld [vmem:[%s8023_s0 + $0xf0] sm:$0xff] }
  0x12   :  { %52 = vst.msk [vmem:[#allocation2 + $0x108] sm:$0xff] %vm17_vm0, %v5355_v0  ;;  %53 = vst.msk [vmem:[#allocation2 + $0x110] sm:$0xff] %vm17_vm0, %v5355_v0 }
  0x13   :  { %55 = vst.msk [vmem:[#allocation2 + $0x120] sm:$0xff] %vm17_vm0, %v5355_v0  ;;  %56 = vst.msk [vmem:[#allocation2 + $0x128] sm:$0xff] %vm17_vm0, %v5355_v0 }
  0x14   :  { %57 = vst.msk [vmem:[#allocation2 + $0x130] sm:$0x3] %vm20_vm1, %v5355_v0  ;;  %60 = vst.msk [vmem:[#allocation2 + $0x148] sm:$0x3] %vm20_vm1, %v5355_v0 }
  0x15   :  { %58 = vst.msk [vmem:[#allocation2 + $0x138] sm:$0xff] %vm17_vm0, %v5355_v0  ;;  %59 = vst.msk [vmem:[#allocation2 + $0x140] sm:$0xff] %vm17_vm0, %v5355_v0 }
  0x16   :  { %61 = vst.msk [vmem:[#allocation2 + $0x150] sm:$0xff] %vm17_vm0, %v5355_v0  ;;  %62 = vst.msk [vmem:[#allocation2 + $0x158] sm:$0xff] %vm17_vm0, %v5355_v0 }
  0x17   :  { %63 = vst.msk [vmem:[#allocation2 + $0x160] sm:$0x3] %vm20_vm1, %v5355_v0  ;;  %66 = vst.msk [vmem:[#allocation2 + $0x178] sm:$0x3] %vm20_vm1, %v5355_v0 }
  0x18   :  { %64 = vst.msk [vmem:[#allocation2 + $0x168] sm:$0xff] %vm17_vm0, %v5355_v0  ;;  %65 = vst.msk [vmem:[#allocation2 + $0x170] sm:$0xff] %vm17_vm0, %v5355_v0 }
  0x19   :  { %67 = vst.msk [vmem:[#allocation2 + $0x180] sm:$0xff] %vm17_vm0, %v5355_v0  ;;  %68 = vst.msk [vmem:[#allocation2 + $0x188] sm:$0xff] %vm17_vm0, %v5355_v0 }
  0x1a   :  { %69 = vst.msk [vmem:[#allocation2 + $0x190] sm:$0x3] %vm20_vm1, %v5355_v0  ;;  %72 = vst.msk [vmem:[#allocation2 + $0x1a8] sm:$0x3] %vm20_vm1, %v5355_v0 }
  0x1b   :  { %70 = vst.msk [vmem:[#allocation2 + $0x198] sm:$0xff] %vm17_vm0, %v5355_v0  ;;  %71 = vst.msk [vmem:[#allocation2 + $0x1a0] sm:$0xff] %vm17_vm0, %v5355_v0 }
  0x1c   :  { %73 = vst.msk [vmem:[#allocation2 + $0x1b0] sm:$0xff] %vm17_vm0, %v5355_v0  ;;  %74 = vst.msk [vmem:[#allocation2 + $0x1b8] sm:$0xff] %vm17_vm0, %v5355_v0 }
  0x1d   :  { %75 = vst.msk [vmem:[#allocation2 + $0x1c0] sm:$0x3] %vm20_vm1, %v5355_v0  ;;  %78 = vst.msk [vmem:[#allocation2 + $0x1d8] sm:$0x3] %vm20_vm1, %v5355_v0 }
  0x1e   :  { %76 = vst.msk [vmem:[#allocation2 + $0x1c8] sm:$0xff] %vm17_vm0, %v5355_v0  ;;  %77 = vst.msk [vmem:[#allocation2 + $0x1d0] sm:$0xff] %vm17_vm0, %v5355_v0 }
  0x1f   :  { %79 = vst.msk [vmem:[#allocation2 + $0x1e0] sm:$0xff] %vm17_vm0, %v5355_v0  ;;  %80 = vst.msk [vmem:[#allocation2 + $0x1e8] sm:$0xff] %vm17_vm0, %v5355_v0 }
  0x20   :  { %81 = vst.msk [vmem:[#allocation2 + $0x1f0] sm:$0x3] %vm20_vm1, %v5355_v0  ;;  %84 = vst.msk [vmem:[#allocation2 + $0x208] sm:$0x3] %vm20_vm1, %v5355_v0 }
  0x21   :  { %82 = vst.msk [vmem:[#allocation2 + $0x1f8] sm:$0xff] %vm17_vm0, %v5355_v0  ;;  %83 = vst.msk [vmem:[#allocation2 + $0x200] sm:$0xff] %vm17_vm0, %v5355_v0 }
  0x22   :  { %85 = vst.msk [vmem:[#allocation2 + $0x210] sm:$0xff] %vm17_vm0, %v5355_v0  ;;  %86 = vst.msk [vmem:[#allocation2 + $0x218] sm:$0xff] %vm17_vm0, %v5355_v0 }
  0x23   :  { %87 = vst.msk [vmem:[#allocation2 + $0x220] sm:$0x3] %vm20_vm1, %v5355_v0  ;;  %90 = vst.msk [vmem:[#allocation2 + $0x238] sm:$0x3] %vm20_vm1, %v5355_v0 }
  0x24   :  { %88 = vst.msk [vmem:[#allocation2 + $0x228] sm:$0xff] %vm17_vm0, %v5355_v0  ;;  %89 = vst.msk [vmem:[#allocation2 + $0x230] sm:$0xff] %vm17_vm0, %v5355_v0 }
  0x25   :  { %91 = vst.msk [vmem:[#allocation2 + $0x240] sm:$0xff] %vm17_vm0, %v5355_v0  ;;  %92 = vst.msk [vmem:[#allocation2 + $0x248] sm:$0xff] %vm17_vm0, %v5355_v0 }
  0x26   :  { %93 = vst.msk [vmem:[#allocation2 + $0x250] sm:$0x3] %vm20_vm1, %v5355_v0  ;;  %96 = vst.msk [vmem:[#allocation2 + $0x268] sm:$0x3] %vm20_vm1, %v5355_v0 }
  0x27   :  { %94 = vst.msk [vmem:[#allocation2 + $0x258] sm:$0xff] %vm17_vm0, %v5355_v0  ;;  %95 = vst.msk [vmem:[#allocation2 + $0x260] sm:$0xff] %vm17_vm0, %v5355_v0 }
  0x28   :  { %97 = vst.msk [vmem:[#allocation2 + $0x270] sm:$0xff] %vm17_vm0, %v5355_v0  ;;  %98 = vst.msk [vmem:[#allocation2 + $0x278] sm:$0xff] %vm17_vm0, %v5355_v0 }
  0x29   :  { %99 = vst.msk [vmem:[#allocation2 + $0x280] sm:$0x3] %vm20_vm1, %v5355_v0  ;;  %102 = vst.msk [vmem:[#allocation2 + $0x298] sm:$0x3] %vm20_vm1, %v5355_v0 }
  0x2a   :  { %100 = vst.msk [vmem:[#allocation2 + $0x288] sm:$0xff] %vm17_vm0, %v5355_v0  ;;  %101 = vst.msk [vmem:[#allocation2 + $0x290] sm:$0xff] %vm17_vm0, %v5355_v0 }
  0x2b   :  { %103 = vst.msk [vmem:[#allocation2 + $0x2a0] sm:$0xff] %vm17_vm0, %v5355_v0  ;;  %104 = vst.msk [vmem:[#allocation2 + $0x2a8] sm:$0xff] %vm17_vm0, %v5355_v0 }
  0x2c   :  { %105 = vst.msk [vmem:[#allocation2 + $0x2b0] sm:$0x3] %vm20_vm1, %v5355_v0  ;;  %108 = vst.msk [vmem:[#allocation2 + $0x2c8] sm:$0x3] %vm20_vm1, %v5355_v0 }
  0x2d   :  { %106 = vst.msk [vmem:[#allocation2 + $0x2b8] sm:$0xff] %vm17_vm0, %v5355_v0  ;;  %107 = vst.msk [vmem:[#allocation2 + $0x2c0] sm:$0xff] %vm17_vm0, %v5355_v0 }
  0x2e   :  { %109 = vst.msk [vmem:[#allocation2 + $0x2d0] sm:$0xff] %vm17_vm0, %v5355_v0  ;;  %110 = vst.msk [vmem:[#allocation2 + $0x2d8] sm:$0xff] %vm17_vm0, %v5355_v0 }
  0x2f   :  { %111 = vst.msk [vmem:[#allocation2 + $0x2e0] sm:$0x3] %vm20_vm1, %v5355_v0  ;;  %114 = vst.msk [vmem:[#allocation2 + $0x2f8] sm:$0x3] %vm20_vm1, %v5355_v0 }
  0x30   :  { %112 = vst.msk [vmem:[#allocation2 + $0x2e8] sm:$0xff] %vm17_vm0, %v5355_v0  ;;  %113 = vst.msk [vmem:[#allocation2 + $0x2f0] sm:$0xff] %vm17_vm0, %v5355_v0 }
  0x31   :  { %115 = vst.msk [vmem:[#allocation2 + $0x300] sm:$0xff] %vm17_vm0, %v5355_v0  ;;  %116 = vst.msk [vmem:[#allocation2 + $0x308] sm:$0xff] %vm17_vm0, %v5355_v0 }
  0x32   :  { %117 = vst.msk [vmem:[#allocation2 + $0x310] sm:$0x3] %vm20_vm1, %v5355_v0  ;;  %120 = vst.msk [vmem:[#allocation2 + $0x328] sm:$0x3] %vm20_vm1, %v5355_v0 }
  0x33   :  { %118 = vst.msk [vmem:[#allocation2 + $0x318] sm:$0xff] %vm17_vm0, %v5355_v0  ;;  %119 = vst.msk [vmem:[#allocation2 + $0x320] sm:$0xff] %vm17_vm0, %v5355_v0 }
  0x34   :  { %121 = vst.msk [vmem:[#allocation2 + $0x330] sm:$0xff] %vm17_vm0, %v5355_v0  ;;  %122 = vst.msk [vmem:[#allocation2 + $0x338] sm:$0xff] %vm17_vm0, %v5355_v0 }
  0x35   :  { %123 = vst.msk [vmem:[#allocation2 + $0x340] sm:$0x3] %vm20_vm1, %v5355_v0  ;;  %126 = vst.msk [vmem:[#allocation2 + $0x358] sm:$0x3] %vm20_vm1, %v5355_v0 }
  0x36   :  { %124 = vst.msk [vmem:[#allocation2 + $0x348] sm:$0xff] %vm17_vm0, %v5355_v0  ;;  %125 = vst.msk [vmem:[#allocation2 + $0x350] sm:$0xff] %vm17_vm0, %v5355_v0 }
  0x37   :  { %194 = vst.msk [vmem:[#allocation2 + $0x31] sm:$0xff] %vm17_vm0, %v129_v1  ;;  %195 = vst.msk [vmem:[#allocation2 + $0x39] sm:$0xff] %vm17_vm0, %v130_v2 }
  0x38   :  { %192 = vst.msk [vmem:[#allocation2 + $0x19] sm:$0xff] %vm17_vm0, %v127_v3  ;;  %193 = vst.msk [vmem:[#allocation2 + $0x21] sm:$0xff] %vm17_vm0, %v128_v4 }
  0x39   :  { %196 = vst.msk [vmem:[#allocation2 + $0x49] sm:$0xff] %vm17_vm0, %v131_v5  ;;  %197 = vst.msk [vmem:[#allocation2 + $0x51] sm:$0xff] %vm17_vm0, %v132_v6 }
  0x3a   :  { %198 = vst.msk [vmem:[#allocation2 + $0x61] sm:$0xff] %vm17_vm0, %v133_v7  ;;  %199 = vst.msk [vmem:[#allocation2 + $0x69] sm:$0xff] %vm17_vm0, %v134_v8 }
  0x3b   :  { %200 = vst.msk [vmem:[#allocation2 + $0x79] sm:$0xff] %vm17_vm0, %v135_v9  ;;  %201 = vst.msk [vmem:[#allocation2 + $0x81] sm:$0xff] %vm17_vm0, %v136_v10 }
  0x3c   :  { %202 = vst.msk [vmem:[#allocation2 + $0x91] sm:$0xff] %vm17_vm0, %v137_v11  ;;  %203 = vst.msk [vmem:[#allocation2 + $0x99] sm:$0xff] %vm17_vm0, %v138_v12 }
  0x3d   :  { %204 = vst.msk [vmem:[#allocation2 + $0xa9] sm:$0xff] %vm17_vm0, %v139_v13  ;;  %205 = vst.msk [vmem:[#allocation2 + $0xb1] sm:$0xff] %vm17_vm0, %v140_v14 }
  0x3e   :  { %206 = vst.msk [vmem:[#allocation2 + $0xc1] sm:$0xff] %vm17_vm0, %v141_v15  ;;  %207 = vst.msk [vmem:[#allocation2 + $0xc9] sm:$0xff] %vm17_vm0, %v142_v16  ;;  %v292_v26 = vld [vmem:[#allocation2 + $0x31] sm:$0xff]  ;;  %v293_v27 = vld [vmem:[#allocation2 + $0x39] sm:$0xff] }
  0x3f   :  { %208 = vst.msk [vmem:[#allocation2 + $0xd9] sm:$0xff] %vm17_vm0, %v143_v17  ;;  %209 = vst.msk [vmem:[#allocation2 + $0xe1] sm:$0xff] %vm17_vm0, %v144_v18  ;;  %v290_v28 = vld [vmem:[#allocation2 + $0x19] sm:$0xff]  ;;  %v5694_v29 = vpack.i.bf16 %v293_v27, %v292_v26  ;;  %v291_v30 = vld [vmem:[#allocation2 + $0x21] sm:$0xff] }
  0x40   :  { %210 = vst.msk [vmem:[#allocation2 + $0xf1] sm:$0xff] %vm17_vm0, %v145_v19  ;;  %211 = vst.msk [vmem:[#allocation2 + $0xf9] sm:$0xff] %vm17_vm0, %v146_v20  ;;  %v294_v31 = vld [vmem:[#allocation2 + $0x49] sm:$0xff]  ;;  %v295_v32 = vld [vmem:[#allocation2 + $0x51] sm:$0xff]  ;;  %v5697_v33 = vpack.i.bf16 %v291_v30, %v290_v28 }
  0x41   :  { %212 = vst.msk [vmem:[#allocation2 + $0x109] sm:$0xff] %vm17_vm0, %v147_v21  ;;  %213 = vst.msk [vmem:[#allocation2 + $0x111] sm:$0xff] %vm17_vm0, %v148_v24  ;;  %4051 = vrot.lane.b32.xlu1 %v5694_v29, %s5356_s7  ;;  %v5701_v34 = vpack.i.bf16 %v295_v32, %v294_v31  ;;  %v296_v35 = vld [vmem:[#allocation2 + $0x61] sm:$0xff]  ;;  %v297_v36 = vld [vmem:[#allocation2 + $0x69] sm:$0xff] }
  0x42   :  { %v298_v37 = vld [vmem:[#allocation2 + $0x79] sm:$0xff]  ;;  %v299_v38 = vld [vmem:[#allocation2 + $0x81] sm:$0xff]  ;;  %4046 = vrot.lane.b32.xlu0 %v5697_v33, %s5356_s7  ;;  %v5705_v39 = vpack.i.bf16 %v297_v36, %v296_v35  ;;  %214 = vst.msk [vmem:[#allocation2 + $0x121] sm:$0xff] %vm17_vm0, %v149_v45  ;;  %215 = vst.msk [vmem:[#allocation2 + $0x129] sm:$0xff] %vm17_vm0, %v150_v46 }
  0x43   :  { %v300_v40 = vld [vmem:[#allocation2 + $0x91] sm:$0xff]  ;;  %v301_v41 = vld [vmem:[#allocation2 + $0x99] sm:$0xff]  ;;  %v5709_v43 = vpack.i.bf16 %v299_v38, %v298_v37  ;;  %216 = vst.msk [vmem:[#allocation2 + $0x139] sm:$0xff] %vm17_vm0, %v151_v47  ;;  %217 = vst.msk [vmem:[#allocation2 + $0x141] sm:$0xff] %vm17_vm0, %v152_v48 }
  0x44   :  { %v302_v42 = vld [vmem:[#allocation2 + $0xa9] sm:$0xff]  ;;  %v303_v44 = vld [vmem:[#allocation2 + $0xb1] sm:$0xff]  ;;  %218 = vst.msk [vmem:[#allocation2 + $0x151] sm:$0xff] %vm17_vm0, %v153_v49  ;;  %v5742_v53 = vpack.i.bf16 %v301_v41, %v300_v40  ;;  %219 = vst.msk [vmem:[#allocation2 + $0x159] sm:$0xff] %vm17_vm0, %v154_v50 }
  0x45   :  { %4056 = vrot.lane.b32.xlu1 %v5701_v34, %s5356_s7  ;;  %220 = vst.msk [vmem:[#allocation2 + $0x169] sm:$0xff] %vm17_vm0, %v155_v51  ;;  %221 = vst.msk [vmem:[#allocation2 + $0x171] sm:$0xff] %vm17_vm0, %v156_v52  ;;  %v5749_v54 = vpack.i.bf16 %v303_v44, %v302_v42  ;;  %v304_v55 = vld [vmem:[#allocation2 + $0xc1] sm:$0xff]  ;;  %v305_v56 = vld [vmem:[#allocation2 + $0xc9] sm:$0xff] }
  0x46   :  { %4061 = vrot.lane.b32.xlu0 %v5705_v39, %s5356_s7  ;;  %v306_v57 = vld [vmem:[#allocation2 + $0xd9] sm:$0xff]  ;;  %v307_v58 = vld [vmem:[#allocation2 + $0xe1] sm:$0xff]  ;;  %v5753_v59 = vpack.i.bf16 %v305_v56, %v304_v55  ;;  %v321_v16 = vld [vmem:[#allocation2 + $0xa] sm:$0xff]  ;;  %222 = vst.msk [vmem:[#allocation2 + $0x181] sm:$0xff] %vm17_vm0, %v157_v25 }
  0x47   :  { %v5757_v60 = vpack.i.bf16 %v307_v58, %v306_v57  ;;  %v308_v61 = vld [vmem:[#allocation2 + $0xf1] sm:$0xff]  ;;  %v309_v62 = vld [vmem:[#allocation2 + $0xf9] sm:$0xff]  ;;  %v320_v15 = vld [vmem:[#allocation2 + $0x2] sm:$0xff] }
  0x48   :  { %v310_v63 = vld [vmem:[#allocation2 + $0x109] sm:$0xff]  ;;  %v311_v0 = vld [vmem:[#allocation2 + $0x111] sm:$0xff]  ;;  %v5761_v1 = vpack.i.bf16 %v309_v62, %v308_v61  ;;  %v322_v17 = vld [vmem:[#allocation2 + $0x1a] sm:$0xff]  ;;  %v4120_v19 = vpack.i.bf16 %v321_v16, %v320_v15 }
  0x49   :  { %4066 = vrot.lane.b32.xlu1 %v5709_v43, %s5356_s7  ;;  %v5765_v2 = vpack.i.bf16 %v311_v0, %v310_v63  ;;  %v312_v3 = vld [vmem:[#allocation2 + $0x121] sm:$0xff]  ;;  %v313_v4 = vld [vmem:[#allocation2 + $0x129] sm:$0xff]  ;;  %v324_v21 = vld [vmem:[#allocation2 + $0x32] sm:$0xff] }
  0x4a   :  { %4071 = vrot.lane.b32.xlu0 %v5742_v53, %s5356_s7  ;;  %v314_v5 = vld [vmem:[#allocation2 + $0x139] sm:$0xff]  ;;  %v315_v6 = vld [vmem:[#allocation2 + $0x141] sm:$0xff]  ;;  %v5769_v7 = vpack.i.bf16 %v313_v4, %v312_v3  ;;  %v326_v23 = vld [vmem:[#allocation2 + $0x4a] sm:$0xff] }
  0x4b   :  { %v5773_v8 = vpack.i.bf16 %v315_v6, %v314_v5  ;;  %v316_v9 = vld [vmem:[#allocation2 + $0x151] sm:$0xff]  ;;  %v317_v10 = vld [vmem:[#allocation2 + $0x159] sm:$0xff]  ;;  %v323_v18 = vld [vmem:[#allocation2 + $0x22] sm:$0xff] }
  0x4c   :  { %v318_v11 = vld [vmem:[#allocation2 + $0x169] sm:$0xff]  ;;  %v319_v12 = vld [vmem:[#allocation2 + $0x171] sm:$0xff]  ;;  %v5777_v13 = vpack.i.bf16 %v317_v10, %v316_v9  ;;  %v5787_v20 = vpack.i.bf16 %v323_v18, %v322_v17  ;;  %v325_v22 = vld [vmem:[#allocation2 + $0x3a] sm:$0xff] }
  0x4d   :  { %4076 = vrot.lane.b32.xlu1 %v5749_v54, %s5356_s7  ;;  %v5781_v14 = vpack.i.bf16 %v319_v12, %v318_v11  ;;  %v327_v24 = vld [vmem:[#allocation2 + $0x52] sm:$0xff]  ;;  %v5796_v27 = vpack.i.bf16 %v325_v22, %v324_v21  ;;  %v328_v30 = vld [vmem:[#allocation2 + $0x62] sm:$0xff]  ;;  %v329_v31 = vld [vmem:[#allocation2 + $0x6a] sm:$0xff] }
  0x4e   :  { %4081 = vrot.lane.b32.xlu0 %v5753_v59, %s5356_s7  ;;  %v158_v26 = vld [vmem:[%s8023_s0 + $0xf8] sm:$0xff]  ;;  %v5802_v28 = vpack.i.bf16 %v327_v24, %v326_v23  ;;  %v331_v35 = vld [vmem:[#allocation2 + $0x82] sm:$0xff]  ;;  %v5806_v36 = vpack.i.bf16 %v329_v31, %v328_v30  ;;  %v334_v41 = vld [vmem:[#allocation2 + $0xaa] sm:$0xff] }
  0x4f   :  { %223 = vst.msk [vmem:[#allocation2 + $0x189] sm:$0xff] %vm17_vm0, %v158_v26  ;;  %v330_v32 = vld [vmem:[#allocation2 + $0x7a] sm:$0xff]  ;;  %v332_v38 = vld [vmem:[#allocation2 + $0x92] sm:$0xff]  ;;  %v336_v46 = vld [vmem:[#allocation2 + $0xc2] sm:$0xff] }
  0x50   :  { %v5810_v37 = vpack.i.bf16 %v331_v35, %v330_v32  ;;  %v333_v40 = vld [vmem:[#allocation2 + $0x9a] sm:$0xff]  ;;  %v335_v42 = vld [vmem:[#allocation2 + $0xb2] sm:$0xff]  ;;  %v337_v47 = vld [vmem:[#allocation2 + $0xca] sm:$0xff] }
  0x51   :  { %4086 = vrot.lane.b32.xlu1 %v5757_v60, %s5356_s7  ;;  %v5814_v44 = vpack.i.bf16 %v333_v40, %v332_v38  ;;  %v5818_v45 = vpack.i.bf16 %v335_v42, %v334_v41  ;;  %v338_v48 = vld [vmem:[#allocation2 + $0xda] sm:$0xff]  ;;  %v339_v49 = vld [vmem:[#allocation2 + $0xe2] sm:$0xff]  ;;  %v5822_v50 = vpack.i.bf16 %v337_v47, %v336_v46  ;;  %v340_v52 = vld [vmem:[#allocation2 + $0xf2] sm:$0xff] }
  0x52   :  { %4091 = vrot.lane.b32.xlu0 %v5761_v1, %s5356_s7  ;;  %v5826_v51 = vpack.i.bf16 %v339_v49, %v338_v48  ;;  %v341_v55 = vld [vmem:[#allocation2 + $0xfa] sm:$0xff]  ;;  %v342_v56 = vld [vmem:[#allocation2 + $0x10a] sm:$0xff]  ;;  %v343_v57 = vld [vmem:[#allocation2 + $0x112] sm:$0xff] }
  0x53   :  { %v5830_v58 = vpack.i.bf16 %v341_v55, %v340_v52  ;;  %v5834_v61 = vpack.i.bf16 %v343_v57, %v342_v56  ;;  %v344_v62 = vld [vmem:[#allocation2 + $0x122] sm:$0xff]  ;;  %v345_v63 = vld [vmem:[#allocation2 + $0x12a] sm:$0xff]  ;;  %v346_v0 = vld [vmem:[#allocation2 + $0x13a] sm:$0xff] }
  0x54   :  { %v347_v3 = vld [vmem:[#allocation2 + $0x142] sm:$0xff]  ;;  %v5838_v4 = vpack.i.bf16 %v345_v63, %v344_v62  ;;  %v348_v6 = vld [vmem:[#allocation2 + $0x152] sm:$0xff]  ;;  %v349_v9 = vld [vmem:[#allocation2 + $0x15a] sm:$0xff] }
  0x55   :  { %4096 = vrot.lane.b32.xlu1 %v5765_v2, %s5356_s7  ;;  %v5842_v5 = vpack.i.bf16 %v347_v3, %v346_v0  ;;  %v350_v10 = vld [vmem:[#allocation2 + $0x16a] sm:$0xff]  ;;  %v351_v11 = vld [vmem:[#allocation2 + $0x172] sm:$0xff]  ;;  %v5846_v12 = vpack.i.bf16 %v349_v9, %v348_v6  ;;  %v353_v17 = vld [vmem:[#allocation2 + $0x20] sm:$0xff] }
  0x56   :  { %4101 = vrot.lane.b32.xlu0 %v5769_v7, %s5356_s7  ;;  %v5850_v15 = vpack.i.bf16 %v351_v11, %v350_v10  ;;  %v352_v16 = vld [vmem:[#allocation2 + $0x18] sm:$0xff]  ;;  %v354_v18 = vld [vmem:[#allocation2 + $0x30] sm:$0xff]  ;;  %v356_v23 = vld [vmem:[#allocation2 + $0x48] sm:$0xff] }
  0x57   :  { %v4200_v21 = vpack.i.bf16 %v353_v17, %v352_v16  ;;  %v357_v24 = vld [vmem:[#allocation2 + $0x50] sm:$0xff]  ;;  %v358_v25 = vld [vmem:[#allocation2 + $0x60] sm:$0xff]  ;;  %v359_v26 = vld [vmem:[#allocation2 + $0x68] sm:$0xff] }
  0x58   :  { %v5859_v30 = vpack.i.bf16 %v357_v24, %v356_v23  ;;  %v5863_v31 = vpack.i.bf16 %v359_v26, %v358_v25  ;;  %v360_v32 = vld [vmem:[#allocation2 + $0x78] sm:$0xff]  ;;  %v361_v35 = vld [vmem:[#allocation2 + $0x80] sm:$0xff]  ;;  %v362_v38 = vld [vmem:[#allocation2 + $0x90] sm:$0xff] }
  0x59   :  { %4106 = vrot.lane.b32.xlu1 %v5773_v8, %s5356_s7  ;;  %v363_v40 = vld [vmem:[#allocation2 + $0x98] sm:$0xff]  ;;  %v5867_v41 = vpack.i.bf16 %v361_v35, %v360_v32  ;;  %v364_v46 = vld [vmem:[#allocation2 + $0xa8] sm:$0xff]  ;;  %v365_v47 = vld [vmem:[#allocation2 + $0xb0] sm:$0xff] }
  0x5a   :  { %4111 = vrot.lane.b32.xlu0 %v5777_v13, %s5356_s7  ;;  %v5871_v42 = vpack.i.bf16 %v363_v40, %v362_v38  ;;  %v366_v48 = vld [vmem:[#allocation2 + $0xc0] sm:$0xff]  ;;  %v367_v49 = vld [vmem:[#allocation2 + $0xc8] sm:$0xff]  ;;  %v5875_v52 = vpack.i.bf16 %v365_v47, %v364_v46  ;;  %v368_v56 = vld [vmem:[#allocation2 + $0xd8] sm:$0xff] }
  0x5b   :  { %v5879_v55 = vpack.i.bf16 %v367_v49, %v366_v48  ;;  %v369_v57 = vld [vmem:[#allocation2 + $0xe0] sm:$0xff]  ;;  %v370_v62 = vld [vmem:[#allocation2 + $0xf0] sm:$0xff]  ;;  %v371_v63 = vld [vmem:[#allocation2 + $0xf8] sm:$0xff] }
  0x5c   :  { %v5883_v0 = vpack.i.bf16 %v369_v57, %v368_v56  ;;  %v5887_v3 = vpack.i.bf16 %v371_v63, %v370_v62  ;;  %v372_v6 = vld [vmem:[#allocation2 + $0x108] sm:$0xff]  ;;  %v373_v9 = vld [vmem:[#allocation2 + $0x110] sm:$0xff]  ;;  %v374_v10 = vld [vmem:[#allocation2 + $0x120] sm:$0xff] }
  0x5d   :  { %4116 = vrot.lane.b32.xlu1 %v5781_v14, %s5356_s7  ;;  %v375_v11 = vld [vmem:[#allocation2 + $0x128] sm:$0xff]  ;;  %v5891_v16 = vpack.i.bf16 %v373_v9, %v372_v6  ;;  %v379_v23 = vld [vmem:[#allocation2 + $0x158] sm:$0xff]  ;;  %v381_v32 = vld [vmem:[#allocation2 + $0x170] sm:$0xff] }
  0x5e   :  { %4121 = vrot.lane.b32.xlu0 %v4120_v19, %s5357_s28  ;;  %v355_v19 = vld [vmem:[#allocation2 + $0x38] sm:$0xff]  ;;  %v5895_v17 = vpack.i.bf16 %v375_v11, %v374_v10  ;;  %v380_v26 = vld [vmem:[#allocation2 + $0x168] sm:$0xff]  ;;  %v382_v35 = vld [vmem:[#allocation2 + $0x180] sm:$0xff] }
  0x5f   :  { %v5856_v22 = vpack.i.bf16 %v355_v19, %v354_v18  ;;  %v376_v18 = vld [vmem:[#allocation2 + $0x138] sm:$0xff]  ;;  %v377_v19 = vld [vmem:[#allocation2 + $0x140] sm:$0xff]  ;;  %v383_v38 = vld [vmem:[#allocation2 + $0x188] sm:$0xff]  ;;  %v5907_v40 = vpack.i.bf16 %v381_v32, %v380_v26 }
  0x60   :  { %v5899_v24 = vpack.i.bf16 %v377_v19, %v376_v18  ;;  %v5911_v46 = vpack.i.bf16 %v383_v38, %v382_v35  ;;  %v173_v47 = vld [vmem:[%s8023_s0 + $0x170] sm:$0xff]  ;;  %v174_v48 = vld [vmem:[%s8023_s0 + $0x178] sm:$0xff]  ;;  %v180_v19 = vld [vmem:[%s8023_s0 + $0x1a8] sm:$0xff] }
  0x61   :  { %4126 = vrot.lane.b32.xlu1 %v5787_v20, %s5357_s28  ;;  %238 = vst.msk [vmem:[#allocation2 + $0x271] sm:$0xff] %vm17_vm0, %v173_v47  ;;  %239 = vst.msk [vmem:[#allocation2 + $0x279] sm:$0xff] %vm17_vm0, %v174_v48  ;;  %v415_v49 = vld [vmem:[#allocation2 + $0x189] sm:$0xff]  ;;  %v480_v38 = vld [vmem:[#allocation2 + $0x1a0] sm:$0xff] }
  0x62   :  { %4131 = vrot.lane.b32.xlu0 %v5796_v27, %s5357_s28  ;;  %v447_v11 = vld [vmem:[#allocation2 + $0x18a] sm:$0xff]  ;;  %245 = vst.msk [vmem:[#allocation2 + $0x2c1] sm:$0xff] %vm17_vm0, %v180_v19  ;;  %v482_v48 = vld [vmem:[#allocation2 + $0x39] sm:$0xff]  ;;  %vm6650_vm10 = vmpackc.low %vm3404_vm9, %vm3404_vm9 }
  0x63   :  { %v490_v19 = vld [vmem:[#allocation2 + $0x99] sm:$0xff] }
  0x65   :  { %4136 = vrot.lane.b32.xlu1 %v5802_v28, %s5357_s28 }
  0x66   :  { %4141 = vrot.lane.b32.xlu0 %v5806_v36, %s5357_s28 }
  0x69   :  { %4146 = vrot.lane.b32.xlu1 %v5810_v37, %s5357_s28 }
  0x6a   :  { %4151 = vrot.lane.b32.xlu0 %v5814_v44, %s5357_s28 }
  0x6d   :  { %4156 = vrot.lane.b32.xlu1 %v5818_v45, %s5357_s28 }
  0x6e   :  { %4161 = vrot.lane.b32.xlu0 %v5822_v50, %s5357_s28 }
  0x71   :  { %4166 = vrot.lane.b32.xlu1 %v5826_v51, %s5357_s28 }
  0x72   :  { %4171 = vrot.lane.b32.xlu0 %v5830_v58, %s5357_s28 }
  0x75   :  { %4176 = vrot.lane.b32.xlu1 %v5834_v61, %s5357_s28 }
  0x76   :  { %4181 = vrot.lane.b32.xlu0 %v5838_v4, %s5357_s28 }
  0x79   :  { %4186 = vrot.lane.b32.xlu1 %v5842_v5, %s5357_s28 }
  0x7a   :  { %4191 = vrot.lane.b32.xlu0 %v5846_v12, %s5357_s28 }
  0x7d   :  { %4196 = vrot.lane.b32.xlu1 %v5850_v15, %s5357_s28 }
  0x7e   :  { %4201 = vrot.lane.b32.xlu0 %v4200_v21, %s5358_s29  ;;  %v378_v21 = vld [vmem:[#allocation2 + $0x150] sm:$0xff] }
  0x7f   :  { %v5903_v25 = vpack.i.bf16 %v379_v23, %v378_v21 }
  0x81   :  { %4206 = vrot.lane.b32.xlu1 %v5856_v22, %s5358_s29 }
  0x82   :  { %4211 = vrot.lane.b32.xlu0 %v5859_v30, %s5358_s29 }
  0x85   :  { %4216 = vrot.lane.b32.xlu1 %v5863_v31, %s5358_s29 }
  0x86   :  { %4221 = vrot.lane.b32.xlu0 %v5867_v41, %s5358_s29 }
  0x89   :  { %4226 = vrot.lane.b32.xlu1 %v5871_v42, %s5358_s29 }
  0x8a   :  { %4231 = vrot.lane.b32.xlu0 %v5875_v52, %s5358_s29 }
  0x8d   :  { %4236 = vrot.lane.b32.xlu1 %v5879_v55, %s5358_s29 }
  0x8e   :  { %4241 = vrot.lane.b32.xlu0 %v5883_v0, %s5358_s29 }
  0x91   :  { %4246 = vrot.lane.b32.xlu1 %v5887_v3, %s5358_s29 }
  0x92   :  { %4251 = vrot.lane.b32.xlu0 %v5891_v16, %s5358_s29 }
  0x95   :  { %4256 = vrot.lane.b32.xlu1 %v5895_v17, %s5358_s29 }
  0x96   :  { %4261 = vrot.lane.b32.xlu0 %v5899_v24, %s5358_s29 }
  0x99   :  { %4266 = vrot.lane.b32.xlu1 %v5903_v25, %s5358_s29 }
  0x9a   :  { %4271 = vrot.lane.b32.xlu0 %v5907_v40, %s5358_s29 }
  0x9d   :  { %4276 = vrot.lane.b32.xlu1 %v5911_v46, %s5358_s29 }
  0x9e   :  { %4281 = vrot.lane.b32.xlu0 %v5697_v33, %s5359_s30  ;;  %v176_v33 = vld [vmem:[%s8023_s0 + $0x188] sm:$0xff] }
  0x9f   :  { %241 = vst.msk [vmem:[#allocation2 + $0x291] sm:$0xff] %vm17_vm0, %v176_v33  ;;  %v484_v33 = vld [vmem:[#allocation2 + $0x51] sm:$0xff] }
  0xa1   :  { %4286 = vrot.lane.b32.xlu1 %v5694_v29, %s5359_s30  ;;  %v175_v29 = vld [vmem:[%s8023_s0 + $0x180] sm:$0xff] }
  0xa2   :  { %4291 = vrot.lane.b32.xlu0 %v5701_v34, %s5359_s30  ;;  %240 = vst.msk [vmem:[#allocation2 + $0x289] sm:$0xff] %vm17_vm0, %v175_v29  ;;  %v159_v34 = vld [vmem:[%s8023_s0 + $0x100] sm:$0xff] }
  0xa3   :  { %224 = vst.msk [vmem:[#allocation2 + $0x1c9] sm:$0xff] %vm17_vm0, %v159_v34 }
  0xa5   :  { %4296 = vrot.lane.b32.xlu1 %v5705_v39, %s5359_s30  ;;  %v160_v39 = vld [vmem:[%s8023_s0 + $0x108] sm:$0xff] }
  0xa6   :  { %4301 = vrot.lane.b32.xlu0 %v5709_v43, %s5359_s30  ;;  %225 = vst.msk [vmem:[#allocation2 + $0x1d1] sm:$0xff] %vm17_vm0, %v160_v39  ;;  %v5961_v43 = vpop.permute.xlu0 %4041  ;;  %v485_v39 = vld [vmem:[#allocation2 + $0x61] sm:$0xff] }
  0xa9   :  { %4306 = vrot.lane.b32.xlu1 %v5742_v53, %s5359_s30 }
  0xaa   :  { %4311 = vrot.lane.b32.xlu0 %v5749_v54, %s5359_s30 }
  0xad   :  { %4316 = vrot.lane.b32.xlu1 %v5753_v59, %s5359_s30  ;;  %v414_v59 = vld [vmem:[#allocation2 + $0x181] sm:$0xff] }
  0xae   :  { %4321 = vrot.lane.b32.xlu0 %v5757_v60, %s5359_s30  ;;  %v5977_v60 = vpack.i.bf16 %v415_v49, %v414_v59  ;;  %v486_v59 = vld [vmem:[#allocation2 + $0x69] sm:$0xff]  ;;  %v487_v49 = vld [vmem:[#allocation2 + $0x79] sm:$0xff] }
  0xb1   :  { %4326 = vrot.lane.b32.xlu1 %v5761_v1, %s5359_s30  ;;  %v177_v1 = vld [vmem:[%s8023_s0 + $0x190] sm:$0xff] }
  0xb2   :  { %4331 = vrot.lane.b32.xlu0 %v5765_v2, %s5359_s30  ;;  %242 = vst.msk [vmem:[#allocation2 + $0x2a1] sm:$0xff] %vm17_vm0, %v177_v1  ;;  %v181_v1 = vld [vmem:[%s8023_s0 + $0x1b0] sm:$0xff] }
  0xb3   :  { %v5963_v53 = vpop.permute.xlu1 %4051  ;;  %246 = vst.msk [vmem:[#allocation2 + $0x2d1] sm:$0xff] %vm17_vm0, %v181_v1  ;;  %v498_v1 = vld [vmem:[#allocation2 + $0xf9] sm:$0xff] }
  0xb4   :  { %v5969_v54 = vpop.permute.xlu0 %4046 }
  0xb5   :  { %4336 = vrot.lane.b32.xlu1 %v5769_v7, %s5359_s30  ;;  %v178_v7 = vld [vmem:[%s8023_s0 + $0x198] sm:$0xff] }
  0xb6   :  { %4341 = vrot.lane.b32.xlu0 %v5773_v8, %s5359_s30  ;;  %243 = vst.msk [vmem:[#allocation2 + $0x2a9] sm:$0xff] %vm17_vm0, %v178_v7  ;;  %v161_v8 = vld [vmem:[%s8023_s0 + $0x110] sm:$0xff] }
  0xb7   :  { %v5971_v56 = vpop.permute.xlu1 %4056  ;;  %226 = vst.msk [vmem:[#allocation2 + $0x1e1] sm:$0xff] %vm17_vm0, %v161_v8  ;;  %v182_v8 = vld [vmem:[%s8023_s0 + $0x1b8] sm:$0xff] }
  0xb8   :  { %v5982_v2 = vpop.permute.xlu0 %4061  ;;  %247 = vst.msk [vmem:[#allocation2 + $0x2d9] sm:$0xff] %vm17_vm0, %v182_v8 }
  0xb9   :  { %4346 = vrot.lane.b32.xlu1 %v5777_v13, %s5359_s30  ;;  %8113 = vst [vmem:[#allocation3_spill] sm:$0xff] %v5982_v2  ;;  %v162_v13 = vld [vmem:[%s8023_s0 + $0x118] sm:$0xff] }
  0xba   :  { %4351 = vrot.lane.b32.xlu0 %v5781_v14, %s5359_s30  ;;  %227 = vst.msk [vmem:[#allocation2 + $0x1e9] sm:$0xff] %vm17_vm0, %v162_v13  ;;  %v166_v13 = vld [vmem:[%s8023_s0 + $0x138] sm:$0xff] }
  0xbb   :  { %v5988_v57 = vpop.permute.xlu1 %4066  ;;  %231 = vst.msk [vmem:[#allocation2 + $0x219] sm:$0xff] %vm17_vm0, %v166_v13  ;;  %v500_v13 = vld [vmem:[#allocation2 + $0x111] sm:$0xff] }
  0xbc   :  { %8114 = vst [vmem:[#allocation4_spill] sm:$0xff] %v5988_v57  ;;  %v6003_v62 = vpop.permute.xlu0 %4071 }
  0xbd   :  { %4356 = vrot.lane.b32.xlu1 %v5977_v60, %s5359_s30  ;;  %8115 = vst [vmem:[#allocation5_spill] sm:$0xff] %v6003_v62 }
  0xbe   :  { %4361 = vrot.lane.b32.xlu0 %v5787_v20, %s5360_s26 }
  0xbf   :  { %v6005_v63 = vpop.permute.xlu1 %4076 }
  0xc0   :  { %8116 = vst [vmem:[#allocation6_spill] sm:$0xff] %v6005_v63  ;;  %v6011_v6 = vpop.permute.xlu0 %4081  ;;  %v523_v63 = vld [vmem:[#allocation2 + $0xaa] sm:$0xff] }
  0xc1   :  { %4366 = vrot.lane.b32.xlu1 %v5796_v27, %s5360_s26 }
  0xc2   :  { %4371 = vrot.lane.b32.xlu0 %v5802_v28, %s5360_s26 }
  0xc3   :  { %v6013_v14 = vpop.permute.xlu1 %4086 }
  0xc4   :  { %v6019_v9 = vpop.permute.xlu0 %4091 }
  0xc5   :  { %4376 = vrot.lane.b32.xlu1 %v5806_v36, %s5360_s26 }
  0xc6   :  { %4381 = vrot.lane.b32.xlu0 %v5810_v37, %s5360_s26 }
  0xc7   :  { %v6021_v10 = vpop.permute.xlu1 %4096 }
  0xc8   :  { %v6027_v20 = vpop.permute.xlu0 %4101 }
  0xc9   :  { %4386 = vrot.lane.b32.xlu1 %v5814_v44, %s5360_s26  ;;  %8117 = vst [vmem:[#allocation7_spill] sm:$0xff] %v6027_v20 }
  0xca   :  { %4391 = vrot.lane.b32.xlu0 %v5818_v45, %s5360_s26 }
  0xcb   :  { %v6029_v27 = vpop.permute.xlu1 %4106 }
  0xcc   :  { %8118 = vst [vmem:[#allocation8_spill] sm:$0xff] %v6029_v27  ;;  %v6035_v28 = vpop.permute.xlu0 %4111  ;;  %v2075_v27 = vld [vmem:[#allocation2 + $0x2a1] sm:$0xff] }
  0xcd   :  { %4396 = vrot.lane.b32.xlu1 %v5822_v50, %s5360_s26  ;;  %8119 = vst [vmem:[#allocation9_spill] sm:$0xff] %v6035_v28  ;;  %v446_v50 = vld [vmem:[#allocation2 + $0x182] sm:$0xff]  ;;  %v1897_v28 = vld [vmem:[#allocation2 + $0x1b2] sm:$0xff] }
  0xce   :  { %4401 = vrot.lane.b32.xlu0 %v5826_v51, %s5360_s26  ;;  %v4435_v51 = vpack.i.bf16 %v447_v11, %v446_v50  ;;  %v4530_v11 = vpack.i.bf16 %v486_v59, %v485_v39  ;;  %v496_v39 = vld [vmem:[#allocation2 + $0xe1] sm:$0xff] }
  0xcf   :  { %v6037_v36 = vpop.permute.xlu1 %4116 }
  0xd0   :  { %8120 = vst [vmem:[#allocation10_spill] sm:$0xff] %v6037_v36  ;;  %v6043_v37 = vpop.permute.xlu0 %4121 }
  0xd1   :  { %4406 = vrot.lane.b32.xlu1 %v5830_v58, %s5360_s26 }
  0xd2   :  { %4411 = vrot.lane.b32.xlu0 %v5834_v61, %s5360_s26  ;;  %v179_v61 = vld [vmem:[%s8023_s0 + $0x1a0] sm:$0xff] }
  0xd3   :  { %v6045_v44 = vpop.permute.xlu1 %4126  ;;  %244 = vst.msk [vmem:[#allocation2 + $0x2b9] sm:$0xff] %vm17_vm0, %v179_v61  ;;  %v489_v61 = vld [vmem:[#allocation2 + $0x91] sm:$0xff] }
  0xd4   :  { %v6051_v45 = vpop.permute.xlu0 %4131 }
  0xd5   :  { %4416 = vrot.lane.b32.xlu1 %v5838_v4, %s5360_s26  ;;  %8121 = vst [vmem:[#allocation11_spill] sm:$0xff] %v6051_v45 }
  0xd6   :  { %4421 = vrot.lane.b32.xlu0 %v5842_v5, %s5360_s26  ;;  %v163_v5 = vld [vmem:[%s8023_s0 + $0x120] sm:$0xff] }
  0xd7   :  { %v6053_v18 = vpop.permute.xlu1 %4136  ;;  %228 = vst.msk [vmem:[#allocation2 + $0x1f9] sm:$0xff] %vm17_vm0, %v163_v5 }
  0xd8   :  { %8122 = vst [vmem:[#allocation12_spill] sm:$0xff] %v6053_v18  ;;  %v6059_v58 = vpop.permute.xlu0 %4141 }
  0xd9   :  { %4426 = vrot.lane.b32.xlu1 %v5846_v12, %s5360_s26  ;;  %8123 = vst [vmem:[#allocation13_spill] sm:$0xff] %v6059_v58  ;;  %v164_v12 = vld [vmem:[%s8023_s0 + $0x128] sm:$0xff]  ;;  %v171_v58 = vld [vmem:[%s8023_s0 + $0x160] sm:$0xff] }
  0xda   :  { %4431 = vrot.lane.b32.xlu0 %v5850_v15, %s5360_s26  ;;  %229 = vst.msk [vmem:[#allocation2 + $0x201] sm:$0xff] %vm17_vm0, %v164_v12  ;;  %v491_v12 = vld [vmem:[#allocation2 + $0xa9] sm:$0xff]  ;;  %236 = vst.msk [vmem:[#allocation2 + $0x259] sm:$0xff] %vm17_vm0, %v171_v58 }
  0xdb   :  { %v6064_v4 = vpop.permute.xlu1 %4146 }
  0xdc   :  { %8124 = vst [vmem:[#allocation14_spill] sm:$0xff] %v6064_v4  ;;  %v6080_v21 = vpop.permute.xlu0 %4151 }
  0xdd   :  { %4436 = vrot.lane.b32.xlu1 %v4435_v51, %s5360_s26  ;;  %8125 = vst [vmem:[#allocation15_spill] sm:$0xff] %v6080_v21 }
  0xde   :  { %4441 = vrot.lane.b32.xlu0 %v5856_v22, %s5361_s13 }
  0xdf   :  { %v6084_v23 = vpop.permute.xlu1 %4156 }
  0xe0   :  { %8126 = vst [vmem:[#allocation16_spill] sm:$0xff] %v6084_v23  ;;  %v6090_v15 = vpop.permute.xlu0 %4161 }
  0xe1   :  { %4446 = vrot.lane.b32.xlu1 %v5859_v30, %s5361_s13 }
  0xe2   :  { %4451 = vrot.lane.b32.xlu0 %v5863_v31, %s5361_s13 }
  0xe3   :  { %v6092_v26 = vpop.permute.xlu1 %4166 }
  0xe4   :  { %v6098_v32 = vpop.permute.xlu0 %4171 }
  0xe5   :  { %4456 = vrot.lane.b32.xlu1 %v5867_v41, %s5361_s13  ;;  %8127 = vst [vmem:[#allocation17_spill] sm:$0xff] %v6098_v32 }
  0xe6   :  { %4461 = vrot.lane.b32.xlu0 %v5871_v42, %s5361_s13 }
  0xe7   :  { %v6100_v35 = vpop.permute.xlu1 %4176 }
  0xe8   :  { %8128 = vst [vmem:[#allocation18_spill] sm:$0xff] %v6100_v35  ;;  %v6106_v22 = vpop.permute.xlu0 %4181 }
  0xe9   :  { %4466 = vrot.lane.b32.xlu1 %v5875_v52, %s5361_s13  ;;  %8129 = vst [vmem:[#allocation19_spill] sm:$0xff] %v6106_v22  ;;  %v2062_v22 = vld [vmem:[#allocation2 + $0x201] sm:$0xff] }
  0xea   :  { %4471 = vrot.lane.b32.xlu0 %v5879_v55, %s5361_s13 }
  0xeb   :  { %v6108_v30 = vpop.permute.xlu1 %4186 }
  0xec   :  { %8130 = vst [vmem:[#allocation20_spill] sm:$0xff] %v6108_v30  ;;  %v6114_v31 = vpop.permute.xlu0 %4191  ;;  %v2043_v30 = vld [vmem:[#allocation2 + $0x2a0] sm:$0xff] }
  0xed   :  { %4476 = vrot.lane.b32.xlu1 %v5883_v0, %s5361_s13  ;;  %8131 = vst [vmem:[#allocation21_spill] sm:$0xff] %v6114_v31  ;;  %v479_v0 = vld [vmem:[#allocation2 + $0x198] sm:$0xff] }
  0xee   :  { %4481 = vrot.lane.b32.xlu0 %v5887_v3, %s5361_s13  ;;  %v4515_v3 = vpack.i.bf16 %v480_v38, %v479_v0  ;;  %v492_v0 = vld [vmem:[#allocation2 + $0xb1] sm:$0xff] }
  0xef   :  { %v6116_v41 = vpop.permute.xlu1 %4196  ;;  %v1865_v31 = vld [vmem:[#allocation2 + $0x1b1] sm:$0xff] }
  0xf0   :  { %8132 = vst [vmem:[#allocation22_spill] sm:$0xff] %v6116_v41  ;;  %v6122_v42 = vpop.permute.xlu0 %4201 }
  0xf1   :  { %4486 = vrot.lane.b32.xlu1 %v5891_v16, %s5361_s13  ;;  %v481_v16 = vld [vmem:[#allocation2 + $0x31] sm:$0xff] }
  0xf2   :  { %4491 = vrot.lane.b32.xlu0 %v5895_v17, %s5361_s13  ;;  %v483_v17 = vld [vmem:[#allocation2 + $0x49] sm:$0xff]  ;;  %v4520_v34 = vpack.i.bf16 %v482_v48, %v481_v16  ;;  %v4545_v16 = vpack.i.bf16 %v492_v0, %v491_v12  ;;  %v493_v48 = vld [vmem:[#allocation2 + $0xc1] sm:$0xff] }
  0xf3   :  { %v6124_v52 = vpop.permute.xlu1 %4206  ;;  %v502_v12 = vld [vmem:[#allocation2 + $0x129] sm:$0xff] }
  0xf4   :  { %v6130_v55 = vpop.permute.xlu0 %4211 }
  0xf5   :  { %4496 = vrot.lane.b32.xlu1 %v5899_v24, %s5361_s13  ;;  %8133 = vst [vmem:[#allocation23_spill] sm:$0xff] %v6130_v55 }
  0xf6   :  { %4501 = vrot.lane.b32.xlu0 %v5903_v25, %s5361_s13  ;;  %v4525_v25 = vpack.i.bf16 %v484_v33, %v483_v17  ;;  %v494_v17 = vld [vmem:[#allocation2 + $0xc9] sm:$0xff] }
  0xf7   :  { %v6132_v47 = vpop.permute.xlu1 %4216 }
  0xf8   :  { %8134 = vst [vmem:[#allocation24_spill] sm:$0xff] %v6132_v47  ;;  %v6138_v29 = vpop.permute.xlu0 %4221  ;;  %v190_v47 = vld [vmem:[%s8023_s0 + $0x1f8] sm:$0xff] }
  0xf9   :  { %4506 = vrot.lane.b32.xlu1 %v5907_v40, %s5361_s13  ;;  %8135 = vst [vmem:[#allocation25_spill] sm:$0xff] %v6138_v29  ;;  %v488_v40 = vld [vmem:[#allocation2 + $0x81] sm:$0xff]  ;;  %255 = vst.msk [vmem:[#allocation2 + $0x339] sm:$0xff] %vm17_vm0, %v190_v47 }
  0xfa   :  { %4511 = vrot.lane.b32.xlu0 %v5911_v46, %s5361_s13  ;;  %v165_v46 = vld [vmem:[%s8023_s0 + $0x130] sm:$0xff]  ;;  %v4535_v51 = vpack.i.bf16 %v488_v40, %v487_v49 }
  0xfb   :  { %v6140_v24 = vpop.permute.xlu1 %4226  ;;  %230 = vst.msk [vmem:[#allocation2 + $0x211] sm:$0xff] %vm17_vm0, %v165_v46  ;;  %v497_v40 = vld [vmem:[#allocation2 + $0xf1] sm:$0xff]  ;;  %v499_v46 = vld [vmem:[#allocation2 + $0x109] sm:$0xff] }
  0xfc   :  { %8136 = vst [vmem:[#allocation26_spill] sm:$0xff] %v6140_v24  ;;  %v6148_v7 = vpop.permute.xlu0 %4231 }
  0xfd   :  { %4516 = vrot.lane.b32.xlu1 %v4515_v3, %s5361_s13  ;;  %8137 = vst [vmem:[#allocation27_spill] sm:$0xff] %v6148_v7  ;;  %v4540_v3 = vpack.i.bf16 %v490_v19, %v489_v61  ;;  %v4565_v61 = vpack.i.bf16 %v500_v13, %v499_v46  ;;  %v501_v19 = vld [vmem:[#allocation2 + $0x121] sm:$0xff] }
  0xfe   :  { %4521 = vrot.lane.b32.xlu0 %v4520_v34, %s5362_s22  ;;  %v495_v34 = vld [vmem:[#allocation2 + $0xd9] sm:$0xff] }
  0xff   :  { %v6160_v50 = vpop.permute.xlu1 %4236  ;;  %v4555_v49 = vpack.i.bf16 %v496_v39, %v495_v34  ;;  %v505_v39 = vld [vmem:[#allocation2 + $0x151] sm:$0xff] }
 0x100   :  { %8138 = vst [vmem:[#allocation28_spill] sm:$0xff] %v6160_v50  ;;  %v6167_v5 = vpop.permute.xlu0 %4241 }
 0x101   :  { %4526 = vrot.lane.b32.xlu1 %v4525_v25, %s5362_s22  ;;  %v4550_v25 = vpack.i.bf16 %v494_v17, %v493_v48  ;;  %v4570_v17 = vpack.i.bf16 %v502_v12, %v501_v19  ;;  %v512_v19 = vld [vmem:[#allocation2 + $0x1a1] sm:$0xff] }
 0x102   :  { %4531 = vrot.lane.b32.xlu0 %v4530_v11, %s5362_s22  ;;  %v2095_v47 = vld [vmem:[#allocation2 + $0x212] sm:$0xff] }
 0x103   :  { %v6169_v38 = vpop.permute.xlu1 %4246 }
 0x104   :  { %v6173_v33 = vpop.permute.xlu0 %4251 }
 0x105   :  { %4536 = vrot.lane.b32.xlu1 %v4535_v51, %s5362_s22  ;;  %8139 = vst [vmem:[#allocation29_spill] sm:$0xff] %v6173_v33  ;;  %v4560_v51 = vpack.i.bf16 %v498_v1, %v497_v40  ;;  %v508_v1 = vld [vmem:[#allocation2 + $0x171] sm:$0xff] }
 0x106   :  { %4541 = vrot.lane.b32.xlu0 %v4540_v3, %s5362_s22  ;;  %v503_v3 = vld [vmem:[#allocation2 + $0x139] sm:$0xff] }
 0x107   :  { %v6175_v59 = vpop.permute.xlu1 %4256 }
 0x108   :  { %8140 = vst [vmem:[#allocation30_spill] sm:$0xff] %v6175_v59  ;;  %v6179_v8 = vpop.permute.xlu0 %4261  ;;  %v189_v59 = vld [vmem:[%s8023_s0 + $0x1f0] sm:$0xff] }
 0x109   :  { %4546 = vrot.lane.b32.xlu1 %v4545_v16, %s5362_s22  ;;  %8141 = vst [vmem:[#allocation31_spill] sm:$0xff] %v6179_v8  ;;  %v504_v16 = vld [vmem:[#allocation2 + $0x141] sm:$0xff]  ;;  %254 = vst.msk [vmem:[#allocation2 + $0x331] sm:$0xff] %vm17_vm0, %v189_v59 }
 0x10a   :  { %4551 = vrot.lane.b32.xlu0 %v4550_v25, %s5362_s22  ;;  %v4575_v34 = vpack.i.bf16 %v504_v16, %v503_v3  ;;  %v506_v25 = vld [vmem:[#allocation2 + $0x159] sm:$0xff] }
 0x10b   :  { %v6181_v11 = vpop.permute.xlu1 %4266  ;;  %v4580_v13 = vpack.i.bf16 %v506_v25, %v505_v39  ;;  %v513_v3 = vld [vmem:[#allocation2 + $0x32] sm:$0xff]  ;;  %v514_v16 = vld [vmem:[#allocation2 + $0x3a] sm:$0xff] }
 0x10c   :  { %8142 = vst [vmem:[#allocation32_spill] sm:$0xff] %v6181_v11  ;;  %v6185_v0 = vpop.permute.xlu0 %4271  ;;  %v516_v39 = vld [vmem:[#allocation2 + $0x52] sm:$0xff]  ;;  %v2010_v11 = vld [vmem:[#allocation2 + $0x28a] sm:$0xff] }
 0x10d   :  { %4556 = vrot.lane.b32.xlu1 %v4555_v49, %s5362_s22  ;;  %8143 = vst [vmem:[#allocation33_spill] sm:$0xff] %v6185_v0  ;;  %v507_v49 = vld [vmem:[#allocation2 + $0x169] sm:$0xff]  ;;  %v1882_v0 = vld [vmem:[#allocation2 + $0x279] sm:$0xff] }
 0x10e   :  { %4561 = vrot.lane.b32.xlu0 %v4560_v51, %s5362_s22  ;;  %v511_v51 = vld [vmem:[#allocation2 + $0x199] sm:$0xff] }
 0x10f   :  { %v6187_v48 = vpop.permute.xlu1 %4276  ;;  %v4595_v12 = vpack.i.bf16 %v512_v19, %v511_v51  ;;  %v520_v51 = vld [vmem:[#allocation2 + $0x82] sm:$0xff] }
 0x110   :  { %8144 = vst [vmem:[#allocation34_spill] sm:$0xff] %v6187_v48  ;;  %v6191_v40 = vpop.permute.xlu0 %4281  ;;  %v4585_v48 = vpack.i.bf16 %v508_v1, %v507_v49  ;;  %v517_v1 = vld [vmem:[#allocation2 + $0x62] sm:$0xff] }
 0x111   :  { %4566 = vrot.lane.b32.xlu1 %v4565_v61, %s5362_s22  ;;  %v183_v19 = vld [vmem:[%s8023_s0 + $0x1c0] sm:$0xff] }
 0x112   :  { %4571 = vrot.lane.b32.xlu0 %v4570_v17, %s5362_s22  ;;  %v515_v17 = vld [vmem:[#allocation2 + $0x4a] sm:$0xff]  ;;  %248 = vst.msk [vmem:[#allocation2 + $0x2e9] sm:$0xff] %vm17_vm0, %v183_v19 }
 0x113   :  { %v6193_v46 = vpop.permute.xlu1 %4286  ;;  %v4605_v49 = vpack.i.bf16 %v516_v39, %v515_v17  ;;  %v522_v17 = vld [vmem:[#allocation2 + $0x9a] sm:$0xff] }
 0x114   :  { %v6197_v50 = vpop.permute.xlu0 %4291  ;;  %v167_v39 = vld [vmem:[%s8023_s0 + $0x140] sm:$0xff] }
 0x115   :  { %4576 = vrot.lane.b32.xlu1 %v4575_v34, %s5362_s22  ;;  %8145 = vst [vmem:[#allocation35_spill] sm:$0xff] %v6197_v50  ;;  %v4600_v34 = vpack.i.bf16 %v514_v16, %v513_v3  ;;  %v521_v16 = vld [vmem:[#allocation2 + $0x92] sm:$0xff]  ;;  %232 = vst.msk [vmem:[#allocation2 + $0x229] sm:$0xff] %vm17_vm0, %v167_v39 }
 0x116   :  { %4581 = vrot.lane.b32.xlu0 %v4580_v13, %s5362_s22  ;;  %v518_v13 = vld [vmem:[#allocation2 + $0x6a] sm:$0xff] }
 0x117   :  { %v6199_v61 = vpop.permute.xlu1 %4296 }
 0x118   :  { %8146 = vst [vmem:[#allocation36_spill] sm:$0xff] %v6199_v61  ;;  %v6203_v41 = vpop.permute.xlu0 %4301 }
 0x119   :  { %4586 = vrot.lane.b32.xlu1 %v4585_v48, %s5362_s22  ;;  %8147 = vst [vmem:[#allocation37_spill] sm:$0xff] %v6203_v41  ;;  %v519_v48 = vld [vmem:[#allocation2 + $0x7a] sm:$0xff]  ;;  %v2081_v33 = vld [vmem:[#allocation2 + $0x2e9] sm:$0xff] }
 0x11a   :  { %4591 = vrot.lane.b32.xlu0 %v5977_v60, %s5362_s22  ;;  %v184_v60 = vld [vmem:[%s8023_s0 + $0x1c8] sm:$0xff]  ;;  %v4615_v3 = vpack.i.bf16 %v520_v51, %v519_v48  ;;  %v2046_v41 = vld [vmem:[#allocation2 + $0x2c0] sm:$0xff] }
 0x11b   :  { %v6205_v25 = vpop.permute.xlu1 %4306  ;;  %249 = vst.msk [vmem:[#allocation2 + $0x2f1] sm:$0xff] %vm17_vm0, %v184_v60  ;;  %v525_v48 = vld [vmem:[#allocation2 + $0xc2] sm:$0xff]  ;;  %v526_v51 = vld [vmem:[#allocation2 + $0xca] sm:$0xff] }
 0x11c   :  { %8148 = vst [vmem:[#allocation38_spill] sm:$0xff] %v6205_v25  ;;  %v6210_v23 = vpop.permute.xlu0 %4311  ;;  %v1881_v60 = vld [vmem:[#allocation2 + $0x271] sm:$0xff]  ;;  %v4630_v39 = vpack.i.bf16 %v526_v51, %v525_v48 }
 0x11d   :  { %4596 = vrot.lane.b32.xlu1 %v4595_v12, %s5362_s22  ;;  %8149 = vst [vmem:[#allocation39_spill] sm:$0xff] %v6210_v23  ;;  %v4610_v12 = vpack.i.bf16 %v518_v13, %v517_v1  ;;  %v524_v23 = vld [vmem:[#allocation2 + $0xb2] sm:$0xff] }
 0x11e   :  { %4601 = vrot.lane.b32.xlu0 %v4600_v34, %s5363_s5  ;;  %v168_v34 = vld [vmem:[%s8023_s0 + $0x148] sm:$0xff]  ;;  %v4625_v13 = vpack.i.bf16 %v524_v23, %v523_v63  ;;  %v1914_v63 = vld [vmem:[#allocation2 + $0x27a] sm:$0xff] }
 0x11f   :  { %v6215_v36 = vpop.permute.xlu1 %4316  ;;  %233 = vst.msk [vmem:[#allocation2 + $0x231] sm:$0xff] %vm17_vm0, %v168_v34  ;;  %v4635_v34 = vpack.i.bf16 %v1882_v0, %v1881_v60  ;;  %v1947_v0 = vld [vmem:[#allocation2 + $0x290] sm:$0xff] }
 0x120   :  { %8150 = vst [vmem:[#allocation40_spill] sm:$0xff] %v6215_v36  ;;  %v6227_v36 = vpop.permute.xlu0 %4321 }
 0x121   :  { %4606 = vrot.lane.b32.xlu1 %v4605_v49, %s5363_s5  ;;  %v4620_v49 = vpack.i.bf16 %v522_v17, %v521_v16 }
 0x122   :  { %4611 = vrot.lane.b32.xlu0 %v4610_v12, %s5363_s5  ;;  %v1866_v12 = vld [vmem:[#allocation2 + $0x1b9] sm:$0xff] }
 0x123   :  { %v6233_v1 = vpop.permute.xlu1 %4326  ;;  %v4640_v17 = vpack.i.bf16 %v1866_v12, %v1865_v31  ;;  %v1979_v12 = vld [vmem:[#allocation2 + $0x291] sm:$0xff] }
 0x124   :  { %v6238_v19 = vpop.permute.xlu0 %4331 }
 0x125   :  { %4616 = vrot.lane.b32.xlu1 %v4615_v3, %s5363_s5  ;;  %8151 = vst [vmem:[#allocation41_spill] sm:$0xff] %v6238_v19  ;;  %v1913_v3 = vld [vmem:[#allocation2 + $0x272] sm:$0xff] }
 0x126   :  { %4621 = vrot.lane.b32.xlu0 %v4620_v49, %s5363_s5  ;;  %v4645_v21 = vpack.i.bf16 %v1914_v63, %v1913_v3  ;;  %v1898_v49 = vld [vmem:[#allocation2 + $0x1ba] sm:$0xff]  ;;  %v2034_v50 = vld [vmem:[#allocation2 + $0x230] sm:$0xff] }
 0x127   :  { %v6240_v7 = vpop.permute.xlu1 %4336  ;;  %v4650_v60 = vpack.i.bf16 %v1898_v49, %v1897_v28  ;;  %v1963_v49 = vld [vmem:[#allocation2 + $0x1d1] sm:$0xff] }
 0x128   :  { %8152 = vst [vmem:[#allocation42_spill] sm:$0xff] %v6240_v7  ;;  %v6244_v16 = vpop.permute.xlu0 %4341  ;;  %v2094_v7 = vld [vmem:[#allocation2 + $0x202] sm:$0xff]  ;;  %v2097_v2 = vld [vmem:[#allocation2 + $0x22a] sm:$0xff] }
 0x129   :  { %4626 = vrot.lane.b32.xlu1 %v4625_v13, %s5363_s5  ;;  %8153 = vst [vmem:[#allocation43_spill] sm:$0xff] %v6244_v16  ;;  %v1946_v13 = vld [vmem:[#allocation2 + $0x288] sm:$0xff] }
 0x12a   :  { %4631 = vrot.lane.b32.xlu0 %v4630_v39, %s5363_s5  ;;  %v4655_v62 = vpack.i.bf16 %v1947_v0, %v1946_v13  ;;  %v1931_v39 = vld [vmem:[#allocation2 + $0x1d0] sm:$0xff] }
 0x12b   :  { %v6246_v23 = vpop.permute.xlu1 %4346 }
 0x12c   :  { %8154 = vst [vmem:[#allocation44_spill] sm:$0xff] %v6246_v23  ;;  %v6250_v48 = vpop.permute.xlu0 %4351  ;;  %v1930_v23 = vld [vmem:[#allocation2 + $0x1c8] sm:$0xff] }
 0x12d   :  { %4636 = vrot.lane.b32.xlu1 %v4635_v34, %s5356_s7  ;;  %8155 = vst [vmem:[#allocation45_spill] sm:$0xff] %v6250_v48  ;;  %v1978_v34 = vld [vmem:[#allocation2 + $0x289] sm:$0xff]  ;;  %v4660_v63 = vpack.i.bf16 %v1931_v39, %v1930_v23  ;;  %v529_v48 = vld [vmem:[#allocation2 + $0xf2] sm:$0xff] }
 0x12e   :  { %4641 = vrot.lane.b32.xlu0 %v4640_v17, %s5356_s7  ;;  %v530_v17 = vld [vmem:[#allocation2 + $0xfa] sm:$0xff]  ;;  %v1995_v39 = vld [vmem:[#allocation2 + $0x1d2] sm:$0xff] }
 0x12f   :  { %v6252_v51 = vpop.permute.xlu1 %4356  ;;  %v4670_v0 = vpack.i.bf16 %v530_v17, %v529_v48  ;;  %v2027_v17 = vld [vmem:[#allocation2 + $0x1e0] sm:$0xff] }
 0x130   :  { %8156 = vst [vmem:[#allocation46_spill] sm:$0xff] %v6252_v51  ;;  %v6256_v31 = vpop.permute.xlu0 %4361  ;;  %v4665_v51 = vpack.i.bf16 %v1979_v12, %v1978_v34 }
 0x131   :  { %4646 = vrot.lane.b32.xlu1 %v4645_v21, %s5357_s28  ;;  %v1962_v21 = vld [vmem:[#allocation2 + $0x1c9] sm:$0xff] }
 0x132   :  { %4651 = vrot.lane.b32.xlu0 %v4650_v60, %s5357_s28  ;;  %v4675_v25 = vpack.i.bf16 %v1963_v49, %v1962_v21  ;;  %v2011_v60 = vld [vmem:[#allocation2 + $0x292] sm:$0xff]  ;;  %v2028_v21 = vld [vmem:[#allocation2 + $0x1e8] sm:$0xff] }
 0x133   :  { %v6258_v3 = vpop.permute.xlu1 %4366  ;;  %v4680_v12 = vpack.i.bf16 %v2011_v60, %v2010_v11  ;;  %v2059_v11 = vld [vmem:[#allocation2 + $0x1e1] sm:$0xff]  ;;  %v2060_v60 = vld [vmem:[#allocation2 + $0x1e9] sm:$0xff] }
 0x134   :  { %v6262_v28 = vpop.permute.xlu0 %4371 }
 0x135   :  { %4656 = vrot.lane.b32.xlu1 %v4655_v62, %s5358_s29  ;;  %8157 = vst [vmem:[#allocation47_spill] sm:$0xff] %v6262_v28  ;;  %v1994_v62 = vld [vmem:[#allocation2 + $0x1ca] sm:$0xff] }
 0x136   :  { %4661 = vrot.lane.b32.xlu0 %v4660_v63, %s5358_s29  ;;  %v4685_v24 = vpack.i.bf16 %v1995_v39, %v1994_v62  ;;  %v2044_v63 = vld [vmem:[#allocation2 + $0x2a8] sm:$0xff]  ;;  %v185_v62 = vld [vmem:[%s8023_s0 + $0x1d0] sm:$0xff] }
 0x137   :  { %v6264_v13 = vpop.permute.xlu1 %4376  ;;  %v4690_v4 = vpack.i.bf16 %v2044_v63, %v2043_v30  ;;  %250 = vst.msk [vmem:[#allocation2 + $0x301] sm:$0xff] %vm17_vm0, %v185_v62  ;;  %v169_v30 = vld [vmem:[%s8023_s0 + $0x150] sm:$0xff]  ;;  %v170_v63 = vld [vmem:[%s8023_s0 + $0x158] sm:$0xff]  ;;  %v6304_v62 = vpack.i.bf16 %v2060_v60, %v2059_v11 }
 0x138   :  { %8158 = vst [vmem:[#allocation48_spill] sm:$0xff] %v6264_v13  ;;  %v6268_v23 = vpop.permute.xlu0 %4381  ;;  %234 = vst.msk [vmem:[#allocation2 + $0x241] sm:$0xff] %vm17_vm0, %v169_v30  ;;  %v2093_v13 = vld [vmem:[#allocation2 + $0x1fa] sm:$0xff] }
 0x139   :  { %4666 = vrot.lane.b32.xlu1 %v4665_v51, %s5359_s30  ;;  %8159 = vst [vmem:[#allocation49_spill] sm:$0xff] %v6268_v23  ;;  %v2076_v23 = vld [vmem:[#allocation2 + $0x2a9] sm:$0xff]  ;;  %235 = vst.msk [vmem:[#allocation2 + $0x249] sm:$0xff] %vm17_vm0, %v170_v63  ;;  %v6403_v58 = vpack.i.bf16 %v2094_v7, %v2093_v13 }
 0x13a   :  { %4671 = vrot.lane.b32.xlu0 %v4670_v0, %s5363_s5  ;;  %v4695_v0 = vpack.i.bf16 %v2028_v21, %v2027_v17  ;;  %v6301_v21 = vpack.i.bf16 %v2076_v23, %v2075_v27  ;;  %v2091_v27 = vld [vmem:[#allocation2 + $0x1e2] sm:$0xff]  ;;  %v2092_v23 = vld [vmem:[#allocation2 + $0x1ea] sm:$0xff] }
 0x13b   :  { %v6270_v34 = vpop.permute.xlu1 %4386  ;;  %v6322_v60 = vpack.i.bf16 %v2092_v23, %v2091_v27  ;;  %v532_v23 = vld [vmem:[#allocation2 + $0x112] sm:$0xff] }
 0x13c   :  { %8160 = vst [vmem:[#allocation50_spill] sm:$0xff] %v6270_v34  ;;  %v6274_v48 = vpop.permute.xlu0 %4391  ;;  %v2108_v34 = vld [vmem:[#allocation2 + $0x2aa] sm:$0xff] }
 0x13d   :  { %4676 = vrot.lane.b32.xlu1 %v4675_v25, %s5359_s30  ;;  %8161 = vst [vmem:[#allocation51_spill] sm:$0xff] %v6274_v48  ;;  %v2107_v48 = vld [vmem:[#allocation2 + $0x2a2] sm:$0xff] }
 0x13e   :  { %4681 = vrot.lane.b32.xlu0 %v4680_v12, %s5360_s26 }
 0x13f   :  { %v6276_v49 = vpop.permute.xlu1 %4396 }
 0x140   :  { %8162 = vst [vmem:[#allocation52_spill] sm:$0xff] %v6276_v49  ;;  %v6283_v39 = vpop.permute.xlu0 %4401  ;;  %v186_v49 = vld [vmem:[%s8023_s0 + $0x1d8] sm:$0xff] }
 0x141   :  { %4686 = vrot.lane.b32.xlu1 %v4685_v24, %s5360_s26  ;;  %251 = vst.msk [vmem:[#allocation2 + $0x309] sm:$0xff] %vm17_vm0, %v186_v49  ;;  %v6312_v49 = vpack.i.bf16 %v2108_v34, %v2107_v48 }
 0x142   :  { %4691 = vrot.lane.b32.xlu0 %v4690_v4, %s5361_s13 }
 0x143   :  { %v6295_v17 = vpop.permute.xlu1 %4406 }
 0x144   :  { %v6306_v57 = vpop.permute.xlu0 %4411 }
 0x145   :  { %4696 = vrot.lane.b32.xlu1 %v4695_v0, %s5361_s13  ;;  %8163 = vst [vmem:[#allocation53_spill] sm:$0xff] %v6306_v57  ;;  %v5324_v57 = vld [vmem:[#allocation2 + $0x30] sm:$0xff] }
 0x146   :  { %4701 = vrot.lane.b32.xlu0 %v6301_v21, %s5362_s22 }
 0x147   :  { %v6308_v16 = vpop.permute.xlu1 %4416 }
 0x148   :  { %8164 = vst [vmem:[#allocation54_spill] sm:$0xff] %v6308_v16  ;;  %v6316_v30 = vpop.permute.xlu0 %4421 }
 0x149   :  { %4706 = vrot.lane.b32.xlu1 %v6304_v62, %s5362_s22  ;;  %8165 = vst [vmem:[#allocation55_spill] sm:$0xff] %v6316_v30 }
 0x14a   :  { %4711 = vrot.lane.b32.xlu0 %v6312_v49, %s5363_s5 }
 0x14b   :  { %v6318_v11 = vpop.permute.xlu1 %4426 }
 0x14c   :  { %8166 = vst [vmem:[#allocation56_spill] sm:$0xff] %v6318_v11  ;;  %v6325_v63 = vpop.permute.xlu0 %4431 }
 0x14d   :  { %4716 = vrot.lane.b32.xlu1 %v4665_v51, %s5356_s7  ;;  %8167 = vst [vmem:[#allocation57_spill] sm:$0xff] %v6325_v63  ;;  %v531_v51 = vld [vmem:[#allocation2 + $0x10a] sm:$0xff] }
 0x14e   :  { %4721 = vrot.lane.b32.xlu0 %v6322_v60, %s5363_s5 }
 0x14f   :  { %v6327_v34 = vpop.permute.xlu1 %4436 }
 0x150   :  { %8168 = vst [vmem:[#allocation58_spill] sm:$0xff] %v6327_v34  ;;  %v6332_v48 = vpop.permute.xlu0 %4441  ;;  %v4755_v34 = vpack.i.bf16 %v532_v23, %v531_v51  ;;  %v2030_v51 = vld [vmem:[#allocation2 + $0x200] sm:$0xff] }
 0x151   :  { %4726 = vrot.lane.b32.xlu1 %v4675_v25, %s5356_s7 }
 0x152   :  { %4731 = vrot.lane.b32.xlu0 %v4680_v12, %s5357_s28  ;;  %v2045_v12 = vld [vmem:[#allocation2 + $0x2b8] sm:$0xff] }
 0x153   :  { %v6334_v30 = vpop.permute.xlu1 %4446 }
 0x154   :  { %v6338_v27 = vpop.permute.xlu0 %4451 }
 0x155   :  { %4736 = vrot.lane.b32.xlu1 %v4685_v24, %s5357_s28  ;;  %8169 = vst [vmem:[#allocation59_spill] sm:$0xff] %v6338_v27 }
 0x156   :  { %4741 = vrot.lane.b32.xlu0 %v4690_v4, %s5358_s29  ;;  %v4775_v4 = vpack.i.bf16 %v2046_v41, %v2045_v12  ;;  %v2061_v12 = vld [vmem:[#allocation2 + $0x1f9] sm:$0xff] }
 0x157   :  { %v6340_v63 = vpop.permute.xlu1 %4456 }
 0x158   :  { %8170 = vst [vmem:[#allocation60_spill] sm:$0xff] %v6340_v63  ;;  %v6344_v25 = vpop.permute.xlu0 %4461  ;;  %v172_v63 = vld [vmem:[%s8023_s0 + $0x168] sm:$0xff] }
 0x159   :  { %4746 = vrot.lane.b32.xlu1 %v4695_v0, %s5358_s29  ;;  %8171 = vst [vmem:[#allocation61_spill] sm:$0xff] %v6344_v25  ;;  %v2029_v0 = vld [vmem:[#allocation2 + $0x1f8] sm:$0xff]  ;;  %v2078_v25 = vld [vmem:[#allocation2 + $0x2c1] sm:$0xff]  ;;  %237 = vst.msk [vmem:[#allocation2 + $0x261] sm:$0xff] %vm17_vm0, %v172_v63 }
 0x15a   :  { %4751 = vrot.lane.b32.xlu0 %v6301_v21, %s5359_s30  ;;  %v4780_v41 = vpack.i.bf16 %v2030_v51, %v2029_v0  ;;  %v2109_v0 = vld [vmem:[#allocation2 + $0x2ba] sm:$0xff]  ;;  %v2110_v51 = vld [vmem:[#allocation2 + $0x2c2] sm:$0xff] }
 0x15b   :  { %v6346_v11 = vpop.permute.xlu1 %4466 }
 0x15c   :  { %8172 = vst [vmem:[#allocation62_spill] sm:$0xff] %v6346_v11  ;;  %v6351_v24 = vpop.permute.xlu0 %4471  ;;  %v2077_v11 = vld [vmem:[#allocation2 + $0x2b9] sm:$0xff] }
 0x15d   :  { %4756 = vrot.lane.b32.xlu1 %v4755_v34, %s5363_s5  ;;  %8173 = vst [vmem:[#allocation63_spill] sm:$0xff] %v6351_v24  ;;  %v187_v24 = vld [vmem:[%s8023_s0 + $0x1e0] sm:$0xff]  ;;  %v6374_v29 = vpack.i.bf16 %v2078_v25, %v2077_v11  ;;  %v6389_v11 = vpack.i.bf16 %v2062_v22, %v2061_v12  ;;  %v6393_v25 = vpack.i.bf16 %v2110_v51, %v2109_v0  ;;  %v534_v51 = vld [vmem:[#allocation2 + $0x12a] sm:$0xff] }
 0x15e   :  { %4761 = vrot.lane.b32.xlu0 %v6304_v62, %s5359_s30  ;;  %252 = vst.msk [vmem:[#allocation2 + $0x319] sm:$0xff] %vm17_vm0, %v187_v24 }
 0x15f   :  { %v6353_v8 = vpop.permute.xlu1 %4476 }
 0x160   :  { %8174 = vst [vmem:[#allocation64_spill] sm:$0xff] %v6353_v8  ;;  %v6359_v23 = vpop.permute.xlu0 %4481  ;;  %v188_v8 = vld [vmem:[%s8023_s0 + $0x1e8] sm:$0xff] }
 0x161   :  { %4766 = vrot.lane.b32.xlu1 %v6312_v49, %s5360_s26  ;;  %253 = vst.msk [vmem:[#allocation2 + $0x321] sm:$0xff] %vm17_vm0, %v188_v8 }
 0x162   :  { %4771 = vrot.lane.b32.xlu0 %v6322_v60, %s5360_s26 }
 0x163   :  { %v6361_v34 = vpop.permute.xlu1 %4486 }
 0x164   :  { %v6382_v16 = vpop.permute.xlu0 %4491 }
 0x165   :  { %4776 = vrot.lane.b32.xlu1 %v4775_v4, %s5361_s13  ;;  %8175 = vst [vmem:[#allocation65_spill] sm:$0xff] %v6382_v16 }
 0x166   :  { %4781 = vrot.lane.b32.xlu0 %v4780_v41, %s5361_s13 }
 0x167   :  { %v6386_v8 = vpop.permute.xlu1 %4496 }
 0x168   :  { %8176 = vst [vmem:[#allocation66_spill] sm:$0xff] %v6386_v8  ;;  %v6395_v24 = vpop.permute.xlu0 %4501  ;;  %v2064_v8 = vld [vmem:[#allocation2 + $0x219] sm:$0xff] }
 0x169   :  { %4786 = vrot.lane.b32.xlu1 %v6374_v29, %s5362_s22  ;;  %8177 = vst [vmem:[#allocation67_spill] sm:$0xff] %v6395_v24  ;;  %v2032_v24 = vld [vmem:[#allocation2 + $0x218] sm:$0xff] }
 0x16a   :  { %4791 = vrot.lane.b32.xlu0 %v6389_v11, %s5362_s22 }
 0x16b   :  { %v6397_v61 = vpop.permute.xlu1 %4506 }
 0x16c   :  { %8178 = vst [vmem:[#allocation68_spill] sm:$0xff] %v6397_v61  ;;  %v6405_v22 = vpop.permute.xlu0 %4511 }
 0x16d   :  { %4796 = vrot.lane.b32.xlu1 %v6393_v25, %s5363_s5  ;;  %8179 = vst [vmem:[#allocation69_spill] sm:$0xff] %v6405_v22 }
 0x16e   :  { %4801 = vrot.lane.b32.xlu0 %v6301_v21, %s5356_s7  ;;  %v533_v21 = vld [vmem:[#allocation2 + $0x122] sm:$0xff] }
 0x16f   :  { %v6407_v63 = vpop.permute.xlu1 %4516 }
 0x170   :  { %8180 = vst [vmem:[#allocation70_spill] sm:$0xff] %v6407_v63  ;;  %v6413_v12 = vpop.permute.xlu0 %4521 }
 0x171   :  { %4806 = vrot.lane.b32.xlu1 %v6403_v58, %s5363_s5 }
 0x172   :  { %4811 = vrot.lane.b32.xlu0 %v6304_v62, %s5356_s7  ;;  %v4840_v62 = vpack.i.bf16 %v534_v51, %v533_v21 }
 0x173   :  { %v6415_v0 = vpop.permute.xlu1 %4526 }
 0x174   :  { %v6421_v7 = vpop.permute.xlu0 %4531 }
 0x175   :  { %4816 = vrot.lane.b32.xlu1 %v6312_v49, %s5357_s28  ;;  %8181 = vst [vmem:[#allocation71_spill] sm:$0xff] %v6421_v7  ;;  %v4084_v7 = vunpack.i.h.bf16 %v6011_v6 }
 0x176   :  { %4821 = vrot.lane.b32.xlu0 %v6322_v60, %s5357_s28  ;;  %v2047_v60 = vld [vmem:[#allocation2 + $0x2d0] sm:$0xff] }
 0x177   :  { %v6423_v13 = vpop.permute.xlu1 %4536 }
 0x178   :  { %8182 = vst [vmem:[#allocation72_spill] sm:$0xff] %v6423_v13  ;;  %v6428_v63 = vpop.permute.xlu0 %4541 }
 0x179   :  { %4826 = vrot.lane.b32.xlu1 %v4775_v4, %s5358_s29  ;;  %8183 = vst [vmem:[#allocation73_spill] sm:$0xff] %v6428_v63  ;;  %v2048_v4 = vld [vmem:[#allocation2 + $0x2d8] sm:$0xff] }
 0x17a   :  { %4831 = vrot.lane.b32.xlu0 %v4780_v41, %s5358_s29  ;;  %v4860_v21 = vpack.i.bf16 %v2048_v4, %v2047_v60  ;;  %v2111_v60 = vld [vmem:[#allocation2 + $0x2d2] sm:$0xff]  ;;  %v2112_v4 = vld [vmem:[#allocation2 + $0x2da] sm:$0xff] }
 0x17b   :  { %v6430_v22 = vpop.permute.xlu1 %4546  ;;  %v6474_v59 = vpack.i.bf16 %v2112_v4, %v2111_v60 }
 0x17c   :  { %8184 = vst [vmem:[#allocation74_spill] sm:$0xff] %v6430_v22  ;;  %v6435_v49 = vpop.permute.xlu0 %4551  ;;  %v2031_v22 = vld [vmem:[#allocation2 + $0x210] sm:$0xff] }
 0x17d   :  { %4836 = vrot.lane.b32.xlu1 %v6374_v29, %s5359_s30  ;;  %8185 = vst [vmem:[#allocation75_spill] sm:$0xff] %v6435_v49  ;;  %v4865_v51 = vpack.i.bf16 %v2032_v24, %v2031_v22  ;;  %v2063_v49 = vld [vmem:[#allocation2 + $0x211] sm:$0xff] }
 0x17e   :  { %4841 = vrot.lane.b32.xlu0 %v4840_v62, %s5363_s5  ;;  %v2079_v62 = vld [vmem:[#allocation2 + $0x2d1] sm:$0xff]  ;;  %v6466_v22 = vpack.i.bf16 %v2064_v8, %v2063_v49 }
 0x17f   :  { %v6437_v61 = vpop.permute.xlu1 %4556 }
 0x180   :  { %8186 = vst [vmem:[#allocation76_spill] sm:$0xff] %v6437_v61  ;;  %v6442_v63 = vpop.permute.xlu0 %4561  ;;  %v2080_v61 = vld [vmem:[#allocation2 + $0x2d9] sm:$0xff] }
 0x181   :  { %4846 = vrot.lane.b32.xlu1 %v6389_v11, %s5359_s30  ;;  %v6463_v24 = vpack.i.bf16 %v2080_v61, %v2079_v62  ;;  %v2096_v61 = vld [vmem:[#allocation2 + $0x21a] sm:$0xff] }
 0x182   :  { %4851 = vrot.lane.b32.xlu0 %v6393_v25, %s5360_s26  ;;  %v6484_v49 = vpack.i.bf16 %v2096_v61, %v2095_v47  ;;  %v4044_v47 = vunpack.i.h.bf16 %v5961_v43  ;;  %v4043_v61 = vunpack.i.l.bf16 %v5961_v43  ;;  %v4089_v43 = vunpack.i.h.bf16 %v6013_v14 }
 0x183   :  { %v6444_v41 = vpop.permute.xlu1 %4566 }
 0x184   :  { %v6450_v13 = vpop.permute.xlu0 %4571 }
 0x185   :  { %4856 = vrot.lane.b32.xlu1 %v6403_v58, %s5360_s26  ;;  %8187 = vst [vmem:[#allocation77_spill] sm:$0xff] %v6450_v13  ;;  %v4049_v13 = vunpack.i.h.bf16 %v5969_v54 }
 0x186   :  { %4861 = vrot.lane.b32.xlu0 %v4860_v21, %s5361_s13 }
 0x187   :  { %v6458_v35 = vpop.permute.xlu1 %4576 }
 0x188   :  { %8188 = vst [vmem:[#allocation78_spill] sm:$0xff] %v6458_v35  ;;  %v6468_v18 = vpop.permute.xlu0 %4581  ;;  %v535_v35 = vld [vmem:[#allocation2 + $0x13a] sm:$0xff] }
 0x189   :  { %4866 = vrot.lane.b32.xlu1 %v4865_v51, %s5361_s13  ;;  %8189 = vst [vmem:[#allocation79_spill] sm:$0xff] %v6468_v18  ;;  %v4053_v18 = vunpack.i.l.bf16 %v5963_v53 }
 0x18a   :  { %4871 = vrot.lane.b32.xlu0 %v6463_v24, %s5362_s22 }
 0x18b   :  { %v6470_v20 = vpop.permute.xlu1 %4586 }
 0x18c   :  { %8190 = vst [vmem:[#allocation80_spill] sm:$0xff] %v6470_v20  ;;  %v6478_v62 = vpop.permute.xlu0 %4591 }
 0x18d   :  { %4876 = vrot.lane.b32.xlu1 %v6466_v22, %s5362_s22  ;;  %8191 = vst [vmem:[#allocation81_spill] sm:$0xff] %v6478_v62  ;;  %v4054_v62 = vunpack.i.h.bf16 %v5963_v53 }
 0x18e   :  { %4881 = vrot.lane.b32.xlu0 %v6474_v59, %s5363_s5 }
 0x18f   :  { %v6480_v8 = vpop.permute.xlu1 %4596 }
 0x190   :  { %8192 = vst [vmem:[#allocation82_spill] sm:$0xff] %v6480_v8  ;;  %v6488_v20 = vpop.permute.xlu0 %4601 }
 0x191   :  { %4886 = vrot.lane.b32.xlu1 %v6374_v29, %s5356_s7  ;;  %v257_v29 = vld [vmem:[#allocation2 + $0x8] sm:$0xff] }
 0x192   :  { %4891 = vrot.lane.b32.xlu0 %v6484_v49, %s5363_s5  ;;  %v1570_v53 = vsel %vm17_vm0, %v257_v29, %v4044_v47  ;;  %v5326_v47 = vld [vmem:[#allocation2 + $0x18] sm:$0xff] }
 0x193   :  { %v6490_v60 = vpop.permute.xlu1 %4606 }
 0x194   :  { %v6496_v4 = vpop.permute.xlu0 %4611 }
 0x195   :  { %4896 = vrot.lane.b32.xlu1 %v6389_v11, %s5356_s7  ;;  %8193 = vst [vmem:[#allocation83_spill] sm:$0xff] %v6496_v4  ;;  %v536_v4 = vld [vmem:[#allocation2 + $0x142] sm:$0xff] }
 0x196   :  { %4901 = vrot.lane.b32.xlu0 %v6393_v25, %s5357_s28  ;;  %v4048_v25 = vunpack.i.l.bf16 %v5969_v54  ;;  %v4925_v54 = vpack.i.bf16 %v536_v4, %v535_v35 }
 0x197   :  { %v6498_v8 = vpop.permute.xlu1 %4616 }
 0x198   :  { %8194 = vst [vmem:[#allocation84_spill] sm:$0xff] %v6498_v8  ;;  %v6508_v11 = vpop.permute.xlu0 %4621  ;;  %v256_v8 = vld [vmem:[#allocation2] sm:$0xff] }
 0x199   :  { %4906 = vrot.lane.b32.xlu1 %v6403_v58, %s5357_s28  ;;  %8195 = vst [vmem:[#allocation85_spill] sm:$0xff] %v6508_v11  ;;  %v4083_v58 = vunpack.i.l.bf16 %v6011_v6  ;;  %v4088_v11 = vunpack.i.l.bf16 %v6013_v14  ;;  %v1569_v27 = vsel %vm17_vm0, %v256_v8, %v4043_v61  ;;  %v5325_v6 = vld [vmem:[#allocation2 + $0x38] sm:$0xff]  ;;  %v6532_v14 = vsel %vm17_vm0, %v5326_v47, %v4048_v25  ;;  %v5330_v61 = vld [vmem:[#allocation2 + $0xe0] sm:$0xff] }
 0x19a   :  { %4911 = vrot.lane.b32.xlu0 %v4860_v21, %s5358_s29  ;;  %v6526_v28 = vsel %vm17_vm0, %v5325_v6, %v4054_v62  ;;  %v5329_v62 = vld [vmem:[#allocation2 + $0xc0] sm:$0xff]  ;;  %v6543_v6 = vsel %vm17_vm0, %v5330_v61, %v4089_v43  ;;  %v4124_v25 = vunpack.i.h.bf16 %v6043_v37  ;;  %v4123_v47 = vunpack.i.l.bf16 %v6043_v37 }
 0x19b   :  { %v6513_v16 = vpop.permute.xlu1 %4626  ;;  %8198 = vst [vmem:[#allocation88_spill] sm:$0xff] %v6526_v28  ;;  %v1585_v29 = vsel %vm17_vm0, %v5329_v62, %v4083_v58  ;;  %v4163_v58 = vunpack.i.l.bf16 %v6090_v15  ;;  %v4204_v43 = vunpack.i.h.bf16 %v6122_v42  ;;  %v4203_v62 = vunpack.i.l.bf16 %v6122_v42  ;;  %v2033_v28 = vld [vmem:[#allocation2 + $0x228] sm:$0xff] }
 0x19c   :  { %8196 = vst [vmem:[#allocation86_spill] sm:$0xff] %v6513_v16  ;;  %v6523_v16 = vsel %vm17_vm0, %v5324_v57, %v4053_v18  ;;  %v6529_v19 = vpop.permute.xlu0 %4631  ;;  %v5328_v57 = vld [vmem:[#allocation2 + $0xc8] sm:$0xff]  ;;  %v4244_v37 = vunpack.i.h.bf16 %v6167_v5  ;;  %v4243_v61 = vunpack.i.l.bf16 %v6167_v5  ;;  %v4283_v21 = vunpack.i.l.bf16 %v6191_v40 }
 0x19d   :  { %4916 = vrot.lane.b32.xlu1 %v4865_v51, %s5358_s29  ;;  %8197 = vst [vmem:[#allocation87_spill] sm:$0xff] %v6523_v16  ;;  %8199 = vst [vmem:[#allocation89_spill] sm:$0xff] %v6529_v19  ;;  %v5327_v51 = vld [vmem:[#allocation2 + $0x20] sm:$0xff]  ;;  %v1586_v18 = vsel %vm17_vm0, %v5328_v57, %v4084_v7  ;;  %v4164_v57 = vunpack.i.h.bf16 %v6090_v15  ;;  %v4284_v7 = vunpack.i.h.bf16 %v6191_v40  ;;  %v4323_v15 = vunpack.i.l.bf16 %v6227_v36 }
 0x19e   :  { %v6535_v35 = vsel %vm17_vm0, %v5327_v51, %v4049_v13  ;;  %4921 = vrot.lane.b32.xlu0 %v6463_v24, %s5359_s30  ;;  %v5331_v13 = vld [vmem:[#allocation2 + $0xd8] sm:$0xff]  ;;  %v1603_v42 = vsel %vm1601_vm2, %v1570_v53, %v4124_v25  ;;  %v1602_v19 = vsel %vm1601_vm2, %v1569_v27, %v4123_v47  ;;  %v4324_v16 = vunpack.i.h.bf16 %v6227_v36  ;;  %v2065_v25 = vld [vmem:[#allocation2 + $0x229] sm:$0xff] }
 0x19f   :  { %v6539_v4 = vpop.permute.xlu1 %4636  ;;  %v6550_v51 = vsel %vm17_vm0, %v5331_v13, %v4088_v11  ;;  %v2049_v11 = vld [vmem:[#allocation2 + $0x2e8] sm:$0xff]  ;;  %v2050_v13 = vld [vmem:[#allocation2 + $0x2f0] sm:$0xff]  ;;  %v1618_v40 = vsel %vm1601_vm2, %v1585_v29, %v4163_v58  ;;  %v1619_v55 = vsel %vm1601_vm2, %v1586_v18, %v4164_v57  ;;  %v1635_v36 = vsel %vm1634_vm3, %v1602_v19, %v4203_v62 }
 0x1a0   :  { %v6560_v8 = vpop.permute.xlu0 %4641  ;;  %v6577_v53 = vpack.i.bf16 %v2050_v13, %v2049_v11  ;;  %v2082_v27 = vld [vmem:[#allocation2 + $0x2f1] sm:$0xff]  ;;  %v1636_v5 = vsel %vm1634_vm3, %v1603_v42, %v4204_v43  ;;  %v1651_v32 = vsel %vm1634_vm3, %v1618_v40, %v4243_v61  ;;  %v1652_v45 = vsel %vm1634_vm3, %v1619_v55, %v4244_v37 }
 0x1a1   :  { %4926 = vrot.lane.b32.xlu1 %v4925_v54, %s5363_s5  ;;  %v2066_v47 = vld [vmem:[#allocation2 + $0x231] sm:$0xff]  ;;  %v1668_v18 = vsel %vm1667_vm4, %v1635_v36, %v4283_v21  ;;  %v1669_v57 = vsel %vm1667_vm4, %v1636_v5, %v4284_v7  ;;  %v1684_v58 = vsel %vm1667_vm4, %v1651_v32, %v4323_v15  ;;  %v1685_v13 = vsel %vm1667_vm4, %v1652_v45, %v4324_v16 }
 0x1a2   :  { %4931 = vrot.lane.b32.xlu0 %v6466_v22, %s5359_s30  ;;  %v6593_v19 = vpack.i.bf16 %v2034_v50, %v2033_v28  ;;  %v6595_v43 = vpack.i.bf16 %v2082_v27, %v2081_v33  ;;  %v6597_v55 = vpack.i.bf16 %v2066_v47, %v2065_v25  ;;  %v2113_v62 = vld [vmem:[#allocation2 + $0x2ea] sm:$0xff]  ;;  %v2114_v21 = vld [vmem:[#allocation2 + $0x2f2] sm:$0xff]  ;;  %v4364_v7 = vunpack.i.h.bf16 %v6256_v31 }
 0x1a3   :  { %v6565_v54 = vpop.permute.xlu1 %4646  ;;  %v4363_v32 = vunpack.i.l.bf16 %v6256_v31  ;;  %v4404_v37 = vunpack.i.h.bf16 %v6283_v39  ;;  %v4403_v61 = vunpack.i.l.bf16 %v6283_v39  ;;  %v4444_v45 = vunpack.i.h.bf16 %v6332_v48 }
 0x1a4   :  { %v6583_v29 = vpop.permute.xlu0 %4651  ;;  %v4443_v50 = vunpack.i.l.bf16 %v6332_v48  ;;  %v4484_v33 = vunpack.i.h.bf16 %v6359_v23  ;;  %v4483_v16 = vunpack.i.l.bf16 %v6359_v23  ;;  %v4524_v15 = vunpack.i.h.bf16 %v6413_v12 }
 0x1a5   :  { %4936 = vrot.lane.b32.xlu1 %v6474_v59, %s5360_s26  ;;  %v4523_v31 = vunpack.i.l.bf16 %v6413_v12  ;;  %v6615_v39 = vpack.i.bf16 %v2114_v21, %v2113_v62  ;;  %v4564_v5 = vunpack.i.h.bf16 %v6442_v63  ;;  %v4563_v40 = vunpack.i.l.bf16 %v6442_v63 }
 0x1a6   :  { %4941 = vrot.lane.b32.xlu0 %v6484_v49, %s5360_s26  ;;  %v4604_v48 = vunpack.i.h.bf16 %v6488_v20  ;;  %v4603_v27 = vunpack.i.l.bf16 %v6488_v20  ;;  %v1701_v23 = vsel %vm1700_vm5, %v1668_v18, %v4363_v32  ;;  %v1702_v12 = vsel %vm1700_vm5, %v1669_v57, %v4364_v7  ;;  %v2098_v18 = vld [vmem:[#allocation2 + $0x232] sm:$0xff] }
 0x1a7   :  { %v6588_v11 = vpop.permute.xlu1 %4656  ;;  %v1717_v25 = vsel %vm1700_vm5, %v1684_v58, %v4403_v61  ;;  %v1718_v47 = vsel %vm1700_vm5, %v1685_v13, %v4404_v37  ;;  %v1734_v63 = vsel %vm1733_vm6, %v1701_v23, %v4443_v50  ;;  %v1735_v36 = vsel %vm1733_vm6, %v1702_v12, %v4444_v45 }
 0x1a8   :  { %v6609_v28 = vpop.permute.xlu0 %4661  ;;  %v1750_v20 = vsel %vm1733_vm6, %v1717_v25, %v4483_v16  ;;  %v1751_v21 = vsel %vm1733_vm6, %v1718_v47, %v4484_v33  ;;  %v1767_v58 = vsel %vm1766_vm7, %v1734_v63, %v4523_v31  ;;  %v1768_v13 = vsel %vm1766_vm7, %v1735_v36, %v4524_v15 }
 0x1a9   :  { %4946 = vrot.lane.b32.xlu1 %v6577_v53, %s5361_s13  ;;  %v1783_v37 = vsel %vm1766_vm7, %v1750_v20, %v4563_v40  ;;  %v1784_v61 = vsel %vm1766_vm7, %v1751_v21, %v4564_v5  ;;  %v1800_v45 = vsel %vm1799_vm8, %v1767_v58, %v4603_v27  ;;  %v1801_v50 = vsel %vm1799_vm8, %v1768_v13, %v4604_v48  ;;  %v6671_v20 = vld [vmem:[#allocation2 + $0x152] sm:$0xff]  ;;  %v6673_v21 = vld [vmem:[#allocation2 + $0x15a] sm:$0xff] }
 0x1aa   :  { %4951 = vrot.lane.b32.xlu0 %v6593_v19, %s5361_s13  ;;  %v6654_v5 = vpack.i.bf16 %v2098_v18, %v2097_v2  ;;  %v4129_v40 = vunpack.i.h.bf16 %v6045_v44  ;;  %v8202_v48 = vunpack.i.l.bf16 %v6045_v44  ;;  %v4168_v47 = vunpack.i.l.bf16 %v6092_v26 }
 0x1ab   :  { %v6613_v42 = vpop.permute.xlu1 %4666  ;;  %v4639_v63 = vunpack.i.h.bf16 %v6539_v4  ;;  %v4638_v2 = vunpack.i.l.bf16 %v6539_v4  ;;  %v4644_v58 = vunpack.i.h.bf16 %v6560_v8  ;;  %v4643_v13 = vunpack.i.l.bf16 %v6560_v8  ;;  %v1833_v4 = vld [vmem:[#allocation2 + $0x1b0] sm:$0xff] }
 0x1ac   :  { %v4672_v62 = vpop.permute.xlu0 %4671  ;;  %v6661_v27 = vsel %vm1601_vm2, %v6532_v14, %v8202_v48  ;;  %v4659_v8 = vunpack.i.h.bf16 %v6588_v11  ;;  %v4664_v33 = vunpack.i.h.bf16 %v6609_v28  ;;  %v4663_v14 = vunpack.i.l.bf16 %v6609_v28 }
 0x1ad   :  { %4956 = vrot.lane.b32.xlu1 %v6595_v43, %s5362_s22  ;;  %v4674_v32 = vunpack.i.h.bf16 %v4672_v62  ;;  %v4673_v57 = vunpack.i.l.bf16 %v4672_v62  ;;  %v3937_v62 = vpack.c.bf16 %v1801_v50, %v1800_v45  ;;  %v4648_v45 = vunpack.i.l.bf16 %v6565_v54 }
 0x1ae   :  { %4961 = vrot.lane.b32.xlu0 %v6597_v55, %s5362_s22  ;;  %v4654_v50 = vunpack.i.h.bf16 %v6583_v29  ;;  %v4669_v23 = vunpack.i.h.bf16 %v6613_v42 }
 0x1af   :  { %v6633_v7 = vpop.permute.xlu1 %4676  ;;  %v1816_v16 = vsel %vm1799_vm8, %v1783_v37, %v4673_v57  ;;  %v1817_v15 = vsel %vm1799_vm8, %v1784_v61, %v4674_v32  ;;  %v1849_v32 = vld [vmem:[#allocation2 + $0x270] sm:$0xff]  ;;  %v1850_v57 = vld [vmem:[#allocation2 + $0x278] sm:$0xff]  ;;  %v4649_v61 = vunpack.i.h.bf16 %v6565_v54  ;;  %v5010_v54 = vpack.i.bf16 %v6673_v21, %v6671_v20  ;;  %v2051_v20 = vld [vmem:[#allocation2 + $0x300] sm:$0xff] }
 0x1b0   :  { %v6664_v12 = vpop.permute.xlu0 %4681  ;;  %v3934_v25 = vpack.c.bf16 %v1817_v15, %v1816_v16  ;;  %v1834_v37 = vld [vmem:[#allocation2 + $0x1b8] sm:$0xff]  ;;  %v4653_v16 = vunpack.i.l.bf16 %v6583_v29  ;;  %v4658_v15 = vunpack.i.l.bf16 %v6588_v11  ;;  %v3163_v29 = vsel %vm17_vm0, %v1849_v32, %v4638_v2  ;;  %v2052_v21 = vld [vmem:[#allocation2 + $0x308] sm:$0xff] }
 0x1b1   :  { %4966 = vrot.lane.b32.xlu1 %v6615_v39, %s5363_s5  ;;  %v4668_v11 = vunpack.i.l.bf16 %v6613_v42  ;;  %v4684_v42 = vunpack.i.h.bf16 %v6664_v12 }
 0x1b2   :  { %4971 = vrot.lane.b32.xlu0 %v6463_v24, %s5356_s7  ;;  %3936 = vmatprep.subr.msk.bf16.mxu0 %vm6650_vm10, %v3934_v25  ;;  %v3164_v25 = vsel %vm17_vm0, %v1850_v57, %v4639_v63  ;;  %v3147_v24 = vsel %vm17_vm0, %v1833_v4, %v4643_v13  ;;  %v3195_v63 = vsel %vm1601_vm2, %v3163_v29, %v4648_v45  ;;  %v4683_v13 = vunpack.i.l.bf16 %v6664_v12 }
 0x1b3   :  { %v6669_v36 = vpop.permute.xlu1 %4686  ;;  %3939 = vmatpush3.bf16.xpose.msk.msra.mxu0 %vm6650_vm10, %v3937_v62  ;;  %v3148_v62 = vsel %vm17_vm0, %v1834_v37, %v4644_v58  ;;  %v3196_v2 = vsel %vm1601_vm2, %v3164_v25, %v4649_v61  ;;  %v3179_v32 = vsel %vm1601_vm2, %v3147_v24, %v4653_v16  ;;  %v3227_v57 = vsel %vm1634_vm3, %v3195_v63, %v4658_v15 }
 0x1b4   :  { %v4692_v48 = vpop.permute.xlu0 %4691  ;;  %v3180_v28 = vsel %vm1601_vm2, %v3148_v62, %v4654_v50  ;;  %v3228_v58 = vsel %vm1634_vm3, %v3196_v2, %v4659_v8  ;;  %v3211_v4 = vsel %vm1634_vm3, %v3179_v32, %v4663_v14  ;;  %v3259_v50 = vsel %vm1667_vm4, %v3227_v57, %v4668_v11 }
 0x1b5   :  { %4976 = vrot.lane.b32.xlu1 %v6654_v5, %s5363_s5  ;;  %v3212_v37 = vsel %vm1634_vm3, %v3180_v28, %v4664_v33  ;;  %v4694_v61 = vunpack.i.h.bf16 %v4692_v48  ;;  %v4693_v45 = vunpack.i.l.bf16 %v4692_v48  ;;  %v4679_v8 = vunpack.i.h.bf16 %v6633_v7 }
 0x1b6   :  { %4981 = vrot.lane.b32.xlu0 %v6466_v22, %s5356_s7  ;;  %v4678_v12 = vunpack.i.l.bf16 %v6633_v7  ;;  %v4689_v14 = vunpack.i.h.bf16 %v6669_v36  ;;  %v4688_v33 = vunpack.i.l.bf16 %v6669_v36 }
 0x1b7   :  { %v4697_v18 = vpop.permute.xlu1 %4696  ;;  %v3244_v57 = vsel %vm1667_vm4, %v3212_v37, %v4679_v8 }
 0x1b8   :  { %v4702_v22 = vpop.permute.xlu0 %4701  ;;  %v4699_v25 = vunpack.i.h.bf16 %v4697_v18  ;;  %v4698_v29 = vunpack.i.l.bf16 %v4697_v18  ;;  %v3243_v18 = vsel %vm1667_vm4, %v3211_v4, %v4678_v12 }
 0x1b9   :  { %4986 = vrot.lane.b32.xlu1 %v6474_v59, %s5357_s28  ;;  %v3260_v59 = vsel %vm1667_vm4, %v3228_v58, %v4669_v23  ;;  %v4704_v24 = vunpack.i.h.bf16 %v4702_v22  ;;  %v4703_v15 = vunpack.i.l.bf16 %v4702_v22  ;;  %v3291_v23 = vsel %vm1700_vm5, %v3259_v50, %v4683_v13 }
 0x1ba   :  { %4991 = vrot.lane.b32.xlu0 %v6484_v49, %s5357_s28  ;;  %v3292_v48 = vsel %vm1700_vm5, %v3260_v59, %v4684_v42  ;;  %v3323_v7 = vsel %vm1733_vm6, %v3291_v23, %v4693_v45  ;;  %v4248_v13 = vunpack.i.l.bf16 %v6169_v38  ;;  %v3275_v22 = vsel %vm1700_vm5, %v3243_v18, %v4688_v33 }
 0x1bb   :  { %v4707_v16 = vpop.permute.xlu1 %4706  ;;  %v3324_v2 = vsel %vm1733_vm6, %v3292_v48, %v4694_v61  ;;  %v4328_v33 = vunpack.i.l.bf16 %v6233_v1  ;;  %v1620_v23 = vsel %vm1601_vm2, %v6550_v51, %v4168_v47 }
 0x1bc   :  { %v4712_v62 = vpop.permute.xlu0 %4711  ;;  %v4709_v32 = vunpack.i.h.bf16 %v4707_v16  ;;  %v4708_v36 = vunpack.i.l.bf16 %v4707_v16  ;;  %v3356_v28 = vsel %vm1766_vm7, %v3324_v2, %v4704_v24  ;;  %v3307_v16 = vsel %vm1733_vm6, %v3275_v22, %v4698_v29 }
 0x1bd   :  { %4996 = vrot.lane.b32.xlu1 %v6577_v53, %s5358_s29  ;;  %v4714_v11 = vunpack.i.h.bf16 %v4712_v62  ;;  %v4713_v49 = vunpack.i.l.bf16 %v4712_v62  ;;  %v3355_v53 = vsel %vm1766_vm7, %v3323_v7, %v4703_v15  ;;  %v4289_v24 = vunpack.i.h.bf16 %v6193_v46  ;;  %v2035_v62 = vld [vmem:[#allocation2 + $0x240] sm:$0xff] }
 0x1be   :  { %5001 = vrot.lane.b32.xlu0 %v6593_v19, %s5358_s29  ;;  %v3276_v19 = vsel %vm1700_vm5, %v3244_v57, %v4689_v14  ;;  %v4288_v15 = vunpack.i.l.bf16 %v6193_v46  ;;  %v3339_v8 = vsel %vm1766_vm7, %v3307_v16, %v4708_v36  ;;  %v4329_v14 = vunpack.i.h.bf16 %v6233_v1  ;;  %v2084_v57 = vld [vmem:[#allocation2 + $0x309] sm:$0xff] }
 0x1bf   :  { %v6730_v63 = vpop.permute.xlu1 %4716  ;;  %v3387_v58 = vsel %vm1799_vm8, %v3355_v53, %v4713_v49  ;;  %v3388_v42 = vsel %vm1799_vm8, %v3356_v28, %v4714_v11  ;;  %v3308_v4 = vsel %vm1733_vm6, %v3276_v19, %v4699_v25  ;;  %v4368_v1 = vunpack.i.l.bf16 %v6258_v3  ;;  %v2036_v11 = vld [vmem:[#allocation2 + $0x248] sm:$0xff] }
 0x1c0   :  { %v4722_v61 = vpop.permute.xlu0 %4721  ;;  %v3982_v45 = vpack.c.bf16 %v3388_v42, %v3387_v58  ;;  %v3340_v12 = vsel %vm1766_vm7, %v3308_v4, %v4709_v32  ;;  %v8203_v49 = vunpack.i.h.bf16 %v6092_v26  ;;  %v8204_v7 = vunpack.i.l.bf16 %v6124_v52  ;;  %v2067_v58 = vld [vmem:[#allocation2 + $0x241] sm:$0xff]  ;;  %v2068_v42 = vld [vmem:[#allocation2 + $0x249] sm:$0xff] }
 0x1c1   :  { %5006 = vrot.lane.b32.xlu1 %v6595_v43, %s5359_s30  ;;  %v4724_v37 = vunpack.i.h.bf16 %v4722_v61  ;;  %v4723_v50 = vunpack.i.l.bf16 %v4722_v61  ;;  %v1653_v47 = vsel %vm1634_vm3, %v1620_v23, %v4248_v13  ;;  %v4099_v32 = vunpack.i.h.bf16 %v6021_v10 }
 0x1c2   :  { %5011 = vrot.lane.b32.xlu0 %v5010_v54, %s5363_s5  ;;  %3984 = vmatprep.subr.msk.bf16.mxu1 %vm6650_vm10, %v3982_v45  ;;  %v1605_v54 = vsel %vm1601_vm2, %v6535_v35, %v4129_v40  ;;  %v1621_v44 = vsel %vm1601_vm2, %v6543_v6, %v8203_v49  ;;  %v1637_v35 = vsel %vm1634_vm3, %v6661_v27, %v8204_v7  ;;  %v8205_v40 = vunpack.i.h.bf16 %v6124_v52  ;;  %v2083_v27 = vld [vmem:[#allocation2 + $0x301] sm:$0xff] }
 0x1c3   :  { %v6749_v59 = vpop.permute.xlu1 %4726  ;;  %v3371_v46 = vsel %vm1799_vm8, %v3339_v8, %v4723_v50  ;;  %v3372_v48 = vsel %vm1799_vm8, %v3340_v12, %v4724_v37  ;;  %v8206_v26 = vunpack.i.h.bf16 %v6169_v38  ;;  %v1670_v6 = vsel %vm1667_vm4, %v1637_v35, %v4288_v15  ;;  %v2115_v15 = vld [vmem:[#allocation2 + $0x302] sm:$0xff] }
 0x1c4   :  { %v6776_v25 = vpop.permute.xlu0 %4731  ;;  %v3985_v29 = vpack.c.bf16 %v3372_v48, %v3371_v46  ;;  %v1638_v51 = vsel %vm1634_vm3, %v1605_v54, %v8205_v40  ;;  %v6801_v52 = vpack.i.bf16 %v2052_v21, %v2051_v20  ;;  %v1686_v28 = vsel %vm1667_vm4, %v1653_v47, %v4328_v33  ;;  %v2099_v47 = vld [vmem:[#allocation2 + $0x242] sm:$0xff] }
 0x1c5   :  { %5016 = vrot.lane.b32.xlu1 %v6597_v55, %s5359_s30  ;;  %v1654_v36 = vsel %vm1634_vm3, %v1621_v44, %v8206_v26  ;;  %v1671_v53 = vsel %vm1667_vm4, %v1638_v51, %v4289_v24  ;;  %v6808_v38 = vpack.i.bf16 %v2036_v11, %v2035_v62  ;;  %v4369_v13 = vunpack.i.h.bf16 %v6258_v3  ;;  %v2116_v3 = vld [vmem:[#allocation2 + $0x30a] sm:$0xff] }
 0x1c6   :  { %5021 = vrot.lane.b32.xlu0 %v6615_v39, %s5360_s26  ;;  %3987 = vmatpush3.bf16.xpose.msk.msra.mxu1 %vm6650_vm10, %v3985_v29  ;;  %v1687_v18 = vsel %vm1667_vm4, %v1654_v36, %v4329_v14  ;;  %v1703_v22 = vsel %vm1700_vm5, %v1670_v6, %v4368_v1  ;;  %v4409_v19 = vunpack.i.h.bf16 %v6295_v17  ;;  %v4408_v61 = vunpack.i.l.bf16 %v6295_v17  ;;  %v2100_v26 = vld [vmem:[#allocation2 + $0x24a] sm:$0xff] }
 0x1c7   :  { %v6790_v2 = vpop.permute.xlu1 %4736  ;;  %v4449_v16 = vunpack.i.h.bf16 %v6334_v30  ;;  %v4448_v4 = vunpack.i.l.bf16 %v6334_v30  ;;  %v4489_v37 = vunpack.i.h.bf16 %v6361_v34  ;;  %v4488_v50 = vunpack.i.l.bf16 %v6361_v34  ;;  %v5332_v36 = vld [vmem:[#allocation2 + $0x50] sm:$0xff] }
 0x1c8   :  { %v6814_v45 = vpop.permute.xlu0 %4741  ;;  %v4529_v8 = vunpack.i.h.bf16 %v6415_v0  ;;  %v4528_v12 = vunpack.i.l.bf16 %v6415_v0  ;;  %v6826_v17 = vpack.i.bf16 %v2084_v57, %v2083_v27  ;;  %v6828_v14 = vpack.i.bf16 %v2068_v42, %v2067_v58 }
 0x1c9   :  { %5026 = vrot.lane.b32.xlu1 %v6654_v5, %s5360_s26  ;;  %v4569_v30 = vunpack.i.h.bf16 %v6444_v41  ;;  %v4568_v33 = vunpack.i.l.bf16 %v6444_v41  ;;  %v4609_v34 = vunpack.i.h.bf16 %v6490_v60  ;;  %v4608_v46 = vunpack.i.l.bf16 %v6490_v60 }
 0x1ca   :  { %5031 = vrot.lane.b32.xlu0 %v6801_v52, %s5361_s13  ;;  %v1704_v0 = vsel %vm1700_vm5, %v1671_v53, %v4369_v13  ;;  %v1719_v48 = vsel %vm1700_vm5, %v1686_v28, %v4408_v61  ;;  %v1720_v20 = vsel %vm1700_vm5, %v1687_v18, %v4409_v19  ;;  %v6841_v54 = vpack.i.bf16 %v2116_v3, %v2115_v15  ;;  %v5333_v53 = vld [vmem:[#allocation2 + $0x48] sm:$0xff]  ;;  %v8209_v13 = vld [vmem:[#allocation3_spill] sm:$0xff] }
 0x1cb   :  { %v6820_v24 = vpop.permute.xlu1 %4746  ;;  %v1736_v23 = vsel %vm1733_vm6, %v1703_v22, %v4448_v4  ;;  %v1737_v41 = vsel %vm1733_vm6, %v1704_v0, %v4449_v16  ;;  %v1752_v1 = vsel %vm1733_vm6, %v1719_v48, %v4488_v50  ;;  %v1753_v60 = vsel %vm1733_vm6, %v1720_v20, %v4489_v37  ;;  %v6876_v37 = vld [vmem:[#allocation2 + $0x16a] sm:$0xff]  ;;  %v5334_v50 = vld [vmem:[#allocation2 + $0xf8] sm:$0xff] }
 0x1cc   :  { %v6839_v21 = vpop.permute.xlu0 %4751  ;;  %v1769_v62 = vsel %vm1766_vm7, %v1736_v23, %v4528_v12  ;;  %v1770_v11 = vsel %vm1766_vm7, %v1737_v41, %v4529_v8  ;;  %v1785_v7 = vsel %vm1766_vm7, %v1752_v1, %v4568_v33  ;;  %v1786_v35 = vsel %vm1766_vm7, %v1753_v60, %v4569_v30  ;;  %v1851_v12 = vld [vmem:[#allocation2 + $0x288] sm:$0xff]  ;;  %v1852_v30 = vld [vmem:[#allocation2 + $0x290] sm:$0xff] }
 0x1cd   :  { %5036 = vrot.lane.b32.xlu1 %v6808_v38, %s5361_s13  ;;  %v1802_v40 = vsel %vm1799_vm8, %v1769_v62, %v4608_v46  ;;  %v1803_v51 = vsel %vm1799_vm8, %v1770_v11, %v4609_v34  ;;  %v8207_v6 = vunpack.i.h.bf16 %v5971_v56  ;;  %v8208_v28 = vunpack.i.l.bf16 %v5971_v56  ;;  %v6878_v56 = vld [vmem:[#allocation2 + $0x172] sm:$0xff]  ;;  %v1835_v60 = vld [vmem:[#allocation2 + $0x1c8] sm:$0xff] }
 0x1ce   :  { %5041 = vrot.lane.b32.xlu0 %v6826_v17, %s5362_s22  ;;  %v4064_v22 = vunpack.i.h.bf16 %v8209_v13  ;;  %v4719_v19 = vunpack.i.h.bf16 %v6730_v63  ;;  %v4718_v61 = vunpack.i.l.bf16 %v6730_v63  ;;  %v8210_v15 = vunpack.i.h.bf16 %v6019_v9  ;;  %v5335_v34 = vld [vmem:[#allocation2 + $0xf0] sm:$0xff] }
 0x1cf   :  { %v4757_v29 = vpop.permute.xlu1 %4756  ;;  %v6860_v27 = vsel %vm17_vm0, %v5332_v36, %v8207_v6  ;;  %v6865_v18 = vsel %vm17_vm0, %v5333_v53, %v8208_v28  ;;  %v4098_v8 = vunpack.i.l.bf16 %v6021_v10  ;;  %v3943_v63 = vpack.c.bf16 %v1803_v51, %v1802_v40  ;;  %v5336_v48 = vld [vmem:[#allocation2 + $0x110] sm:$0xff]  ;;  %v8219_v10 = vld [vmem:[#allocation87_spill] sm:$0xff] }
 0x1d0   :  { %v4759_v49 = vunpack.i.h.bf16 %v4757_v29  ;;  %v4758_v44 = vunpack.i.l.bf16 %v4757_v29  ;;  %v6869_v42 = vpop.permute.xlu0 %4761  ;;  %v6883_v3 = vsel %vm17_vm0, %v5334_v50, %v8210_v15  ;;  %v6888_v33 = vpack.i.bf16 %v2100_v26, %v2099_v47  ;;  %v1836_v29 = vld [vmem:[#allocation2 + $0x1d0] sm:$0xff] }
 0x1d1   :  { %5046 = vrot.lane.b32.xlu1 %v6828_v14, %s5362_s22  ;;  %v8211_v46 = vunpack.i.l.bf16 %v6019_v9  ;;  %v6898_v20 = vsel %vm17_vm0, %v5336_v48, %v4099_v32  ;;  %v4729_v23 = vunpack.i.h.bf16 %v6749_v59  ;;  %v4728_v41 = vunpack.i.l.bf16 %v6749_v59  ;;  %v8212_v9 = vld [vmem:[#allocation11_spill] sm:$0xff] }
 0x1d2   :  { %v1818_v57 = vsel %vm1799_vm8, %v1785_v7, %v4758_v44  ;;  %v1819_v58 = vsel %vm1799_vm8, %v1786_v35, %v4759_v49  ;;  %5051 = vrot.lane.b32.xlu0 %v6841_v54, %s5363_s5  ;;  %v4134_v1 = vunpack.i.h.bf16 %v8212_v9  ;;  %v4734_v62 = vunpack.i.h.bf16 %v6776_v25 }
 0x1d3   :  { %v6874_v16 = vpop.permute.xlu1 %4766  ;;  %v3940_v4 = vpack.c.bf16 %v1819_v58, %v1818_v57  ;;  %v6893_v0 = vsel %vm17_vm0, %v5335_v34, %v8211_v46  ;;  %v4733_v11 = vunpack.i.l.bf16 %v6776_v25  ;;  %v5095_v59 = vpack.i.bf16 %v6878_v56, %v6876_v37  ;;  %v8216_v56 = vld [vmem:[#allocation35_spill] sm:$0xff] }
 0x1d4   :  { %v6909_v32 = vpop.permute.xlu0 %4771  ;;  %v3165_v49 = vsel %vm17_vm0, %v1851_v12, %v4718_v61  ;;  %v4739_v44 = vunpack.i.h.bf16 %v6790_v2  ;;  %v4738_v7 = vunpack.i.l.bf16 %v6790_v2  ;;  %v4744_v40 = vunpack.i.h.bf16 %v6814_v45 }
 0x1d5   :  { %5056 = vrot.lane.b32.xlu1 %v6595_v43, %s5356_s7  ;;  %3942 = vmatprep.subr.msk.bf16.mxu0 %vm6650_vm10, %v3940_v4  ;;  %v3166_v43 = vsel %vm17_vm0, %v1852_v30, %v4719_v19  ;;  %v4743_v25 = vunpack.i.l.bf16 %v6814_v45  ;;  %v4749_v51 = vunpack.i.h.bf16 %v6820_v24  ;;  %v4748_v47 = vunpack.i.l.bf16 %v6820_v24 }
 0x1d6   :  { %3945 = vmatpush3.bf16.xpose.msk.msra.mxu0 %vm6650_vm10, %v3943_v63  ;;  %5061 = vrot.lane.b32.xlu0 %v6888_v33, %s5363_s5  ;;  %v3150_v26 = vsel %vm17_vm0, %v1836_v29, %v4729_v23  ;;  %v3149_v36 = vsel %vm17_vm0, %v1835_v60, %v4728_v41  ;;  %v4754_v6 = vunpack.i.h.bf16 %v6839_v21  ;;  %v4753_v2 = vunpack.i.l.bf16 %v6839_v21 }
 0x1d7   :  { %v4777_v35 = vpop.permute.xlu1 %4776  ;;  %v3198_v45 = vsel %vm1601_vm2, %v3166_v43, %v4734_v62  ;;  %v3197_v53 = vsel %vm1601_vm2, %v3165_v49, %v4733_v11  ;;  %v4769_v24 = vunpack.i.h.bf16 %v6874_v16  ;;  %v4768_v28 = vunpack.i.l.bf16 %v6874_v16 }
 0x1d8   :  { %v4782_v57 = vpop.permute.xlu0 %4781  ;;  %v3181_v58 = vsel %vm1601_vm2, %v3149_v36, %v4738_v7  ;;  %v3182_v19 = vsel %vm1601_vm2, %v3150_v26, %v4739_v44  ;;  %v4779_v61 = vunpack.i.h.bf16 %v4777_v35  ;;  %v4778_v4 = vunpack.i.l.bf16 %v4777_v35 }
 0x1d9   :  { %5066 = vrot.lane.b32.xlu1 %v6597_v55, %s5356_s7  ;;  %v3229_v21 = vsel %vm1634_vm3, %v3197_v53, %v4743_v25  ;;  %v3230_v55 = vsel %vm1634_vm3, %v3198_v45, %v4744_v40  ;;  %v3213_v15 = vsel %vm1634_vm3, %v3181_v58, %v4748_v47  ;;  %v3214_v12 = vsel %vm1634_vm3, %v3182_v19, %v4749_v51  ;;  %v8213_v58 = vld [vmem:[#allocation17_spill] sm:$0xff] }
 0x1da   :  { %5071 = vrot.lane.b32.xlu0 %v6615_v39, %s5357_s28  ;;  %v3261_v16 = vsel %vm1667_vm4, %v3229_v21, %v4753_v2  ;;  %v3262_v30 = vsel %vm1667_vm4, %v3230_v55, %v4754_v6  ;;  %v4764_v46 = vunpack.i.h.bf16 %v6869_v42  ;;  %v4763_v48 = vunpack.i.l.bf16 %v6869_v42  ;;  %v8214_v21 = vld [vmem:[#allocation23_spill] sm:$0xff] }
 0x1db   :  { %v4787_v50 = vpop.permute.xlu1 %4786  ;;  %v3293_v23 = vsel %vm1700_vm5, %v3261_v16, %v4768_v28  ;;  %v3294_v41 = vsel %vm1700_vm5, %v3262_v30, %v4769_v24  ;;  %v4774_v39 = vunpack.i.h.bf16 %v6909_v32  ;;  %v4773_v29 = vunpack.i.l.bf16 %v6909_v32 }
 0x1dc   :  { %v4789_v63 = vunpack.i.h.bf16 %v4787_v50  ;;  %v4788_v34 = vunpack.i.l.bf16 %v4787_v50  ;;  %v4792_v60 = vpop.permute.xlu0 %4791  ;;  %v3325_v62 = vsel %vm1733_vm6, %v3293_v23, %v4778_v4  ;;  %v3326_v11 = vsel %vm1733_vm6, %v3294_v41, %v4779_v61 }
 0x1dd   :  { %5076 = vrot.lane.b32.xlu1 %v6654_v5, %s5357_s28  ;;  %v4784_v49 = vunpack.i.h.bf16 %v4782_v57  ;;  %v4783_v5 = vunpack.i.l.bf16 %v4782_v57  ;;  %v4794_v40 = vunpack.i.h.bf16 %v4792_v60  ;;  %v4793_v25 = vunpack.i.l.bf16 %v4792_v60  ;;  %v5337_v60 = vld [vmem:[#allocation2 + $0x108] sm:$0xff] }
 0x1de   :  { %5081 = vrot.lane.b32.xlu0 %v6801_v52, %s5358_s29  ;;  %v3357_v42 = vsel %vm1766_vm7, %v3325_v62, %v4788_v34  ;;  %v3358_v35 = vsel %vm1766_vm7, %v3326_v11, %v4789_v63  ;;  %v3246_v32 = vsel %vm1667_vm4, %v3214_v12, %v4764_v46  ;;  %v3245_v51 = vsel %vm1667_vm4, %v3213_v15, %v4763_v48  ;;  %v2053_v63 = vld [vmem:[#allocation2 + $0x318] sm:$0xff]  ;;  %v2054_v34 = vld [vmem:[#allocation2 + $0x320] sm:$0xff]  ;;  %v8215_v46 = vld [vmem:[#allocation29_spill] sm:$0xff] }
 0x1df   :  { %v4797_v43 = vpop.permute.xlu1 %4796  ;;  %v4133_v52 = vunpack.i.l.bf16 %v8212_v9  ;;  %v3277_v6 = vsel %vm1700_vm5, %v3245_v51, %v4773_v29  ;;  %v3278_v2 = vsel %vm1700_vm5, %v3246_v32, %v4774_v39  ;;  %v4174_v19 = vunpack.i.h.bf16 %v8213_v58  ;;  %v8217_v62 = vld [vmem:[#allocation41_spill] sm:$0xff]  ;;  %v2085_v51 = vld [vmem:[#allocation2 + $0x319] sm:$0xff] }
 0x1e0   :  { %v4799_v44 = vunpack.i.h.bf16 %v4797_v43  ;;  %v4798_v7 = vunpack.i.l.bf16 %v4797_v43  ;;  %v6965_v36 = vpop.permute.xlu0 %4801  ;;  %v3310_v24 = vsel %vm1733_vm6, %v3278_v2, %v4784_v49  ;;  %v4173_v61 = vunpack.i.l.bf16 %v8213_v58  ;;  %v8220_v2 = vld [vmem:[#allocation47_spill] sm:$0xff] }
 0x1e1   :  { %5086 = vrot.lane.b32.xlu1 %v6808_v38, %s5358_s29  ;;  %v3309_v38 = vsel %vm1733_vm6, %v3277_v6, %v4783_v5  ;;  %v3342_v50 = vsel %vm1766_vm7, %v3310_v24, %v4794_v40  ;;  %v4214_v55 = vunpack.i.h.bf16 %v8214_v21  ;;  %v4213_v15 = vunpack.i.l.bf16 %v8214_v21  ;;  %v8218_v5 = vld [vmem:[#allocation88_spill] sm:$0xff]  ;;  %v8222_v21 = vld [vmem:[#allocation59_spill] sm:$0xff] }
 0x1e2   :  { %v3389_v47 = vsel %vm1799_vm8, %v3357_v42, %v4798_v7  ;;  %v3390_v26 = vsel %vm1799_vm8, %v3358_v35, %v4799_v44  ;;  %5091 = vrot.lane.b32.xlu0 %v6826_v17, %s5359_s30  ;;  %v3341_v4 = vsel %vm1766_vm7, %v3309_v38, %v4793_v25  ;;  %v4254_v48 = vunpack.i.h.bf16 %v8215_v46  ;;  %v2037_v42 = vld [vmem:[#allocation2 + $0x258] sm:$0xff]  ;;  %v2038_v35 = vld [vmem:[#allocation2 + $0x260] sm:$0xff] }
 0x1e3   :  { %v4807_v45 = vpop.permute.xlu1 %4806  ;;  %v3988_v53 = vpack.c.bf16 %v3390_v26, %v3389_v47  ;;  %v4253_v37 = vunpack.i.l.bf16 %v8215_v46  ;;  %v6998_v39 = vsel %vm17_vm0, %v5337_v60, %v4098_v8  ;;  %v4294_v29 = vunpack.i.h.bf16 %v8216_v56  ;;  %v2086_v47 = vld [vmem:[#allocation2 + $0x321] sm:$0xff] }
 0x1e4   :  { %v4809_v28 = vunpack.i.h.bf16 %v4807_v45  ;;  %v4808_v57 = vunpack.i.l.bf16 %v4807_v45  ;;  %v6988_v30 = vpop.permute.xlu0 %4811  ;;  %v4334_v11 = vunpack.i.h.bf16 %v8217_v62  ;;  %v4333_v43 = vunpack.i.l.bf16 %v8217_v62  ;;  %v2117_v46 = vld [vmem:[#allocation2 + $0x31a] sm:$0xff]  ;;  %v8225_v62 = vld [vmem:[#allocation77_spill] sm:$0xff] }
 0x1e5   :  { %5096 = vrot.lane.b32.xlu1 %v5095_v59, %s5363_s5  ;;  %3990 = vmatprep.subr.msk.bf16.mxu1 %vm6650_vm10, %v3988_v53  ;;  %v4293_v59 = vunpack.i.l.bf16 %v8216_v56  ;;  %v4063_v49 = vunpack.i.l.bf16 %v8209_v13  ;;  %v1607_v44 = vsel %vm1601_vm2, %v8218_v5, %v4134_v1  ;;  %v1606_v8 = vsel %vm1601_vm2, %v8219_v10, %v4133_v52  ;;  %v8224_v56 = vld [vmem:[#allocation71_spill] sm:$0xff]  ;;  %v8241_v13 = vld [vmem:[#allocation13_spill] sm:$0xff] }
 0x1e6   :  { %v3373_v12 = vsel %vm1799_vm8, %v3341_v4, %v4808_v57  ;;  %v3374_v16 = vsel %vm1799_vm8, %v3342_v50, %v4809_v28  ;;  %5101 = vrot.lane.b32.xlu0 %v6828_v14, %s5359_s30  ;;  %v7016_v7 = vpack.i.bf16 %v2054_v34, %v2053_v63  ;;  %v1622_v40 = vsel %vm1601_vm2, %v6893_v0, %v4173_v61  ;;  %v2069_v28 = vld [vmem:[#allocation2 + $0x259] sm:$0xff]  ;;  %v2070_v57 = vld [vmem:[#allocation2 + $0x261] sm:$0xff] }
 0x1e7   :  { %v6993_v23 = vpop.permute.xlu1 %4816  ;;  %v3991_v41 = vpack.c.bf16 %v3374_v16, %v3373_v12  ;;  %v1623_v9 = vsel %vm1601_vm2, %v6883_v3, %v4174_v19  ;;  %v1639_v1 = vsel %vm1634_vm3, %v1606_v8, %v4213_v15  ;;  %v1640_v25 = vsel %vm1634_vm3, %v1607_v44, %v4214_v55  ;;  %v8221_v19 = vld [vmem:[#allocation53_spill] sm:$0xff]  ;;  %v8226_v5 = vld [vmem:[#allocation83_spill] sm:$0xff] }
 0x1e8   :  { %v7024_v32 = vpop.permute.xlu0 %4821  ;;  %v1655_v26 = vsel %vm1634_vm3, %v1622_v40, %v4253_v37  ;;  %v1656_v52 = vsel %vm1634_vm3, %v1623_v9, %v4254_v48  ;;  %v1672_v6 = vsel %vm1667_vm4, %v1639_v1, %v4293_v59  ;;  %v4373_v45 = vunpack.i.l.bf16 %v8220_v2  ;;  %v8223_v12 = vld [vmem:[#allocation65_spill] sm:$0xff]  ;;  %v2118_v48 = vld [vmem:[#allocation2 + $0x322] sm:$0xff] }
 0x1e9   :  { %5106 = vrot.lane.b32.xlu1 %v6841_v54, %s5360_s26  ;;  %3993 = vmatpush3.bf16.xpose.msk.msra.mxu1 %vm6650_vm10, %v3991_v41  ;;  %v1673_v3 = vsel %vm1667_vm4, %v1640_v25, %v4294_v29  ;;  %v1688_v53 = vsel %vm1667_vm4, %v1655_v26, %v4333_v43  ;;  %v1689_v38 = vsel %vm1667_vm4, %v1656_v52, %v4334_v11  ;;  %v4374_v58 = vunpack.i.h.bf16 %v8220_v2  ;;  %v2101_v26 = vld [vmem:[#allocation2 + $0x25a] sm:$0xff]  ;;  %v2102_v52 = vld [vmem:[#allocation2 + $0x262] sm:$0xff] }
 0x1ea   :  { %5111 = vrot.lane.b32.xlu0 %v6888_v33, %s5360_s26  ;;  %v7037_v24 = vpack.i.bf16 %v2038_v35, %v2037_v42  ;;  %v4414_v61 = vunpack.i.h.bf16 %v8221_v19  ;;  %v4413_v4 = vunpack.i.l.bf16 %v8221_v19  ;;  %v7044_v50 = vpack.i.bf16 %v2086_v47, %v2085_v51  ;;  %v8227_v19 = vld [vmem:[#allocation7_spill] sm:$0xff] }
 0x1eb   :  { %v7030_v0 = vpop.permute.xlu1 %4826  ;;  %v4454_v55 = vunpack.i.h.bf16 %v8222_v21  ;;  %v4453_v15 = vunpack.i.l.bf16 %v8222_v21  ;;  %v4494_v16 = vunpack.i.h.bf16 %v8223_v12  ;;  %v4493_v63 = vunpack.i.l.bf16 %v8223_v12 }
 0x1ec   :  { %v7050_v34 = vpop.permute.xlu0 %4831  ;;  %v1705_v37 = vsel %vm1700_vm5, %v1672_v6, %v4373_v45  ;;  %v4534_v59 = vunpack.i.h.bf16 %v8224_v56  ;;  %v4533_v41 = vunpack.i.l.bf16 %v8224_v56  ;;  %v7057_v29 = vpack.i.bf16 %v2070_v57, %v2069_v28 }
 0x1ed   :  { %5116 = vrot.lane.b32.xlu1 %v7016_v7, %s5361_s13  ;;  %v4574_v11 = vunpack.i.h.bf16 %v8225_v62  ;;  %v4573_v43 = vunpack.i.l.bf16 %v8225_v62  ;;  %v4614_v44 = vunpack.i.h.bf16 %v8226_v5  ;;  %v4613_v10 = vunpack.i.l.bf16 %v8226_v5  ;;  %v7105_v5 = vld [vmem:[#allocation2 + $0x18a] sm:$0xff] }
 0x1ee   :  { %5121 = vrot.lane.b32.xlu0 %v7037_v24, %s5361_s13  ;;  %v1706_v8 = vsel %vm1700_vm5, %v1673_v3, %v4374_v58  ;;  %v1721_v42 = vsel %vm1700_vm5, %v1688_v53, %v4413_v4  ;;  %v1722_v35 = vsel %vm1700_vm5, %v1689_v38, %v4414_v61  ;;  %v7070_v40 = vpack.i.bf16 %v2118_v48, %v2117_v46 }
 0x1ef   :  { %v7055_v60 = vpop.permute.xlu1 %4836  ;;  %v1738_v9 = vsel %vm1733_vm6, %v1705_v37, %v4453_v15  ;;  %v1739_v1 = vsel %vm1733_vm6, %v1706_v8, %v4454_v55  ;;  %v1754_v25 = vsel %vm1733_vm6, %v1721_v42, %v4493_v63  ;;  %v1755_v51 = vsel %vm1733_vm6, %v1722_v35, %v4494_v16  ;;  %v8228_v15 = vld [vmem:[#allocation12_spill] sm:$0xff]  ;;  %v8229_v63 = vld [vmem:[#allocation18_spill] sm:$0xff]  ;;  %v1853_v42 = vld [vmem:[#allocation2 + $0x2a0] sm:$0xff] }
 0x1f0   :  { %v4842_v47 = vpop.permute.xlu0 %4841  ;;  %v1771_v6 = vsel %vm1766_vm7, %v1738_v9, %v4533_v41  ;;  %v1772_v2 = vsel %vm1766_vm7, %v1739_v1, %v4534_v59  ;;  %v1787_v38 = vsel %vm1766_vm7, %v1754_v25, %v4573_v43  ;;  %v1788_v28 = vsel %vm1766_vm7, %v1755_v51, %v4574_v11  ;;  %v7103_v43 = vld [vmem:[#allocation2 + $0x182] sm:$0xff] }
 0x1f1   :  { %5126 = vrot.lane.b32.xlu1 %v7044_v50, %s5362_s22  ;;  %v4844_v45 = vunpack.i.h.bf16 %v4842_v47  ;;  %v4843_v3 = vunpack.i.l.bf16 %v4842_v47  ;;  %v1804_v57 = vsel %vm1799_vm8, %v1771_v6, %v4613_v10  ;;  %v1805_v58 = vsel %vm1799_vm8, %v1772_v2, %v4614_v44  ;;  %v8230_v44 = vld [vmem:[#allocation24_spill] sm:$0xff] }
 0x1f2   :  { %5131 = vrot.lane.b32.xlu0 %v7057_v29, %s5362_s22  ;;  %v4104_v61 = vunpack.i.h.bf16 %v8227_v19  ;;  %v7091_v55 = vpack.i.bf16 %v2102_v52, %v2101_v26  ;;  %v4139_v12 = vunpack.i.h.bf16 %v8228_v15  ;;  %v4138_v16 = vunpack.i.l.bf16 %v8228_v15  ;;  %v1854_v35 = vld [vmem:[#allocation2 + $0x2a8] sm:$0xff] }
 0x1f3   :  { %v7078_v53 = vpop.permute.xlu1 %4846  ;;  %v1820_v4 = vsel %vm1799_vm8, %v1787_v38, %v4843_v3  ;;  %v1821_v21 = vsel %vm1799_vm8, %v1788_v28, %v4844_v45  ;;  %v4179_v46 = vunpack.i.h.bf16 %v8229_v63  ;;  %v4178_v56 = vunpack.i.l.bf16 %v8229_v63  ;;  %v1838_v25 = vld [vmem:[#allocation2 + $0x1e8] sm:$0xff] }
 0x1f4   :  { %v7096_v48 = vpop.permute.xlu0 %4851  ;;  %v3946_v37 = vpack.c.bf16 %v1821_v21, %v1820_v4  ;;  %v4804_v59 = vunpack.i.h.bf16 %v6965_v36  ;;  %v4803_v41 = vunpack.i.l.bf16 %v6965_v36  ;;  %v3949_v11 = vpack.c.bf16 %v1805_v58, %v1804_v57  ;;  %v1837_v36 = vld [vmem:[#allocation2 + $0x1e0] sm:$0xff] }
 0x1f5   :  { %5136 = vrot.lane.b32.xlu1 %v7070_v40, %s5363_s5  ;;  %v4219_v10 = vunpack.i.h.bf16 %v8230_v44  ;;  %v4218_v8 = vunpack.i.l.bf16 %v8230_v44  ;;  %v4814_v9 = vunpack.i.h.bf16 %v6988_v30  ;;  %v4813_v1 = vunpack.i.l.bf16 %v6988_v30 }
 0x1f6   :  { %5141 = vrot.lane.b32.xlu0 %v6826_v17, %s5356_s7  ;;  %3948 = vmatprep.subr.msk.bf16.mxu0 %vm6650_vm10, %v3946_v37  ;;  %v4819_v51 = vunpack.i.h.bf16 %v6993_v23  ;;  %v4818_v47 = vunpack.i.l.bf16 %v6993_v23  ;;  %v4824_v26 = vunpack.i.h.bf16 %v7024_v32  ;;  %v4823_v52 = vunpack.i.l.bf16 %v7024_v32  ;;  %v8231_v17 = vld [vmem:[#allocation30_spill] sm:$0xff] }
 0x1f7   :  { %v7101_v62 = vpop.permute.xlu1 %4856  ;;  %3951 = vmatpush3.bf16.xpose.msk.msra.mxu0 %vm6650_vm10, %v3949_v11  ;;  %v4259_v30 = vunpack.i.h.bf16 %v8231_v17  ;;  %v4829_v6 = vunpack.i.h.bf16 %v7030_v0  ;;  %v4828_v2 = vunpack.i.l.bf16 %v7030_v0  ;;  %v5180_v23 = vpack.i.bf16 %v7105_v5, %v7103_v43 }
 0x1f8   :  { %v4862_v45 = vpop.permute.xlu0 %4861  ;;  %v3168_v3 = vsel %vm17_vm0, %v1854_v35, %v4804_v59  ;;  %v3167_v32 = vsel %vm17_vm0, %v1853_v42, %v4803_v41  ;;  %v4834_v38 = vunpack.i.h.bf16 %v7050_v34  ;;  %v4833_v28 = vunpack.i.l.bf16 %v7050_v34 }
 0x1f9   :  { %5146 = vrot.lane.b32.xlu1 %v7091_v55, %s5363_s5  ;;  %v3152_v58 = vsel %vm17_vm0, %v1838_v25, %v4814_v9  ;;  %v3151_v4 = vsel %vm17_vm0, %v1837_v36, %v4813_v1  ;;  %v4839_v21 = vunpack.i.h.bf16 %v7055_v60  ;;  %v4838_v0 = vunpack.i.l.bf16 %v7055_v60 }
 0x1fa   :  { %5151 = vrot.lane.b32.xlu0 %v6828_v14, %s5356_s7  ;;  %v3199_v37 = vsel %vm1601_vm2, %v3167_v32, %v4818_v47  ;;  %v3200_v59 = vsel %vm1601_vm2, %v3168_v3, %v4819_v51  ;;  %v3183_v41 = vsel %vm1601_vm2, %v3151_v4, %v4823_v52  ;;  %v3184_v34 = vsel %vm1601_vm2, %v3152_v58, %v4824_v26 }
 0x1fb   :  { %v4867_v57 = vpop.permute.xlu1 %4866  ;;  %v3231_v11 = vsel %vm1634_vm3, %v3199_v37, %v4828_v2  ;;  %v3232_v42 = vsel %vm1634_vm3, %v3200_v59, %v4829_v6  ;;  %v4854_v60 = vunpack.i.h.bf16 %v7096_v48  ;;  %v4853_v35 = vunpack.i.l.bf16 %v7096_v48 }
 0x1fc   :  { %v4872_v14 = vpop.permute.xlu0 %4871  ;;  %v3215_v9 = vsel %vm1634_vm3, %v3183_v41, %v4833_v28  ;;  %v3216_v1 = vsel %vm1634_vm3, %v3184_v34, %v4834_v38  ;;  %v4864_v36 = vunpack.i.h.bf16 %v4862_v45  ;;  %v4863_v25 = vunpack.i.l.bf16 %v4862_v45 }
 0x1fd   :  { %5156 = vrot.lane.b32.xlu1 %v6841_v54, %s5357_s28  ;;  %v3263_v47 = vsel %vm1667_vm4, %v3231_v11, %v4838_v0  ;;  %v3264_v54 = vsel %vm1667_vm4, %v3232_v42, %v4839_v21  ;;  %v4874_v26 = vunpack.i.h.bf16 %v4872_v14  ;;  %v4873_v52 = vunpack.i.l.bf16 %v4872_v14 }
 0x1fe   :  { %5161 = vrot.lane.b32.xlu0 %v6888_v33, %s5357_s28  ;;  %v4849_v6 = vunpack.i.h.bf16 %v7078_v53  ;;  %v4848_v48 = vunpack.i.l.bf16 %v7078_v53  ;;  %v4859_v2 = vunpack.i.h.bf16 %v7101_v62  ;;  %v4858_v3 = vunpack.i.l.bf16 %v7101_v62 }
 0x1ff   :  { %v4877_v51 = vpop.permute.xlu1 %4876  ;;  %v3295_v45 = vsel %vm1700_vm5, %v3263_v47, %v4853_v35  ;;  %v3296_v32 = vsel %vm1700_vm5, %v3264_v54, %v4854_v60  ;;  %v4869_v38 = vunpack.i.h.bf16 %v4867_v57  ;;  %v4868_v28 = vunpack.i.l.bf16 %v4867_v57  ;;  %v8232_v47 = vld [vmem:[#allocation36_spill] sm:$0xff] }
 0x200   :  { %v4882_v58 = vpop.permute.xlu0 %4881  ;;  %v3327_v33 = vsel %vm1733_vm6, %v3295_v45, %v4863_v25  ;;  %v3328_v4 = vsel %vm1733_vm6, %v3296_v32, %v4864_v36  ;;  %v4878_v59 = vunpack.i.l.bf16 %v4877_v51  ;;  %v3247_v57 = vsel %vm1667_vm4, %v3215_v9, %v4848_v48  ;;  %v8233_v48 = vld [vmem:[#allocation42_spill] sm:$0xff] }
 0x201   :  { %5166 = vrot.lane.b32.xlu1 %v7016_v7, %s5358_s29  ;;  %v4884_v21 = vunpack.i.h.bf16 %v4882_v58  ;;  %v4883_v53 = vunpack.i.l.bf16 %v4882_v58  ;;  %v3359_v62 = vsel %vm1766_vm7, %v3327_v33, %v4873_v52  ;;  %v3360_v37 = vsel %vm1766_vm7, %v3328_v4, %v4874_v26  ;;  %v2039_v4 = vld [vmem:[#allocation2 + $0x270] sm:$0xff] }
 0x202   :  { %v4879_v7 = vunpack.i.h.bf16 %v4877_v51  ;;  %5171 = vrot.lane.b32.xlu0 %v7037_v24, %s5358_s29  ;;  %v3248_v41 = vsel %vm1667_vm4, %v3216_v1, %v4849_v6  ;;  %v4258_v42 = vunpack.i.l.bf16 %v8231_v17  ;;  %v3279_v60 = vsel %vm1700_vm5, %v3247_v57, %v4858_v3  ;;  %v8236_v57 = vld [vmem:[#allocation60_spill] sm:$0xff] }
 0x203   :  { %v7164_v0 = vpop.permute.xlu1 %4886  ;;  %v3391_v34 = vsel %vm1799_vm8, %v3359_v62, %v4883_v53  ;;  %v3392_v11 = vsel %vm1799_vm8, %v3360_v37, %v4884_v21  ;;  %v3280_v35 = vsel %vm1700_vm5, %v3248_v41, %v4859_v2  ;;  %v3311_v24 = vsel %vm1733_vm6, %v3279_v60, %v4868_v28  ;;  %v2056_v28 = vld [vmem:[#allocation2 + $0x338] sm:$0xff] }
 0x204   :  { %v3994_v14 = vpack.c.bf16 %v3392_v11, %v3391_v34  ;;  %v4892_v36 = vpop.permute.xlu0 %4891  ;;  %v3312_v9 = vsel %vm1733_vm6, %v3280_v35, %v4869_v38  ;;  %v4299_v54 = vunpack.i.h.bf16 %v8232_v47  ;;  %v4298_v26 = vunpack.i.l.bf16 %v8232_v47  ;;  %v2055_v38 = vld [vmem:[#allocation2 + $0x330] sm:$0xff]  ;;  %v2040_v21 = vld [vmem:[#allocation2 + $0x278] sm:$0xff] }
 0x205   :  { %5176 = vrot.lane.b32.xlu1 %v7044_v50, %s5359_s30  ;;  %v4894_v1 = vunpack.i.h.bf16 %v4892_v36  ;;  %v4893_v25 = vunpack.i.l.bf16 %v4892_v36  ;;  %v3343_v52 = vsel %vm1766_vm7, %v3311_v24, %v4878_v59  ;;  %v3344_v6 = vsel %vm1766_vm7, %v3312_v9, %v4879_v7  ;;  %v2088_v53 = vld [vmem:[#allocation2 + $0x339] sm:$0xff]  ;;  %v2071_v11 = vld [vmem:[#allocation2 + $0x271] sm:$0xff]  ;;  %v8238_v24 = vld [vmem:[#allocation72_spill] sm:$0xff] }
 0x206   :  { %5181 = vrot.lane.b32.xlu0 %v5180_v23, %s5363_s5  ;;  %3996 = vmatprep.subr.msk.bf16.mxu1 %vm6650_vm10, %v3994_v14  ;;  %v4339_v2 = vunpack.i.h.bf16 %v8233_v48  ;;  %v4338_v3 = vunpack.i.l.bf16 %v8233_v48  ;;  %v1609_v43 = vsel %vm1601_vm2, %v6860_v27, %v4139_v12  ;;  %v1608_v5 = vsel %vm1601_vm2, %v6865_v18, %v4138_v16  ;;  %v8235_v37 = vld [vmem:[#allocation54_spill] sm:$0xff]  ;;  %v8240_v48 = vld [vmem:[#allocation84_spill] sm:$0xff] }
 0x207   :  { %v7181_v51 = vpop.permute.xlu1 %4896  ;;  %v3375_v45 = vsel %vm1799_vm8, %v3343_v52, %v4893_v25  ;;  %v3376_v32 = vsel %vm1799_vm8, %v3344_v6, %v4894_v1  ;;  %v1624_v23 = vsel %vm1601_vm2, %v6998_v39, %v4178_v56  ;;  %v1625_v27 = vsel %vm1601_vm2, %v6898_v20, %v4179_v46  ;;  %v8234_v56 = vld [vmem:[#allocation48_spill] sm:$0xff]  ;;  %v8237_v35 = vld [vmem:[#allocation66_spill] sm:$0xff] }
 0x208   :  { %v3997_v58 = vpack.c.bf16 %v3376_v32, %v3375_v45  ;;  %v7211_v33 = vpop.permute.xlu0 %4901  ;;  %v1641_v15 = vsel %vm1634_vm3, %v1608_v5, %v4218_v8  ;;  %v1642_v18 = vsel %vm1634_vm3, %v1609_v43, %v4219_v10  ;;  %v1657_v39 = vsel %vm1634_vm3, %v1624_v23, %v4258_v42  ;;  %v2072_v42 = vld [vmem:[#allocation2 + $0x279] sm:$0xff] }
 0x209   :  { %5186 = vrot.lane.b32.xlu1 %v7057_v29, %s5359_s30  ;;  %v1658_v16 = vsel %vm1634_vm3, %v1625_v27, %v4259_v30  ;;  %v1674_v63 = vsel %vm1667_vm4, %v1641_v15, %v4298_v26  ;;  %v4378_v20 = vunpack.i.l.bf16 %v8234_v56  ;;  %v7235_v46 = vpack.i.bf16 %v2056_v28, %v2055_v38  ;;  %v2087_v30 = vld [vmem:[#allocation2 + $0x331] sm:$0xff]  ;;  %v2120_v38 = vld [vmem:[#allocation2 + $0x33a] sm:$0xff] }
 0x20a   :  { %5191 = vrot.lane.b32.xlu0 %v7070_v40, %s5360_s26  ;;  %3999 = vmatpush3.bf16.xpose.msk.msra.mxu1 %vm6650_vm10, %v3997_v58  ;;  %v1675_v44 = vsel %vm1667_vm4, %v1642_v18, %v4299_v54  ;;  %v1690_v10 = vsel %vm1667_vm4, %v1657_v39, %v4338_v3  ;;  %v1691_v8 = vsel %vm1667_vm4, %v1658_v16, %v4339_v2  ;;  %v4379_v62 = vunpack.i.h.bf16 %v8234_v56  ;;  %v8239_v54 = vld [vmem:[#allocation78_spill] sm:$0xff] }
 0x20b   :  { %v7224_v12 = vpop.permute.xlu1 %4906  ;;  %v7242_v17 = vpack.i.bf16 %v2040_v21, %v2039_v4  ;;  %v4419_v7 = vunpack.i.h.bf16 %v8235_v37  ;;  %v4418_v59 = vunpack.i.l.bf16 %v8235_v37  ;;  %v4458_v41 = vunpack.i.l.bf16 %v8236_v57  ;;  %v2119_v32 = vld [vmem:[#allocation2 + $0x332] sm:$0xff] }
 0x20c   :  { %v7248_v34 = vpop.permute.xlu0 %4911  ;;  %v4459_v60 = vunpack.i.h.bf16 %v8236_v57  ;;  %v4499_v14 = vunpack.i.h.bf16 %v8237_v35  ;;  %v4498_v36 = vunpack.i.l.bf16 %v8237_v35  ;;  %v4538_v9 = vunpack.i.l.bf16 %v8238_v24  ;;  %v7304_v35 = vld [vmem:[#allocation2 + $0x19a] sm:$0xff] }
 0x20d   :  { %5196 = vrot.lane.b32.xlu1 %v7091_v55, %s5360_s26  ;;  %v1707_v25 = vsel %vm1700_vm5, %v1674_v63, %v4378_v20  ;;  %v4539_v47 = vunpack.i.h.bf16 %v8238_v24  ;;  %v4579_v26 = vunpack.i.h.bf16 %v8239_v54  ;;  %v7261_v52 = vpack.i.bf16 %v2088_v53, %v2087_v30  ;;  %v2103_v30 = vld [vmem:[#allocation2 + $0x272] sm:$0xff]  ;;  %v2104_v53 = vld [vmem:[#allocation2 + $0x27a] sm:$0xff] }
 0x20e   :  { %5201 = vrot.lane.b32.xlu0 %v7235_v46, %s5361_s13  ;;  %v4578_v6 = vunpack.i.l.bf16 %v8239_v54  ;;  %v4619_v2 = vunpack.i.h.bf16 %v8240_v48  ;;  %v4618_v3 = vunpack.i.l.bf16 %v8240_v48  ;;  %v7268_v45 = vpack.i.bf16 %v2072_v42, %v2071_v11  ;;  %v5340_v54 = vld [vmem:[#allocation2 + $0x128] sm:$0xff] }
 0x20f   :  { %v7254_v1 = vpop.permute.xlu1 %4916  ;;  %v1708_v28 = vsel %vm1700_vm5, %v1675_v44, %v4379_v62  ;;  %v1723_v43 = vsel %vm1700_vm5, %v1690_v10, %v4418_v59  ;;  %v1724_v5 = vsel %vm1700_vm5, %v1691_v8, %v4419_v7  ;;  %v1740_v23 = vsel %vm1733_vm6, %v1707_v25, %v4458_v41  ;;  %v5338_v59 = vld [vmem:[#allocation2 + $0x68] sm:$0xff]  ;;  %v1856_v25 = vld [vmem:[#allocation2 + $0x2c0] sm:$0xff] }
 0x210   :  { %v7274_v58 = vpop.permute.xlu0 %4921  ;;  %v1741_v4 = vsel %vm1733_vm6, %v1708_v28, %v4459_v60  ;;  %v1756_v21 = vsel %vm1733_vm6, %v1723_v43, %v4498_v36  ;;  %v1757_v27 = vsel %vm1733_vm6, %v1724_v5, %v4499_v14  ;;  %v1773_v15 = vsel %vm1766_vm7, %v1740_v23, %v4538_v9  ;;  %v7306_v14 = vld [vmem:[#allocation2 + $0x1a2] sm:$0xff]  ;;  %v1855_v9 = vld [vmem:[#allocation2 + $0x2b8] sm:$0xff] }
 0x211   :  { %5206 = vrot.lane.b32.xlu1 %v7242_v17, %s5361_s13  ;;  %v1774_v39 = vsel %vm1766_vm7, %v1741_v4, %v4539_v47  ;;  %v7283_v56 = vpack.i.bf16 %v2120_v38, %v2119_v32  ;;  %v1789_v20 = vsel %vm1766_vm7, %v1756_v21, %v4578_v6  ;;  %v1790_v44 = vsel %vm1766_vm7, %v1757_v27, %v4579_v26  ;;  %v5339_v36 = vld [vmem:[#allocation2 + $0x60] sm:$0xff] }
 0x212   :  { %5211 = vrot.lane.b32.xlu0 %v7261_v52, %s5362_s22  ;;  %v1806_v10 = vsel %vm1799_vm8, %v1773_v15, %v4618_v3  ;;  %v1807_v8 = vsel %vm1799_vm8, %v1774_v39, %v4619_v2  ;;  %v7298_v57 = vsel %vm17_vm0, %v5338_v59, %v4064_v22  ;;  %v4889_v41 = vunpack.i.h.bf16 %v7164_v0  ;;  %v1839_v3 = vld [vmem:[#allocation2 + $0x1f8] sm:$0xff]  ;;  %v1840_v32 = vld [vmem:[#allocation2 + $0x200] sm:$0xff] }
 0x213   :  { %v4927_v18 = vpop.permute.xlu1 %4926  ;;  %v4888_v11 = vunpack.i.l.bf16 %v7164_v0  ;;  %v7311_v24 = vsel %vm17_vm0, %v5339_v36, %v4063_v49  ;;  %v4103_v22 = vunpack.i.l.bf16 %v8227_v19  ;;  %v3955_v0 = vpack.c.bf16 %v1807_v8, %v1806_v10  ;;  %v8247_v19 = vld [vmem:[#allocation4_spill] sm:$0xff] }
 0x214   :  { %v4929_v16 = vunpack.i.h.bf16 %v4927_v18  ;;  %v4928_v63 = vunpack.i.l.bf16 %v4927_v18  ;;  %v7293_v7 = vpop.permute.xlu0 %4931  ;;  %v7316_v47 = vpack.i.bf16 %v2104_v53, %v2103_v30  ;;  %v7321_v26 = vsel %vm17_vm0, %v5340_v54, %v4104_v61 }
 0x215   :  { %5216 = vrot.lane.b32.xlu1 %v7268_v45, %s5362_s22  ;;  %v4144_v6 = vunpack.i.h.bf16 %v8241_v13  ;;  %v4899_v49 = vunpack.i.h.bf16 %v7181_v51  ;;  %v4898_v48 = vunpack.i.l.bf16 %v7181_v51  ;;  %v4143_v2 = vunpack.i.l.bf16 %v8241_v13 }
 0x216   :  { %v1822_v62 = vsel %vm1799_vm8, %v1789_v20, %v4928_v63  ;;  %v1823_v37 = vsel %vm1799_vm8, %v1790_v44, %v4929_v16  ;;  %5221 = vrot.lane.b32.xlu0 %v7283_v56, %s5363_s5  ;;  %v4904_v38 = vunpack.i.h.bf16 %v7211_v33  ;;  %v4903_v61 = vunpack.i.l.bf16 %v7211_v33 }
 0x217   :  { %v3952_v42 = vpack.c.bf16 %v1823_v37, %v1822_v62  ;;  %v7302_v60 = vpop.permute.xlu1 %4936  ;;  %v5265_v51 = vpack.i.bf16 %v7306_v14, %v7304_v35  ;;  %v3169_v43 = vsel %vm17_vm0, %v1855_v9, %v4888_v11  ;;  %v4909_v5 = vunpack.i.h.bf16 %v7224_v12 }
 0x218   :  { %v7333_v28 = vpop.permute.xlu0 %4941  ;;  %v4908_v23 = vunpack.i.l.bf16 %v7224_v12  ;;  %v4914_v21 = vunpack.i.h.bf16 %v7248_v34  ;;  %v4913_v33 = vunpack.i.l.bf16 %v7248_v34  ;;  %v4919_v27 = vunpack.i.h.bf16 %v7254_v1 }
 0x219   :  { %5226 = vrot.lane.b32.xlu1 %v7044_v50, %s5356_s7  ;;  %3954 = vmatprep.subr.msk.bf16.mxu0 %vm6650_vm10, %v3952_v42  ;;  %v3170_v50 = vsel %vm17_vm0, %v1856_v25, %v4889_v41  ;;  %v4918_v15 = vunpack.i.l.bf16 %v7254_v1  ;;  %v3154_v18 = vsel %vm17_vm0, %v1840_v32, %v4899_v49  ;;  %v3153_v39 = vsel %vm17_vm0, %v1839_v3, %v4898_v48 }
 0x21a   :  { %3957 = vmatpush3.bf16.xpose.msk.msra.mxu0 %vm6650_vm10, %v3955_v0  ;;  %5231 = vrot.lane.b32.xlu0 %v7316_v47, %s5363_s5  ;;  %v4924_v16 = vunpack.i.h.bf16 %v7274_v58  ;;  %v4923_v12 = vunpack.i.l.bf16 %v7274_v58  ;;  %v3202_v34 = vsel %vm1601_vm2, %v3170_v50, %v4904_v38  ;;  %v3201_v63 = vsel %vm1601_vm2, %v3169_v43, %v4903_v61 }
 0x21b   :  { %v4947_v4 = vpop.permute.xlu1 %4946  ;;  %v4939_v1 = vunpack.i.h.bf16 %v7302_v60  ;;  %v4938_v20 = vunpack.i.l.bf16 %v7302_v60  ;;  %v3185_v10 = vsel %vm1601_vm2, %v3153_v39, %v4908_v23  ;;  %v3186_v8 = vsel %vm1601_vm2, %v3154_v18, %v4909_v5 }
 0x21c   :  { %v4952_v44 = vpop.permute.xlu0 %4951  ;;  %v4949_v30 = vunpack.i.h.bf16 %v4947_v4  ;;  %v4948_v53 = vunpack.i.l.bf16 %v4947_v4  ;;  %v3233_v58 = vsel %vm1634_vm3, %v3201_v63, %v4913_v33  ;;  %v3217_v37 = vsel %vm1634_vm3, %v3185_v10, %v4918_v15 }
 0x21d   :  { %5236 = vrot.lane.b32.xlu1 %v7057_v29, %s5356_s7  ;;  %v3234_v29 = vsel %vm1634_vm3, %v3202_v34, %v4914_v21  ;;  %v3218_v59 = vsel %vm1634_vm3, %v3186_v8, %v4919_v27  ;;  %v3265_v41 = vsel %vm1667_vm4, %v3233_v58, %v4923_v12  ;;  %v4934_v36 = vunpack.i.h.bf16 %v7293_v7  ;;  %v8244_v58 = vld [vmem:[#allocation31_spill] sm:$0xff] }
 0x21e   :  { %5241 = vrot.lane.b32.xlu0 %v7070_v40, %s5357_s28  ;;  %v3266_v11 = vsel %vm1667_vm4, %v3234_v29, %v4924_v16  ;;  %v4933_v9 = vunpack.i.l.bf16 %v7293_v7  ;;  %v3297_v25 = vsel %vm1700_vm5, %v3265_v41, %v4938_v20  ;;  %v4944_v40 = vunpack.i.h.bf16 %v7333_v28 }
 0x21f   :  { %v4957_v62 = vpop.permute.xlu1 %4956  ;;  %v3298_v0 = vsel %vm1700_vm5, %v3266_v11, %v4939_v1  ;;  %v4943_v49 = vunpack.i.l.bf16 %v7333_v28  ;;  %v3329_v48 = vsel %vm1733_vm6, %v3297_v25, %v4948_v53  ;;  %v4954_v38 = vunpack.i.h.bf16 %v4952_v44  ;;  %v527_v53 = vld [vmem:[#allocation2 + $0xda] sm:$0xff] }
 0x220   :  { %v4959_v42 = vunpack.i.h.bf16 %v4957_v62  ;;  %v4958_v60 = vunpack.i.l.bf16 %v4957_v62  ;;  %v4962_v54 = vpop.permute.xlu0 %4961  ;;  %v3330_v3 = vsel %vm1733_vm6, %v3298_v0, %v4949_v30  ;;  %v3250_v28 = vsel %vm1667_vm4, %v3218_v59, %v4934_v36  ;;  %v528_v62 = vld [vmem:[#allocation2 + $0xe2] sm:$0xff] }
 0x221   :  { %5246 = vrot.lane.b32.xlu1 %v7091_v55, %s5357_s28  ;;  %v4953_v55 = vunpack.i.l.bf16 %v4952_v44  ;;  %v4964_v5 = vunpack.i.h.bf16 %v4962_v54  ;;  %v4963_v23 = vunpack.i.l.bf16 %v4962_v54  ;;  %v3249_v4 = vsel %vm1667_vm4, %v3217_v37, %v4933_v9  ;;  %v8243_v44 = vld [vmem:[#allocation25_spill] sm:$0xff]  ;;  %v5341_v11 = vld [vmem:[#allocation2 + $0x120] sm:$0xff] }
 0x222   :  { %5251 = vrot.lane.b32.xlu0 %v7235_v46, %s5358_s29  ;;  %v3361_v7 = vsel %vm1766_vm7, %v3329_v48, %v4958_v60  ;;  %v3362_v43 = vsel %vm1766_vm7, %v3330_v3, %v4959_v42  ;;  %v8242_v46 = vld [vmem:[#allocation19_spill] sm:$0xff]  ;;  %v3281_v18 = vsel %vm1700_vm5, %v3249_v4, %v4943_v49  ;;  %v3282_v39 = vsel %vm1700_vm5, %v3250_v28, %v4944_v40 }
 0x223   :  { %v4967_v32 = vpop.permute.xlu1 %4966  ;;  %v4184_v15 = vunpack.i.h.bf16 %v8242_v46  ;;  %v3314_v34 = vsel %vm1733_vm6, %v3282_v39, %v4954_v38  ;;  %v4183_v20 = vunpack.i.l.bf16 %v8242_v46  ;;  %v4224_v10 = vunpack.i.h.bf16 %v8243_v44  ;;  %v8246_v25 = vld [vmem:[#allocation43_spill] sm:$0xff] }
 0x224   :  { %v4969_v61 = vunpack.i.h.bf16 %v4967_v32  ;;  %v4968_v50 = vunpack.i.l.bf16 %v4967_v32  ;;  %v7389_v27 = vpop.permute.xlu0 %4971  ;;  %v3346_v30 = vsel %vm1766_vm7, %v3314_v34, %v4964_v5  ;;  %v4263_v29 = vunpack.i.l.bf16 %v8244_v58  ;;  %v2058_v32 = vld [vmem:[#allocation2 + $0x350] sm:$0xff]  ;;  %v8251_v34 = vld [vmem:[#allocation67_spill] sm:$0xff] }
 0x225   :  { %5256 = vrot.lane.b32.xlu1 %v7242_v17, %s5358_s29  ;;  %v3313_v17 = vsel %vm1733_vm6, %v3281_v18, %v4953_v55  ;;  %v1593_v35 = vsel %vm17_vm0, %v5341_v11, %v4103_v22  ;;  %v4264_v14 = vunpack.i.h.bf16 %v8244_v58  ;;  %v4344_v0 = vunpack.i.h.bf16 %v8246_v25  ;;  %v2042_v55 = vld [vmem:[#allocation2 + $0x290] sm:$0xff] }
 0x226   :  { %v3393_v21 = vsel %vm1799_vm8, %v3361_v7, %v4968_v50  ;;  %v3394_v33 = vsel %vm1799_vm8, %v3362_v43, %v4969_v61  ;;  %5261 = vrot.lane.b32.xlu0 %v7261_v52, %s5359_s30  ;;  %v3345_v8 = vsel %vm1766_vm7, %v3313_v17, %v4963_v23  ;;  %v4223_v52 = vunpack.i.l.bf16 %v8243_v44  ;;  %v8248_v50 = vld [vmem:[#allocation49_spill] sm:$0xff] }
 0x227   :  { %v4000_v16 = vpack.c.bf16 %v3394_v33, %v3393_v21  ;;  %v4977_v12 = vpop.permute.xlu1 %4976  ;;  %v4343_v54 = vunpack.i.l.bf16 %v8246_v25  ;;  %v5280_v40 = vpack.i.bf16 %v528_v62, %v527_v53  ;;  %v4069_v49 = vunpack.i.h.bf16 %v8247_v19  ;;  %v8249_v21 = vld [vmem:[#allocation55_spill] sm:$0xff]  ;;  %v2121_v25 = vld [vmem:[#allocation2 + $0x34a] sm:$0xff] }
 0x228   :  { %v4979_v63 = vunpack.i.h.bf16 %v4977_v12  ;;  %v4978_v1 = vunpack.i.l.bf16 %v4977_v12  ;;  %v7412_v41 = vpop.permute.xlu0 %4981  ;;  %v1610_v22 = vsel %vm1601_vm2, %v7311_v24, %v4143_v2  ;;  %v1611_v48 = vsel %vm1601_vm2, %v7298_v57, %v4144_v6  ;;  %v2041_v6 = vld [vmem:[#allocation2 + $0x288] sm:$0xff]  ;;  %v2090_v12 = vld [vmem:[#allocation2 + $0x351] sm:$0xff] }
 0x229   :  { %5266 = vrot.lane.b32.xlu1 %v5265_v51, %s5363_s5  ;;  %4002 = vmatprep.subr.msk.bf16.mxu1 %vm6650_vm10, %v4000_v16  ;;  %v8245_v51 = vld [vmem:[#allocation37_spill] sm:$0xff]  ;;  %v1626_v3 = vsel %vm1601_vm2, %v1593_v35, %v4183_v20  ;;  %v1627_v38 = vsel %vm1601_vm2, %v7321_v26, %v4184_v15  ;;  %v1643_v24 = vsel %vm1634_vm3, %v1610_v22, %v4223_v52  ;;  %v4384_v7 = vunpack.i.h.bf16 %v8248_v50  ;;  %v8253_v52 = vld [vmem:[#allocation79_spill] sm:$0xff] }
 0x22a   :  { %v3377_v37 = vsel %vm1799_vm8, %v3345_v8, %v4978_v1  ;;  %v3378_v59 = vsel %vm1799_vm8, %v3346_v30, %v4979_v63  ;;  %v4303_v42 = vunpack.i.l.bf16 %v8245_v51  ;;  %v4304_v9 = vunpack.i.h.bf16 %v8245_v51  ;;  %5271 = vrot.lane.b32.xlu0 %v7268_v45, %s5359_s30  ;;  %v2057_v45 = vld [vmem:[#allocation2 + $0x348] sm:$0xff]  ;;  %v8250_v15 = vld [vmem:[#allocation61_spill] sm:$0xff] }
 0x22b   :  { %v4003_v60 = vpack.c.bf16 %v3378_v59, %v3377_v37  ;;  %v7419_v36 = vpop.permute.xlu1 %4986  ;;  %v1644_v13 = vsel %vm1634_vm3, %v1611_v48, %v4224_v10  ;;  %v1659_v2 = vsel %vm1634_vm3, %v1626_v3, %v4263_v29  ;;  %v4383_v43 = vunpack.i.l.bf16 %v8248_v50  ;;  %v2089_v16 = vld [vmem:[#allocation2 + $0x349] sm:$0xff]  ;;  %v2074_v30 = vld [vmem:[#allocation2 + $0x291] sm:$0xff] }
 0x22c   :  { %v7445_v57 = vpop.permute.xlu0 %4991  ;;  %v1676_v61 = vsel %vm1667_vm4, %v1643_v24, %v4303_v42  ;;  %v1677_v26 = vsel %vm1667_vm4, %v1644_v13, %v4304_v9  ;;  %v1692_v23 = vsel %vm1667_vm4, %v1659_v2, %v4343_v54  ;;  %v5290_v4 = vpack.i.bf16 %v2058_v32, %v2057_v45  ;;  %v8252_v20 = vld [vmem:[#allocation73_spill] sm:$0xff] }
 0x22d   :  { %5276 = vrot.lane.b32.xlu1 %v7283_v56, %s5360_s26  ;;  %4005 = vmatpush3.bf16.xpose.msk.msra.mxu1 %vm6650_vm10, %v4003_v60  ;;  %v1660_v56 = vsel %vm1634_vm3, %v1627_v38, %v4264_v14  ;;  %v4424_v33 = vunpack.i.h.bf16 %v8249_v21  ;;  %v4423_v46 = vunpack.i.l.bf16 %v8249_v21  ;;  %v4463_v18 = vunpack.i.l.bf16 %v8250_v15  ;;  %v2073_v8 = vld [vmem:[#allocation2 + $0x289] sm:$0xff]  ;;  %v2106_v32 = vld [vmem:[#allocation2 + $0x292] sm:$0xff]  ;;  %v3403_v38 = vld [vmem:[%s8024_s1] sm:$0xff] }
 0x22e   :  { %v1693_v28 = vsel %vm1667_vm4, %v1660_v56, %v4344_v0  ;;  %5281 = vrot.lane.b32.xlu0 %v5280_v40, %s5363_s5  ;;  %v5295_v39 = vpack.i.bf16 %v2042_v55, %v2041_v6  ;;  %v4464_v17 = vunpack.i.h.bf16 %v8250_v15  ;;  %v4504_v63 = vunpack.i.h.bf16 %v8251_v34  ;;  %v8254_v59 = vld [vmem:[#allocation85_spill] sm:$0xff]  ;;  %3898 = vmatprep.mubr.msk.f32.mxu0 %vm3404_vm9, %v3403_v38 }
 0x22f   :  { %v7451_v5 = vpop.permute.xlu1 %4996  ;;  %v4503_v1 = vunpack.i.l.bf16 %v8251_v34  ;;  %v4543_v44 = vunpack.i.l.bf16 %v8252_v20  ;;  %v1709_v53 = vsel %vm1700_vm5, %v1676_v61, %v4383_v43  ;;  %v1710_v62 = vsel %vm1700_vm5, %v1677_v26, %v4384_v7  ;;  %v2122_v0 = vld [vmem:[#allocation2 + $0x352] sm:$0xff]  ;;  %v2105_v45 = vld [vmem:[#allocation2 + $0x28a] sm:$0xff]  ;;  %3932 = vmatprep.mubr.msk.f32.mxu1 %vm3404_vm9, %v3403_v38 }
 0x230   :  { %v7466_v10 = vpop.permute.xlu0 %5001  ;;  %v4583_v58 = vunpack.i.l.bf16 %v8253_v52  ;;  %v4584_v37 = vunpack.i.h.bf16 %v8253_v52  ;;  %v4624_v11 = vunpack.i.h.bf16 %v8254_v59  ;;  %v4623_v35 = vunpack.i.l.bf16 %v8254_v59 }
 0x231   :  { %5286 = vrot.lane.b32.xlu1 %v7316_v47, %s5360_s26  ;;  %v4544_v47 = vunpack.i.h.bf16 %v8252_v20  ;;  %v5300_v14 = vpack.i.bf16 %v2090_v12, %v2089_v16  ;;  %v1725_v51 = vsel %vm1700_vm5, %v1692_v23, %v4423_v46  ;;  %v1726_v42 = vsel %vm1700_vm5, %v1693_v28, %v4424_v33  ;;  %v8255_v33 = vld [vmem:[#allocation8_spill] sm:$0xff]  ;;  %v8256_v16 = vld [vmem:[#allocation14_spill] sm:$0xff] }
 0x232   :  { %5291 = vrot.lane.b32.xlu0 %v5290_v4, %s5361_s13  ;;  %v1742_v60 = vsel %vm1733_vm6, %v1709_v53, %v4463_v18  ;;  %v5305_v9 = vpack.i.bf16 %v2074_v30, %v2073_v8  ;;  %v1743_v54 = vsel %vm1733_vm6, %v1710_v62, %v4464_v17  ;;  %v1758_v40 = vsel %vm1733_vm6, %v1725_v51, %v4503_v1  ;;  %v5342_v4 = vld [vmem:[#allocation2 + $0x80] sm:$0xff]  ;;  %v1857_v8 = vld [vmem:[#allocation2 + $0x2d0] sm:$0xff]  ;;  %v1858_v30 = vld [vmem:[#allocation2 + $0x2d8] sm:$0xff] }
 0x233   :  { %v7472_v29 = vpop.permute.xlu1 %5006  ;;  %v1759_v22 = vsel %vm1733_vm6, %v1726_v42, %v4504_v63  ;;  %v1775_v48 = vsel %vm1766_vm7, %v1742_v60, %v4543_v44  ;;  %v1776_v24 = vsel %vm1766_vm7, %v1743_v54, %v4544_v47  ;;  %v1791_v13 = vsel %vm1766_vm7, %v1758_v40, %v4583_v58  ;;  %v8257_v44 = vld [vmem:[#allocation20_spill] sm:$0xff]  ;;  %v1841_v47 = vld [vmem:[#allocation2 + $0x210] sm:$0xff] }
 0x234   :  { %v5012_v3 = vpop.permute.xlu0 %5011  ;;  %v1792_v56 = vsel %vm1766_vm7, %v1759_v22, %v4584_v37  ;;  %v1808_v61 = vsel %vm1799_vm8, %v1775_v48, %v4623_v35  ;;  %v1809_v50 = vsel %vm1799_vm8, %v1776_v24, %v4624_v11  ;;  %v5310_v7 = vpack.i.bf16 %v2122_v0, %v2121_v25  ;;  %v8258_v11 = vld [vmem:[#allocation26_spill] sm:$0xff] }
 0x235   :  { %5296 = vrot.lane.b32.xlu1 %v5295_v39, %s5361_s13  ;;  %v5014_v2 = vunpack.i.h.bf16 %v5012_v3  ;;  %v5013_v6 = vunpack.i.l.bf16 %v5012_v3  ;;  %v4068_v43 = vunpack.i.l.bf16 %v8247_v19  ;;  %v5315_v28 = vpack.i.bf16 %v2106_v32, %v2105_v45 }
 0x236   :  { %5301 = vrot.lane.b32.xlu0 %v5300_v14, %s5362_s22  ;;  %v7506_v21 = vsel %vm17_vm0, %v5342_v4, %v4069_v49  ;;  %v4109_v46 = vunpack.i.h.bf16 %v8255_v33  ;;  %v4108_v15 = vunpack.i.l.bf16 %v8255_v33  ;;  %v4149_v12 = vunpack.i.h.bf16 %v8256_v16 }
 0x237   :  { %v7491_v55 = vpop.permute.xlu1 %5016  ;;  %v1824_v26 = vsel %vm1799_vm8, %v1791_v13, %v5013_v6  ;;  %v1825_v23 = vsel %vm1799_vm8, %v1792_v56, %v5014_v2  ;;  %v4974_v17 = vunpack.i.h.bf16 %v7389_v27  ;;  %v4973_v34 = vunpack.i.l.bf16 %v7389_v27  ;;  %v1842_v27 = vld [vmem:[#allocation2 + $0x218] sm:$0xff] }
 0x238   :  { %v3958_v18 = vpack.c.bf16 %v1825_v23, %v1824_v26  ;;  %v5022_v39 = vpop.permute.xlu0 %5021  ;;  %v3961_v1 = vpack.c.bf16 %v1809_v50, %v1808_v61  ;;  %v4148_v20 = vunpack.i.l.bf16 %v8256_v16  ;;  %v4189_v49 = vunpack.i.h.bf16 %v8257_v44 }
 0x239   :  { %5306 = vrot.lane.b32.xlu1 %v5305_v9, %s5362_s22  ;;  %v4984_v53 = vunpack.i.h.bf16 %v7412_v41  ;;  %v4983_v62 = vunpack.i.l.bf16 %v7412_v41  ;;  %v4989_v52 = vunpack.i.h.bf16 %v7419_v36  ;;  %v4988_v58 = vunpack.i.l.bf16 %v7419_v36 }
 0x23a   :  { %5311 = vrot.lane.b32.xlu0 %v5310_v7, %s5363_s5  ;;  %3960 = vmatprep.subr.msk.bf16.mxu0 %vm6650_vm10, %v3958_v18  ;;  %v4994_v37 = vunpack.i.h.bf16 %v7445_v57  ;;  %v4993_v59 = vunpack.i.l.bf16 %v7445_v57  ;;  %v4188_v41 = vunpack.i.l.bf16 %v8257_v44  ;;  %v4229_v35 = vunpack.i.h.bf16 %v8258_v11 }
 0x23b   :  { %v7513_v63 = vpop.permute.xlu1 %5026  ;;  %3963 = vmatpush3.bf16.xpose.msk.msra.mxu0 %vm6650_vm10, %v3961_v1  ;;  %v4999_v14 = vunpack.i.h.bf16 %v7451_v5  ;;  %v4998_v51 = vunpack.i.l.bf16 %v7451_v5  ;;  %v3172_v36 = vsel %vm17_vm0, %v1858_v30, %v4974_v17  ;;  %v3171_v60 = vsel %vm17_vm0, %v1857_v8, %v4973_v34 }
 0x23c   :  { %v5032_v42 = vpop.permute.xlu0 %5031  ;;  %v5004_v57 = vunpack.i.h.bf16 %v7466_v10  ;;  %v5003_v9 = vunpack.i.l.bf16 %v7466_v10  ;;  %v3156_v0 = vsel %vm17_vm0, %v1842_v27, %v4984_v53  ;;  %v3155_v54 = vsel %vm17_vm0, %v1841_v47, %v4983_v62 }
 0x23d   :  { %5316 = vrot.lane.b32.xlu1 %v5315_v28, %s5363_s5  ;;  %v5009_v40 = vunpack.i.h.bf16 %v7472_v29  ;;  %v5008_v22 = vunpack.i.l.bf16 %v7472_v29  ;;  %v3203_v5 = vsel %vm1601_vm2, %v3171_v60, %v4988_v58  ;;  %v3204_v48 = vsel %vm1601_vm2, %v3172_v36, %v4989_v52 }
 0x23e   :  { %v3187_v3 = vsel %vm1601_vm2, %v3155_v54, %v4993_v59  ;;  %v3188_v45 = vsel %vm1601_vm2, %v3156_v0, %v4994_v37  ;;  %v3235_v32 = vsel %vm1634_vm3, %v3203_v5, %v4998_v51  ;;  %v3236_v10 = vsel %vm1634_vm3, %v3204_v48, %v4999_v14  ;;  %v8259_v48 = vld [vmem:[#allocation32_spill] sm:$0xff] }
 0x23f   :  { %v5037_v25 = vpop.permute.xlu1 %5036  ;;  %v5024_v38 = vunpack.i.h.bf16 %v5022_v39  ;;  %v5023_v24 = vunpack.i.l.bf16 %v5022_v39  ;;  %v3219_v2 = vsel %vm1634_vm3, %v3187_v3, %v5003_v9  ;;  %v3220_v6 = vsel %vm1634_vm3, %v3188_v45, %v5004_v57 }
 0x240   :  { %v5042_v13 = vpop.permute.xlu0 %5041  ;;  %v5034_v29 = vunpack.i.h.bf16 %v5032_v42  ;;  %v5033_v56 = vunpack.i.l.bf16 %v5032_v42  ;;  %v3267_v50 = vsel %vm1667_vm4, %v3235_v32, %v5008_v22  ;;  %v3268_v7 = vsel %vm1667_vm4, %v3236_v10, %v5009_v40 }
 0x241   :  { %v5044_v26 = vunpack.i.h.bf16 %v5042_v13  ;;  %v5043_v23 = vunpack.i.l.bf16 %v5042_v13  ;;  %v5019_v28 = vunpack.i.h.bf16 %v7491_v55  ;;  %v5018_v4 = vunpack.i.l.bf16 %v7491_v55 }
 0x242   :  { %v5029_v18 = vunpack.i.h.bf16 %v7513_v63  ;;  %v5028_v39 = vunpack.i.l.bf16 %v7513_v63  ;;  %v3299_v17 = vsel %vm1700_vm5, %v3267_v50, %v5023_v24  ;;  %v3300_v34 = vsel %vm1700_vm5, %v3268_v7, %v5024_v38  ;;  %v8260_v38 = vld [vmem:[#allocation38_spill] sm:$0xff] }
 0x243   :  { %v5047_v61 = vpop.permute.xlu1 %5046  ;;  %v5039_v1 = vunpack.i.h.bf16 %v5037_v25  ;;  %v5038_v8 = vunpack.i.l.bf16 %v5037_v25  ;;  %v3331_v53 = vsel %vm1733_vm6, %v3299_v17, %v5033_v56  ;;  %v3332_v62 = vsel %vm1733_vm6, %v3300_v34, %v5034_v29  ;;  %v5343_v29 = vld [vmem:[#allocation2 + $0x78] sm:$0xff] }
 0x244   :  { %v5052_v30 = vpop.permute.xlu0 %5051  ;;  %v3363_v55 = vsel %vm1766_vm7, %v3331_v53, %v5043_v23  ;;  %v3364_v58 = vsel %vm1766_vm7, %v3332_v62, %v5044_v26  ;;  %v5049_v63 = vunpack.i.h.bf16 %v5047_v61  ;;  %v5048_v37 = vunpack.i.l.bf16 %v5047_v61  ;;  %v5344_v61 = vld [vmem:[#allocation2 + $0x140] sm:$0xff]  ;;  %v5345_v7 = vld [vmem:[#allocation2 + $0x138] sm:$0xff] }
 0x245   :  { %v5054_v47 = vunpack.i.h.bf16 %v5052_v30  ;;  %v5053_v27 = vunpack.i.l.bf16 %v5052_v30  ;;  %v3251_v59 = vsel %vm1667_vm4, %v3219_v2, %v5018_v4  ;;  %v3252_v14 = vsel %vm1667_vm4, %v3220_v6, %v5019_v28  ;;  %v8264_v30 = vld [vmem:[#allocation62_spill] sm:$0xff] }
 0x246   :  { %v4228_v36 = vunpack.i.l.bf16 %v8258_v11  ;;  %v3283_v60 = vsel %vm1700_vm5, %v3251_v59, %v5028_v39  ;;  %v3284_v57 = vsel %vm1700_vm5, %v3252_v14, %v5029_v18  ;;  %v4269_v3 = vunpack.i.h.bf16 %v8259_v48  ;;  %v8262_v39 = vld [vmem:[#allocation50_spill] sm:$0xff] }
 0x247   :  { %v7559_v52 = vpop.permute.xlu1 %5056  ;;  %v3395_v51 = vsel %vm1799_vm8, %v3363_v55, %v5053_v27  ;;  %v3396_v42 = vsel %vm1799_vm8, %v3364_v58, %v5054_v47  ;;  %v3315_v0 = vsel %vm1733_vm6, %v3283_v60, %v5038_v8  ;;  %v3316_v54 = vsel %vm1733_vm6, %v3284_v57, %v5039_v1  ;;  %v8265_v47 = vld [vmem:[#allocation68_spill] sm:$0xff]  ;;  %v8266_v59 = vld [vmem:[#allocation74_spill] sm:$0xff] }
 0x248   :  { %v4006_v9 = vpack.c.bf16 %v3396_v42, %v3395_v51  ;;  %v5062_v25 = vpop.permute.xlu0 %5061  ;;  %v4268_v45 = vunpack.i.l.bf16 %v8259_v48  ;;  %v3347_v32 = vsel %vm1766_vm7, %v3315_v0, %v5048_v37  ;;  %v3348_v10 = vsel %vm1766_vm7, %v3316_v54, %v5049_v63  ;;  %v8267_v42 = vld [vmem:[#allocation80_spill] sm:$0xff]  ;;  %v8268_v57 = vld [vmem:[#allocation86_spill] sm:$0xff] }
 0x249   :  { %v5064_v40 = vunpack.i.h.bf16 %v5062_v25  ;;  %v5063_v22 = vunpack.i.l.bf16 %v5062_v25  ;;  %v4309_v24 = vunpack.i.h.bf16 %v8260_v38  ;;  %v4308_v13 = vunpack.i.l.bf16 %v8260_v38 }
 0x24a   :  { %4008 = vmatprep.subr.msk.bf16.mxu1 %vm6650_vm10, %v4006_v9  ;;  %v1579_v56 = vsel %vm17_vm0, %v5343_v29, %v4068_v43  ;;  %v1596_v50 = vsel %vm17_vm0, %v5344_v61, %v4109_v46  ;;  %v1595_v26 = vsel %vm17_vm0, %v5345_v7, %v4108_v15  ;;  %v1613_v19 = vsel %vm1601_vm2, %v7506_v21, %v4149_v12  ;;  %v8261_v12 = vld [vmem:[#allocation44_spill] sm:$0xff] }
 0x24b   :  { %v7572_v5 = vpop.permute.xlu1 %5066  ;;  %v3379_v2 = vsel %vm1799_vm8, %v3347_v32, %v5063_v22  ;;  %v3380_v6 = vsel %vm1799_vm8, %v3348_v10, %v5064_v40  ;;  %v1612_v43 = vsel %vm1601_vm2, %v1579_v56, %v4148_v20  ;;  %v1629_v46 = vsel %vm1601_vm2, %v1596_v50, %v4189_v49 }
 0x24c   :  { %v4009_v23 = vpack.c.bf16 %v3380_v6, %v3379_v2  ;;  %v7593_v28 = vpop.permute.xlu0 %5071  ;;  %v1628_v33 = vsel %vm1601_vm2, %v1595_v26, %v4188_v41  ;;  %v1645_v4 = vsel %vm1634_vm3, %v1612_v43, %v4228_v36  ;;  %v1646_v21 = vsel %vm1634_vm3, %v1613_v19, %v4229_v35  ;;  %v8263_v35 = vld [vmem:[#allocation56_spill] sm:$0xff] }
 0x24d   :  { %v4349_v16 = vunpack.i.h.bf16 %v8261_v12  ;;  %v4348_v20 = vunpack.i.l.bf16 %v8261_v12  ;;  %v1661_v49 = vsel %vm1634_vm3, %v1628_v33, %v4268_v45  ;;  %v1662_v44 = vsel %vm1634_vm3, %v1629_v46, %v4269_v3 }
 0x24e   :  { %4011 = vmatpush3.bf16.xpose.msk.msra.mxu1 %vm6650_vm10, %v4009_v23  ;;  %v1678_v41 = vsel %vm1667_vm4, %v1645_v4, %v4308_v13  ;;  %v1679_v18 = vsel %vm1667_vm4, %v1646_v21, %v4309_v24  ;;  %v4389_v17 = vunpack.i.h.bf16 %v8262_v39  ;;  %v4388_v11 = vunpack.i.l.bf16 %v8262_v39  ;;  %v1859_v4 = vld [vmem:[#allocation2 + $0x2e8] sm:$0xff]  ;;  %v1860_v21 = vld [vmem:[#allocation2 + $0x2f0] sm:$0xff] }
 0x24f   :  { %v7608_v15 = vpop.permute.xlu1 %5076  ;;  %v4429_v34 = vunpack.i.h.bf16 %v8263_v35  ;;  %v4428_v1 = vunpack.i.l.bf16 %v8263_v35  ;;  %v4469_v53 = vunpack.i.h.bf16 %v8264_v30  ;;  %v4468_v62 = vunpack.i.l.bf16 %v8264_v30 }
 0x250   :  { %v7626_v8 = vpop.permute.xlu0 %5081  ;;  %v4509_v27 = vunpack.i.h.bf16 %v8265_v47  ;;  %v4508_v55 = vunpack.i.l.bf16 %v8265_v47  ;;  %v1694_v63 = vsel %vm1667_vm4, %v1661_v49, %v4348_v20  ;;  %v1695_v37 = vsel %vm1667_vm4, %v1662_v44, %v4349_v16  ;;  %v8269_v16 = vld [vmem:[#allocation5_spill] sm:$0xff] }
 0x251   :  { %v4549_v14 = vunpack.i.h.bf16 %v8266_v59  ;;  %v4548_v51 = vunpack.i.l.bf16 %v8266_v59  ;;  %v4589_v36 = vunpack.i.h.bf16 %v8267_v42  ;;  %v4588_v60 = vunpack.i.l.bf16 %v8267_v42 }
 0x252   :  { %v4629_v9 = vunpack.i.h.bf16 %v8268_v57  ;;  %v4628_v25 = vunpack.i.l.bf16 %v8268_v57  ;;  %v1711_v0 = vsel %vm1700_vm5, %v1678_v41, %v4388_v11  ;;  %v1712_v54 = vsel %vm1700_vm5, %v1679_v18, %v4389_v17  ;;  %v8270_v18 = vld [vmem:[#allocation9_spill] sm:$0xff]  ;;  %v1843_v17 = vld [vmem:[#allocation2 + $0x228] sm:$0xff] }
 0x253   :  { %v7632_v58 = vpop.permute.xlu1 %5086  ;;  %v1727_v40 = vsel %vm1700_vm5, %v1694_v63, %v4428_v1  ;;  %v1728_v22 = vsel %vm1700_vm5, %v1695_v37, %v4429_v34  ;;  %v1744_v3 = vsel %vm1733_vm6, %v1711_v0, %v4468_v62  ;;  %v1745_v45 = vsel %vm1733_vm6, %v1712_v54, %v4469_v53 }
 0x254   :  { %v7646_v48 = vpop.permute.xlu0 %5091  ;;  %v1760_v32 = vsel %vm1733_vm6, %v1727_v40, %v4508_v55  ;;  %v1761_v10 = vsel %vm1733_vm6, %v1728_v22, %v4509_v27  ;;  %v1777_v24 = vsel %vm1766_vm7, %v1744_v3, %v4548_v51  ;;  %v1778_v13 = vsel %vm1766_vm7, %v1745_v45, %v4549_v14 }
 0x255   :  { %v1793_v29 = vsel %vm1766_vm7, %v1760_v32, %v4588_v60  ;;  %v1794_v56 = vsel %vm1766_vm7, %v1761_v10, %v4589_v36  ;;  %v1810_v61 = vsel %vm1799_vm8, %v1777_v24, %v4628_v25  ;;  %v1811_v50 = vsel %vm1799_vm8, %v1778_v13, %v4629_v9 }
 0x256   :  { %v5059_v19 = vunpack.i.h.bf16 %v7559_v52  ;;  %v5058_v43 = vunpack.i.l.bf16 %v7559_v52  ;;  %v3967_v12 = vpack.c.bf16 %v1811_v50, %v1810_v61  ;;  %v4074_v20 = vunpack.i.h.bf16 %v8269_v16  ;;  %v1844_v52 = vld [vmem:[#allocation2 + $0x230] sm:$0xff] }
 0x257   :  { %v5097_v38 = vpop.permute.xlu1 %5096  ;;  %v5069_v49 = vunpack.i.h.bf16 %v7572_v5  ;;  %v5068_v44 = vunpack.i.l.bf16 %v7572_v5  ;;  %v4073_v41 = vunpack.i.l.bf16 %v8269_v16  ;;  %v4114_v39 = vunpack.i.h.bf16 %v8270_v18 }
 0x258   :  { %v5099_v2 = vunpack.i.h.bf16 %v5097_v38  ;;  %v5098_v6 = vunpack.i.l.bf16 %v5097_v38  ;;  %v7660_v23 = vpop.permute.xlu0 %5101  ;;  %v5074_v11 = vunpack.i.h.bf16 %v7593_v28  ;;  %v5073_v35 = vunpack.i.l.bf16 %v7593_v28 }
 0x259   :  { %v3174_v1 = vsel %vm17_vm0, %v1860_v21, %v5059_v19  ;;  %v3173_v5 = vsel %vm17_vm0, %v1859_v4, %v5058_v43  ;;  %v5079_v30 = vunpack.i.h.bf16 %v7608_v15  ;;  %v5078_v53 = vunpack.i.l.bf16 %v7608_v15 }
 0x25a   :  { %v1826_v7 = vsel %vm1799_vm8, %v1793_v29, %v5098_v6  ;;  %v1827_v26 = vsel %vm1799_vm8, %v1794_v56, %v5099_v2  ;;  %v5084_v47 = vunpack.i.h.bf16 %v7626_v8  ;;  %v5083_v27 = vunpack.i.l.bf16 %v7626_v8 }
 0x25b   :  { %v3964_v46 = vpack.c.bf16 %v1827_v26, %v1826_v7  ;;  %v5107_v33 = vpop.permute.xlu1 %5106  ;;  %v5089_v55 = vunpack.i.h.bf16 %v7632_v58  ;;  %v5088_v28 = vunpack.i.l.bf16 %v7632_v58  ;;  %v3158_v63 = vsel %vm17_vm0, %v1844_v52, %v5069_v49 }
 0x25c   :  { %v5112_v34 = vpop.permute.xlu0 %5111  ;;  %v3157_v37 = vsel %vm17_vm0, %v1843_v17, %v5068_v44  ;;  %v5094_v59 = vunpack.i.h.bf16 %v7646_v48  ;;  %v5093_v14 = vunpack.i.l.bf16 %v7646_v48  ;;  %v3206_v51 = vsel %vm1601_vm2, %v3174_v1, %v5074_v11 }
 0x25d   :  { %3966 = vmatprep.subr.msk.bf16.mxu0 %vm6650_vm10, %v3964_v46  ;;  %v3205_v15 = vsel %vm1601_vm2, %v3173_v5, %v5073_v35  ;;  %v5109_v42 = vunpack.i.h.bf16 %v5107_v33  ;;  %v5108_v36 = vunpack.i.l.bf16 %v5107_v33  ;;  %v3189_v8 = vsel %vm1601_vm2, %v3157_v37, %v5078_v53  ;;  %v8272_v37 = vld [vmem:[#allocation21_spill] sm:$0xff] }
 0x25e   :  { %3969 = vmatpush3.bf16.xpose.msk.msra.mxu0 %vm6650_vm10, %v3967_v12  ;;  %v3190_v57 = vsel %vm1601_vm2, %v3158_v63, %v5079_v30  ;;  %v3237_v0 = vsel %vm1634_vm3, %v3205_v15, %v5083_v27  ;;  %v3238_v54 = vsel %vm1634_vm3, %v3206_v51, %v5084_v47  ;;  %v3221_v40 = vsel %vm1634_vm3, %v3189_v8, %v5088_v28  ;;  %v8271_v47 = vld [vmem:[#allocation15_spill] sm:$0xff] }
 0x25f   :  { %v5117_v62 = vpop.permute.xlu1 %5116  ;;  %v3222_v22 = vsel %vm1634_vm3, %v3190_v57, %v5089_v55  ;;  %v3269_v48 = vsel %vm1667_vm4, %v3237_v0, %v5093_v14  ;;  %v3270_v3 = vsel %vm1667_vm4, %v3238_v54, %v5094_v59  ;;  %v5104_v10 = vunpack.i.h.bf16 %v7660_v23  ;;  %v8275_v54 = vld [vmem:[#allocation39_spill] sm:$0xff] }
 0x260   :  { %v5122_v60 = vpop.permute.xlu0 %5121  ;;  %v5119_v58 = vunpack.i.h.bf16 %v5117_v62  ;;  %v5118_v9 = vunpack.i.l.bf16 %v5117_v62  ;;  %v5103_v38 = vunpack.i.l.bf16 %v7660_v23  ;;  %v3301_v24 = vsel %vm1700_vm5, %v3269_v48, %v5108_v36  ;;  %v8273_v36 = vld [vmem:[#allocation27_spill] sm:$0xff]  ;;  %v5346_v48 = vld [vmem:[#allocation2 + $0x98] sm:$0xff] }
 0x261   :  { %v3302_v13 = vsel %vm1700_vm5, %v3270_v3, %v5109_v42  ;;  %v5114_v6 = vunpack.i.h.bf16 %v5112_v34  ;;  %v5113_v29 = vunpack.i.l.bf16 %v5112_v34  ;;  %v5124_v7 = vunpack.i.h.bf16 %v5122_v60 }
 0x262   :  { %v3333_v56 = vsel %vm1733_vm6, %v3301_v24, %v5118_v9  ;;  %v3334_v61 = vsel %vm1733_vm6, %v3302_v13, %v5119_v58  ;;  %v5123_v26 = vunpack.i.l.bf16 %v5122_v60  ;;  %v3254_v21 = vsel %vm1667_vm4, %v3222_v22, %v5104_v10  ;;  %v8274_v9 = vld [vmem:[#allocation33_spill] sm:$0xff]  ;;  %v5348_v10 = vld [vmem:[#allocation2 + $0x158] sm:$0xff] }
 0x263   :  { %v5127_v25 = vpop.permute.xlu1 %5126  ;;  %v3253_v12 = vsel %vm1667_vm4, %v3221_v40, %v5103_v38  ;;  %v4113_v52 = vunpack.i.l.bf16 %v8270_v18  ;;  %v3286_v35 = vsel %vm1700_vm5, %v3254_v21, %v5114_v6  ;;  %v4154_v27 = vunpack.i.h.bf16 %v8271_v47  ;;  %v5349_v24 = vld [vmem:[#allocation2 + $0x150] sm:$0xff] }
 0x264   :  { %v5129_v45 = vunpack.i.h.bf16 %v5127_v25  ;;  %v5128_v32 = vunpack.i.l.bf16 %v5127_v25  ;;  %v5132_v2 = vpop.permute.xlu0 %5131  ;;  %v3285_v11 = vsel %vm1700_vm5, %v3253_v12, %v5113_v29  ;;  %v3318_v30 = vsel %vm1733_vm6, %v3286_v35, %v5124_v7  ;;  %v8276_v29 = vld [vmem:[#allocation45_spill] sm:$0xff] }
 0x265   :  { %v5134_v33 = vunpack.i.h.bf16 %v5132_v2  ;;  %v5133_v4 = vunpack.i.l.bf16 %v5132_v2  ;;  %v3317_v5 = vsel %vm1733_vm6, %v3285_v11, %v5123_v26  ;;  %v4153_v55 = vunpack.i.l.bf16 %v8271_v47  ;;  %v8280_v11 = vld [vmem:[#allocation69_spill] sm:$0xff] }
 0x266   :  { %v3365_v46 = vsel %vm1766_vm7, %v3333_v56, %v5128_v32  ;;  %v3366_v23 = vsel %vm1766_vm7, %v3334_v61, %v5129_v45  ;;  %v4194_v59 = vunpack.i.h.bf16 %v8272_v37  ;;  %v4193_v14 = vunpack.i.l.bf16 %v8272_v37  ;;  %v5347_v45 = vld [vmem:[#allocation2 + $0x90] sm:$0xff] }
 0x267   :  { %v5137_v50 = vpop.permute.xlu1 %5136  ;;  %v3349_v28 = vsel %vm1766_vm7, %v3317_v5, %v5133_v4  ;;  %v3350_v63 = vsel %vm1766_vm7, %v3318_v30, %v5134_v33  ;;  %v4234_v60 = vunpack.i.h.bf16 %v8273_v36  ;;  %v4233_v8 = vunpack.i.l.bf16 %v8273_v36  ;;  %v8278_v4 = vld [vmem:[#allocation57_spill] sm:$0xff] }
 0x268   :  { %v5139_v19 = vunpack.i.h.bf16 %v5137_v50  ;;  %v5138_v43 = vunpack.i.l.bf16 %v5137_v50  ;;  %v7709_v17 = vpop.permute.xlu0 %5141  ;;  %v4274_v25 = vunpack.i.h.bf16 %v8274_v9  ;;  %v4273_v0 = vunpack.i.l.bf16 %v8274_v9  ;;  %v8283_v37 = vld [vmem:[#allocation89_spill] sm:$0xff] }
 0x269   :  { %v4314_v40 = vunpack.i.h.bf16 %v8275_v54  ;;  %v4313_v22 = vunpack.i.l.bf16 %v8275_v54  ;;  %v1582_v3 = vsel %vm17_vm0, %v5346_v48, %v4074_v20  ;;  %v1581_v32 = vsel %vm17_vm0, %v5347_v45, %v4073_v41 }
 0x26a   :  { %v3397_v49 = vsel %vm1799_vm8, %v3365_v46, %v5138_v43  ;;  %v3398_v44 = vsel %vm1799_vm8, %v3366_v23, %v5139_v19  ;;  %v1598_v38 = vsel %vm17_vm0, %v5348_v10, %v4114_v39  ;;  %v1597_v13 = vsel %vm17_vm0, %v5349_v24, %v4113_v52  ;;  %v8277_v46 = vld [vmem:[#allocation51_spill] sm:$0xff] }
 0x26b   :  { %v4012_v34 = vpack.c.bf16 %v3398_v44, %v3397_v49  ;;  %v5147_v1 = vpop.permute.xlu1 %5146  ;;  %v1614_v2 = vsel %vm1601_vm2, %v1581_v32, %v4153_v55  ;;  %v1615_v20 = vsel %vm1601_vm2, %v1582_v3, %v4154_v27  ;;  %v1630_v6 = vsel %vm1601_vm2, %v1597_v13, %v4193_v14  ;;  %v8279_v49 = vld [vmem:[#allocation63_spill] sm:$0xff]  ;;  %v8282_v55 = vld [vmem:[#allocation81_spill] sm:$0xff] }
 0x26c   :  { %v5149_v53 = vunpack.i.h.bf16 %v5147_v1  ;;  %v5148_v62 = vunpack.i.l.bf16 %v5147_v1  ;;  %v7726_v42 = vpop.permute.xlu0 %5151  ;;  %v1631_v16 = vsel %vm1601_vm2, %v1598_v38, %v4194_v59  ;;  %v1647_v18 = vsel %vm1634_vm3, %v1614_v2, %v4233_v8 }
 0x26d   :  { %4014 = vmatprep.subr.msk.bf16.mxu1 %vm6650_vm10, %v4012_v34  ;;  %v1648_v39 = vsel %vm1634_vm3, %v1615_v20, %v4234_v60  ;;  %v4354_v56 = vunpack.i.h.bf16 %v8276_v29  ;;  %v4353_v61 = vunpack.i.l.bf16 %v8276_v29  ;;  %v1663_v7 = vsel %vm1634_vm3, %v1630_v6, %v4273_v0  ;;  %v1861_v29 = vld [vmem:[#allocation2 + $0x300] sm:$0xff] }
 0x26e   :  { %v3381_v51 = vsel %vm1799_vm8, %v3349_v28, %v5148_v62  ;;  %v3382_v15 = vsel %vm1799_vm8, %v3350_v63, %v5149_v53  ;;  %v1664_v26 = vsel %vm1634_vm3, %v1631_v16, %v4274_v25  ;;  %v1680_v19 = vsel %vm1667_vm4, %v1647_v18, %v4313_v22  ;;  %v8281_v53 = vld [vmem:[#allocation75_spill] sm:$0xff] }
 0x26f   :  { %v4015_v57 = vpack.c.bf16 %v3382_v15, %v3381_v51  ;;  %v7730_v58 = vpop.permute.xlu1 %5156  ;;  %v1681_v43 = vsel %vm1667_vm4, %v1648_v39, %v4314_v40  ;;  %v4394_v23 = vunpack.i.h.bf16 %v8277_v46  ;;  %v4393_v33 = vunpack.i.l.bf16 %v8277_v46 }
 0x270   :  { %v7752_v41 = vpop.permute.xlu0 %5161  ;;  %v4434_v21 = vunpack.i.h.bf16 %v8278_v4  ;;  %v4433_v12 = vunpack.i.l.bf16 %v8278_v4  ;;  %v4474_v44 = vunpack.i.h.bf16 %v8279_v49  ;;  %v4473_v52 = vunpack.i.l.bf16 %v8279_v49 }
 0x271   :  { %4017 = vmatpush3.bf16.xpose.msk.msra.mxu1 %vm6650_vm10, %v4015_v57  ;;  %v4514_v35 = vunpack.i.h.bf16 %v8280_v11  ;;  %v4513_v34 = vunpack.i.l.bf16 %v8280_v11  ;;  %v1696_v5 = vsel %vm1667_vm4, %v1663_v7, %v4353_v61  ;;  %v1697_v30 = vsel %vm1667_vm4, %v1664_v26, %v4354_v56  ;;  %v1862_v56 = vld [vmem:[#allocation2 + $0x308] sm:$0xff]  ;;  %v1845_v26 = vld [vmem:[#allocation2 + $0x240] sm:$0xff] }
 0x272   :  { %v4554_v62 = vunpack.i.h.bf16 %v8281_v53  ;;  %v4553_v47 = vunpack.i.l.bf16 %v8281_v53  ;;  %v4594_v28 = vunpack.i.h.bf16 %v8282_v55  ;;  %v4593_v63 = vunpack.i.l.bf16 %v8282_v55 }
 0x273   :  { %v7758_v50 = vpop.permute.xlu1 %5166  ;;  %v4634_v59 = vunpack.i.h.bf16 %v8283_v37  ;;  %v4633_v14 = vunpack.i.l.bf16 %v8283_v37  ;;  %v1713_v51 = vsel %vm1700_vm5, %v1680_v19, %v4393_v33  ;;  %v1714_v15 = vsel %vm1700_vm5, %v1681_v43, %v4394_v23  ;;  %v1846_v19 = vld [vmem:[#allocation2 + $0x248] sm:$0xff]  ;;  %v8284_v33 = vld [vmem:[#allocation6_spill] sm:$0xff] }
 0x274   :  { %v7772_v1 = vpop.permute.xlu0 %5171  ;;  %v1729_v36 = vsel %vm1700_vm5, %v1696_v5, %v4433_v12  ;;  %v1730_v60 = vsel %vm1700_vm5, %v1697_v30, %v4434_v21  ;;  %v1746_v8 = vsel %vm1733_vm6, %v1713_v51, %v4473_v52  ;;  %v1747_v57 = vsel %vm1733_vm6, %v1714_v15, %v4474_v44 }
 0x275   :  { %v1762_v9 = vsel %vm1733_vm6, %v1729_v36, %v4513_v34  ;;  %v1763_v25 = vsel %vm1733_vm6, %v1730_v60, %v4514_v35  ;;  %v1779_v54 = vsel %vm1766_vm7, %v1746_v8, %v4553_v47  ;;  %v1780_v40 = vsel %vm1766_vm7, %v1747_v57, %v4554_v62 }
 0x276   :  { %v1795_v45 = vsel %vm1766_vm7, %v1762_v9, %v4593_v63  ;;  %v1796_v32 = vsel %vm1766_vm7, %v1763_v25, %v4594_v28  ;;  %v1812_v10 = vsel %vm1799_vm8, %v1779_v54, %v4633_v14  ;;  %v1813_v38 = vsel %vm1799_vm8, %v1780_v40, %v4634_v59 }
 0x277   :  { %v7778_v27 = vpop.permute.xlu1 %5176  ;;  %v5144_v6 = vunpack.i.h.bf16 %v7709_v17  ;;  %v5143_v16 = vunpack.i.l.bf16 %v7709_v17  ;;  %v3973_v39 = vpack.c.bf16 %v1813_v38, %v1812_v10  ;;  %v5154_v61 = vunpack.i.h.bf16 %v7726_v42 }
 0x278   :  { %v5182_v0 = vpop.permute.xlu0 %5181  ;;  %v5153_v7 = vunpack.i.l.bf16 %v7726_v42  ;;  %v5159_v43 = vunpack.i.h.bf16 %v7730_v58  ;;  %v5158_v46 = vunpack.i.l.bf16 %v7730_v58  ;;  %v5164_v17 = vunpack.i.h.bf16 %v7752_v41 }
 0x279   :  { %v5184_v22 = vunpack.i.h.bf16 %v5182_v0  ;;  %v5183_v48 = vunpack.i.l.bf16 %v5182_v0  ;;  %v5163_v23 = vunpack.i.l.bf16 %v7752_v41  ;;  %v4079_v4 = vunpack.i.h.bf16 %v8284_v33 }
 0x27a   :  { %v5169_v42 = vunpack.i.h.bf16 %v7758_v50  ;;  %v5168_v21 = vunpack.i.l.bf16 %v7758_v50  ;;  %v3176_v49 = vsel %vm17_vm0, %v1862_v56, %v5144_v6  ;;  %v3175_v44 = vsel %vm17_vm0, %v1861_v29, %v5143_v16 }
 0x27b   :  { %v7794_v3 = vpop.permute.xlu1 %5186  ;;  %v1828_v24 = vsel %vm1799_vm8, %v1795_v45, %v5183_v48  ;;  %v1829_v13 = vsel %vm1799_vm8, %v1796_v32, %v5184_v22  ;;  %v5174_v58 = vunpack.i.h.bf16 %v7772_v1  ;;  %v5173_v52 = vunpack.i.l.bf16 %v7772_v1 }
 0x27c   :  { %v3970_v2 = vpack.c.bf16 %v1829_v13, %v1828_v24  ;;  %v5192_v20 = vpop.permute.xlu0 %5191  ;;  %v3160_v41 = vsel %vm17_vm0, %v1846_v19, %v5154_v61  ;;  %v3159_v35 = vsel %vm17_vm0, %v1845_v26, %v5153_v7  ;;  %v5179_v34 = vunpack.i.h.bf16 %v7778_v27 }
 0x27d   :  { %v5178_v5 = vunpack.i.l.bf16 %v7778_v27  ;;  %v3207_v50 = vsel %vm1601_vm2, %v3175_v44, %v5158_v46  ;;  %v3208_v30 = vsel %vm1601_vm2, %v3176_v49, %v5159_v43  ;;  %v3191_v53 = vsel %vm1601_vm2, %v3159_v35, %v5163_v23 }
 0x27e   :  { %3972 = vmatprep.subr.msk.bf16.mxu0 %vm6650_vm10, %v3970_v2  ;;  %v3192_v62 = vsel %vm1601_vm2, %v3160_v41, %v5164_v17  ;;  %v3239_v47 = vsel %vm1634_vm3, %v3207_v50, %v5168_v21  ;;  %v3240_v1 = vsel %vm1634_vm3, %v3208_v30, %v5169_v42  ;;  %v5194_v55 = vunpack.i.h.bf16 %v5192_v20  ;;  %v8285_v21 = vld [vmem:[#allocation10_spill] sm:$0xff] }
 0x27f   :  { %v7804_v18 = vpop.permute.xlu1 %5196  ;;  %3975 = vmatpush3.bf16.xpose.msk.msra.mxu0 %vm6650_vm10, %v3973_v39  ;;  %v5193_v28 = vunpack.i.l.bf16 %v5192_v20  ;;  %v3223_v37 = vsel %vm1634_vm3, %v3191_v53, %v5173_v52  ;;  %v3224_v59 = vsel %vm1634_vm3, %v3192_v62, %v5174_v58  ;;  %v3271_v15 = vsel %vm1667_vm4, %v3239_v47, %v5178_v5  ;;  %v8286_v52 = vld [vmem:[#allocation16_spill] sm:$0xff]  ;;  %v8287_v5 = vld [vmem:[#allocation22_spill] sm:$0xff]  ;;  %v5350_v47 = vld [vmem:[#allocation2 + $0xb0] sm:$0xff] }
 0x280   :  { %v5202_v12 = vpop.permute.xlu0 %5201  ;;  %v3272_v36 = vsel %vm1667_vm4, %v3240_v1, %v5179_v34  ;;  %v5189_v57 = vunpack.i.h.bf16 %v7794_v3  ;;  %v5188_v9 = vunpack.i.l.bf16 %v7794_v3  ;;  %v5199_v25 = vunpack.i.h.bf16 %v7804_v18 }
 0x281   :  { %v5204_v27 = vunpack.i.h.bf16 %v5202_v12  ;;  %v5203_v14 = vunpack.i.l.bf16 %v5202_v12  ;;  %v5198_v0 = vunpack.i.l.bf16 %v7804_v18  ;;  %v3303_v54 = vsel %vm1700_vm5, %v3271_v15, %v5193_v28  ;;  %v8289_v15 = vld [vmem:[#allocation34_spill] sm:$0xff] }
 0x282   :  { %v3304_v40 = vsel %vm1700_vm5, %v3272_v36, %v5194_v55  ;;  %v3255_v16 = vsel %vm1667_vm4, %v3223_v37, %v5188_v9  ;;  %v3256_v18 = vsel %vm1667_vm4, %v3224_v59, %v5189_v57  ;;  %v4078_v56 = vunpack.i.l.bf16 %v8284_v33  ;;  %v8288_v55 = vld [vmem:[#allocation28_spill] sm:$0xff] }
 0x283   :  { %v5207_v11 = vpop.permute.xlu1 %5206  ;;  %v3335_v32 = vsel %vm1733_vm6, %v3303_v54, %v5203_v14  ;;  %v3336_v10 = vsel %vm1733_vm6, %v3304_v40, %v5204_v27  ;;  %v3287_v61 = vsel %vm1700_vm5, %v3255_v16, %v5198_v0  ;;  %v3288_v7 = vsel %vm1700_vm5, %v3256_v18, %v5199_v25  ;;  %v5351_v59 = vld [vmem:[#allocation2 + $0xa8] sm:$0xff]  ;;  %v5352_v14 = vld [vmem:[#allocation2 + $0x170] sm:$0xff]  ;;  %v8291_v40 = vld [vmem:[#allocation46_spill] sm:$0xff] }
 0x284   :  { %v5212_v63 = vpop.permute.xlu0 %5211  ;;  %v5209_v22 = vunpack.i.h.bf16 %v5207_v11  ;;  %v5208_v48 = vunpack.i.l.bf16 %v5207_v11  ;;  %v4119_v12 = vunpack.i.h.bf16 %v8285_v21  ;;  %v4118_v49 = vunpack.i.l.bf16 %v8285_v21  ;;  %v5353_v33 = vld [vmem:[#allocation2 + $0x168] sm:$0xff]  ;;  %v8293_v16 = vld [vmem:[#allocation70_spill] sm:$0xff] }
 0x285   :  { %v5214_v60 = vunpack.i.h.bf16 %v5212_v63  ;;  %v5213_v8 = vunpack.i.l.bf16 %v5212_v63  ;;  %v4159_v11 = vunpack.i.h.bf16 %v8286_v52  ;;  %v4158_v41 = vunpack.i.l.bf16 %v8286_v52  ;;  %v8290_v9 = vld [vmem:[#allocation40_spill] sm:$0xff] }
 0x286   :  { %v3319_v43 = vsel %vm1733_vm6, %v3287_v61, %v5208_v48  ;;  %v3320_v46 = vsel %vm1733_vm6, %v3288_v7, %v5209_v22  ;;  %v4199_v50 = vunpack.i.h.bf16 %v8287_v5  ;;  %v4198_v30 = vunpack.i.l.bf16 %v8287_v5  ;;  %v8294_v61 = vld [vmem:[#allocation82_spill] sm:$0xff] }
 0x287   :  { %v5217_v51 = vpop.permute.xlu1 %5216  ;;  %v3367_v3 = vsel %vm1766_vm7, %v3335_v32, %v5213_v8  ;;  %v3368_v2 = vsel %vm1766_vm7, %v3336_v10, %v5214_v60  ;;  %v1584_v1 = vsel %vm17_vm0, %v5350_v47, %v4079_v4  ;;  %v4239_v28 = vunpack.i.h.bf16 %v8288_v55 }
 0x288   :  { %v5222_v45 = vpop.permute.xlu0 %5221  ;;  %v5219_v20 = vunpack.i.h.bf16 %v5217_v51  ;;  %v5218_v6 = vunpack.i.l.bf16 %v5217_v51  ;;  %v4238_v63 = vunpack.i.l.bf16 %v8288_v55  ;;  %v1583_v27 = vsel %vm17_vm0, %v5351_v59, %v4078_v56 }
 0x289   :  { %v5224_v38 = vunpack.i.h.bf16 %v5222_v45  ;;  %v5223_v24 = vunpack.i.l.bf16 %v5222_v45  ;;  %v1600_v51 = vsel %vm17_vm0, %v5352_v14, %v4119_v12  ;;  %v4279_v36 = vunpack.i.h.bf16 %v8289_v15 }
 0x28a   :  { %v3351_v44 = vsel %vm1766_vm7, %v3319_v43, %v5218_v6  ;;  %v3352_v58 = vsel %vm1766_vm7, %v3320_v46, %v5219_v20  ;;  %v4278_v60 = vunpack.i.l.bf16 %v8289_v15  ;;  %v1599_v4 = vsel %vm17_vm0, %v5353_v33, %v4118_v49  ;;  %v8295_v46 = vld [vmem:[#allocation52_spill] sm:$0xff]  ;;  %v1864_v15 = vld [vmem:[#allocation2 + $0x320] sm:$0xff] }
 0x28b   :  { %v7845_v13 = vpop.permute.xlu1 %5226  ;;  %v3399_v39 = vsel %vm1799_vm8, %v3367_v3, %v5223_v24  ;;  %v3400_v29 = vsel %vm1799_vm8, %v3368_v2, %v5224_v38  ;;  %v1617_v8 = vsel %vm1601_vm2, %v1584_v1, %v4159_v11  ;;  %v1616_v57 = vsel %vm1601_vm2, %v1583_v27, %v4158_v41  ;;  %v8292_v38 = vld [vmem:[#allocation58_spill] sm:$0xff] }
 0x28c   :  { %v4018_v26 = vpack.c.bf16 %v3400_v29, %v3399_v39  ;;  %v5232_v19 = vpop.permute.xlu0 %5231  ;;  %v4318_v25 = vunpack.i.l.bf16 %v8290_v9  ;;  %v1633_v0 = vsel %vm1601_vm2, %v1600_v51, %v4199_v50  ;;  %v1632_v54 = vsel %vm1601_vm2, %v1599_v4, %v4198_v30  ;;  %v8297_v50 = vld [vmem:[#allocation76_spill] sm:$0xff] }
 0x28d   :  { %v5234_v17 = vunpack.i.h.bf16 %v5232_v19  ;;  %v5233_v23 = vunpack.i.l.bf16 %v5232_v19  ;;  %v4359_v22 = vunpack.i.h.bf16 %v8291_v40  ;;  %v4358_v48 = vunpack.i.l.bf16 %v8291_v40 }
 0x28e   :  { %4020 = vmatprep.subr.msk.bf16.mxu1 %vm6650_vm10, %v4018_v26  ;;  %v1649_v32 = vsel %vm1634_vm3, %v1616_v57, %v4238_v63  ;;  %v1650_v10 = vsel %vm1634_vm3, %v1617_v8, %v4239_v28  ;;  %v4439_v24 = vunpack.i.h.bf16 %v8292_v38  ;;  %v4438_v3 = vunpack.i.l.bf16 %v8292_v38 }
 0x28f   :  { %v7858_v42 = vpop.permute.xlu1 %5236  ;;  %v3383_v35 = vsel %vm1799_vm8, %v3351_v44, %v5233_v23  ;;  %v3384_v34 = vsel %vm1799_vm8, %v3352_v58, %v5234_v17  ;;  %v1665_v20 = vsel %vm1634_vm3, %v1632_v54, %v4278_v60  ;;  %v1666_v6 = vsel %vm1634_vm3, %v1633_v0, %v4279_v36  ;;  %v8296_v44 = vld [vmem:[#allocation64_spill] sm:$0xff]  ;;  %v1863_v0 = vld [vmem:[#allocation2 + $0x318] sm:$0xff]  ;;  %v1848_v54 = vld [vmem:[#allocation2 + $0x260] sm:$0xff] }
 0x290   :  { %v4021_v53 = vpack.c.bf16 %v3384_v34, %v3383_v35  ;;  %v7872_v62 = vpop.permute.xlu0 %5241  ;;  %v4519_v18 = vunpack.i.h.bf16 %v8293_v16  ;;  %v4518_v39 = vunpack.i.l.bf16 %v8293_v16  ;;  %v4319_v29 = vunpack.i.h.bf16 %v8290_v9 }
 0x291   :  { %v1682_v56 = vsel %vm1667_vm4, %v1649_v32, %v4318_v25  ;;  %v4599_v7 = vunpack.i.h.bf16 %v8294_v61  ;;  %v4598_v26 = vunpack.i.l.bf16 %v8294_v61  ;;  %v1698_v19 = vsel %vm1667_vm4, %v1665_v20, %v4358_v48 }
 0x292   :  { %4023 = vmatpush3.bf16.xpose.msk.msra.mxu1 %vm6650_vm10, %v4021_v53  ;;  %v1699_v43 = vsel %vm1667_vm4, %v1666_v6, %v4359_v22  ;;  %v4399_v17 = vunpack.i.h.bf16 %v8295_v46  ;;  %v4398_v23 = vunpack.i.l.bf16 %v8295_v46  ;;  %v1731_v12 = vsel %vm1700_vm5, %v1698_v19, %v4438_v3 }
 0x293   :  { %v7879_v37 = vpop.permute.xlu1 %5246  ;;  %v1732_v49 = vsel %vm1700_vm5, %v1699_v43, %v4439_v24  ;;  %v4479_v58 = vunpack.i.h.bf16 %v8296_v44  ;;  %v4478_v52 = vunpack.i.l.bf16 %v8296_v44  ;;  %v1764_v41 = vsel %vm1733_vm6, %v1731_v12, %v4518_v39 }
 0x294   :  { %v7895_v45 = vpop.permute.xlu0 %5251  ;;  %v1765_v35 = vsel %vm1733_vm6, %v1732_v49, %v4519_v18  ;;  %v4559_v30 = vunpack.i.h.bf16 %v8297_v50  ;;  %v4558_v53 = vunpack.i.l.bf16 %v8297_v50  ;;  %v1797_v47 = vsel %vm1766_vm7, %v1764_v41, %v4598_v26 }
 0x295   :  { %v1798_v1 = vsel %vm1766_vm7, %v1765_v35, %v4599_v7  ;;  %v1683_v55 = vsel %vm1667_vm4, %v1650_v10, %v4319_v29  ;;  %v5229_v28 = vunpack.i.h.bf16 %v7845_v13  ;;  %v1715_v14 = vsel %vm1700_vm5, %v1682_v56, %v4398_v23  ;;  %v1847_v10 = vld [vmem:[#allocation2 + $0x258] sm:$0xff] }
 0x296   :  { %v1716_v51 = vsel %vm1700_vm5, %v1683_v55, %v4399_v17  ;;  %v1748_v33 = vsel %vm1733_vm6, %v1715_v14, %v4478_v52  ;;  %v5228_v8 = vunpack.i.l.bf16 %v7845_v13  ;;  %v5239_v57 = vunpack.i.h.bf16 %v7858_v42 }
 0x297   :  { %v7901_v2 = vpop.permute.xlu1 %5256  ;;  %v1749_v4 = vsel %vm1733_vm6, %v1716_v51, %v4479_v58  ;;  %v1781_v9 = vsel %vm1766_vm7, %v1748_v33, %v4558_v53  ;;  %v3178_v40 = vsel %vm17_vm0, %v1864_v15, %v5229_v28  ;;  %v5238_v22 = vunpack.i.l.bf16 %v7858_v42 }
 0x298   :  { %v7915_v21 = vpop.permute.xlu0 %5261  ;;  %v1782_v25 = vsel %vm1766_vm7, %v1749_v4, %v4559_v30  ;;  %v5244_v48 = vunpack.i.h.bf16 %v7872_v62  ;;  %v5243_v32 = vunpack.i.l.bf16 %v7872_v62  ;;  %v5249_v38 = vunpack.i.h.bf16 %v7879_v37 }
 0x299   :  { %v5248_v24 = vunpack.i.l.bf16 %v7879_v37  ;;  %v3177_v16 = vsel %vm17_vm0, %v1863_v0, %v5228_v8  ;;  %v3162_v18 = vsel %vm17_vm0, %v1848_v54, %v5239_v57  ;;  %v5254_v39 = vunpack.i.h.bf16 %v7895_v45 }
 0x29a   :  { %v5253_v42 = vunpack.i.l.bf16 %v7895_v45  ;;  %v5259_v29 = vunpack.i.h.bf16 %v7901_v2  ;;  %v5258_v62 = vunpack.i.l.bf16 %v7901_v2  ;;  %v3161_v37 = vsel %vm17_vm0, %v1847_v10, %v5238_v22 }
 0x29b   :  { %v5267_v11 = vpop.permute.xlu1 %5266  ;;  %v3210_v7 = vsel %vm1601_vm2, %v3178_v40, %v5244_v48  ;;  %v3209_v26 = vsel %vm1601_vm2, %v3177_v16, %v5243_v32  ;;  %v3193_v46 = vsel %vm1601_vm2, %v3161_v37, %v5248_v24  ;;  %v3194_v45 = vsel %vm1601_vm2, %v3162_v18, %v5249_v38  ;;  %v5354_v48 = vld [vmem:[%s8024_s1] sm:$0xff] }
 0x29c   :  { %v5269_v34 = vunpack.i.h.bf16 %v5267_v11  ;;  %v5268_v5 = vunpack.i.l.bf16 %v5267_v11  ;;  %v7931_v27 = vpop.permute.xlu0 %5271  ;;  %v5264_v17 = vunpack.i.h.bf16 %v7915_v21  ;;  %v5263_v2 = vunpack.i.l.bf16 %v7915_v21 }
 0x29d   :  { %v3241_v12 = vsel %vm1634_vm3, %v3209_v26, %v5253_v42  ;;  %v3242_v49 = vsel %vm1634_vm3, %v3210_v7, %v5254_v39  ;;  %v5274_v44 = vunpack.i.h.bf16 %v7931_v27  ;;  %v5273_v58 = vunpack.i.l.bf16 %v7931_v27 }
 0x29e   :  { %v1830_v63 = vsel %vm1799_vm8, %v1797_v47, %v5268_v5  ;;  %v1831_v59 = vsel %vm1799_vm8, %v1798_v1, %v5269_v34  ;;  %v3225_v52 = vsel %vm1634_vm3, %v3193_v46, %v5258_v62  ;;  %v3226_v11 = vsel %vm1634_vm3, %v3194_v45, %v5259_v29 }
 0x29f   :  { %v3976_v36 = vpack.c.bf16 %v1831_v59, %v1830_v63  ;;  %v7935_v60 = vpop.permute.xlu1 %5276  ;;  %v3273_v53 = vsel %vm1667_vm4, %v3241_v12, %v5263_v2  ;;  %v3274_v47 = vsel %vm1667_vm4, %v3242_v49, %v5264_v17  ;;  %v3258_v63 = vsel %vm1667_vm4, %v3226_v11, %v5274_v44 }
 0x2a0   :  { %v5282_v13 = vpop.permute.xlu0 %5281  ;;  %v5279_v41 = vunpack.i.h.bf16 %v7935_v60  ;;  %v5278_v21 = vunpack.i.l.bf16 %v7935_v60  ;;  %v3257_v59 = vsel %vm1667_vm4, %v3225_v52, %v5273_v58  ;;  %v5364_v11 = vmov 0  }
 0x2a1   :  { %3978 = vmatprep.subr.msk.bf16.mxu0 %vm6650_vm10, %v3976_v36  ;;  %v5284_v3 = vunpack.i.h.bf16 %v5282_v13  ;;  %v5283_v20 = vunpack.i.l.bf16 %v5282_v13  ;;  %5320 = vset.pattern.permute.xlu0 %v5364_v11 }
 0x2a2   :  { %v3305_v51 = vsel %vm1700_vm5, %v3273_v53, %v5278_v21  ;;  %v3306_v15 = vsel %vm1700_vm5, %v3274_v47, %v5279_v41  ;;  %5321 = vset.pattern.permute.xlu1 %v5364_v11  ;;  %v3775_v41 = vld [vmem:[%s8025_s3] sm:$0xff] }
 0x2a3   :  { %v5287_v6 = vpop.permute.xlu1 %5286  ;;  %v1815_v56 = vsel %vm1799_vm8, %v1782_v25, %v5284_v3  ;;  %v1814_v61 = vsel %vm1799_vm8, %v1781_v9, %v5283_v20 }
 0x2a4   :  { %v3979_v19 = vpack.c.bf16 %v1815_v56, %v1814_v61  ;;  %v5292_v43 = vpop.permute.xlu0 %5291  ;;  %v5289_v35 = vunpack.i.h.bf16 %v5287_v6  ;;  %v5288_v34 = vunpack.i.l.bf16 %v5287_v6 }
 0x2a5   :  { %v5294_v5 = vunpack.i.h.bf16 %v5292_v43  ;;  %v5293_v50 = vunpack.i.l.bf16 %v5292_v43 }
 0x2a6   :  { %3981 = vmatpush3.bf16.xpose.msk.msra.mxu0 %vm6650_vm10, %v3979_v19  ;;  %v3289_v33 = vsel %vm1700_vm5, %v3257_v59, %v5288_v34  ;;  %v3290_v4 = vsel %vm1700_vm5, %v3258_v63, %v5289_v35 }
 0x2a7   :  { %v5297_v23 = vpop.permute.xlu1 %5296  ;;  %v3337_v8 = vsel %vm1733_vm6, %v3305_v51, %v5293_v50  ;;  %v3338_v57 = vsel %vm1733_vm6, %v3306_v15, %v5294_v5  ;;  %v3762_v5 = vld [vmem:[%s8026_s2] sm:$0xff] }
 0x2a8   :  { %v5302_v30 = vpop.permute.xlu0 %5301  ;;  %v5299_v1 = vunpack.i.h.bf16 %v5297_v23  ;;  %v5298_v55 = vunpack.i.l.bf16 %v5297_v23 }
 0x2a9   :  { %v5304_v27 = vunpack.i.h.bf16 %v5302_v30  ;;  %v5303_v14 = vunpack.i.l.bf16 %v5302_v30 }
 0x2aa   :  { %v3321_v25 = vsel %vm1733_vm6, %v3289_v33, %v5298_v55  ;;  %v3322_v0 = vsel %vm1733_vm6, %v3290_v4, %v5299_v1 }
 0x2ab   :  { %v5307_v28 = vpop.permute.xlu1 %5306  ;;  %v3369_v32 = vsel %vm1766_vm7, %v3337_v8, %v5303_v14  ;;  %v3370_v13 = vsel %vm1766_vm7, %v3338_v57, %v5304_v27 }
 0x2ac   :  { %v5309_v36 = vunpack.i.h.bf16 %v5307_v28  ;;  %v5308_v60 = vunpack.i.l.bf16 %v5307_v28  ;;  %v5312_v9 = vpop.permute.xlu0 %5311 }
 0x2ad   :  { %v5314_v54 = vunpack.i.h.bf16 %v5312_v9  ;;  %v5313_v40 = vunpack.i.l.bf16 %v5312_v9  ;;  %3899 = vmatmul.mubr.msk.f32.vlgmr.msra.gmra.mrb[0].mxu0 %vm3404_vm9, %v5354_v48 }
 0x2ae   :  { %v3353_v24 = vsel %vm1766_vm7, %v3321_v25, %v5308_v60  ;;  %v3354_v3 = vsel %vm1766_vm7, %v3322_v0, %v5309_v36 }
 0x2af   :  { %v5317_v22 = vpop.permute.xlu1 %5316  ;;  %v3401_v20 = vsel %vm1799_vm8, %v3369_v32, %v5313_v40  ;;  %v3402_v6 = vsel %vm1799_vm8, %v3370_v13, %v5314_v54 }
 0x2b0   :  { %v5319_v10 = vunpack.i.h.bf16 %v5317_v22  ;;  %v5318_v38 = vunpack.i.l.bf16 %v5317_v22  ;;  %v4024_v16 = vpack.c.bf16 %v3402_v6, %v3401_v20 }
 0x2b2   :  { %v3385_v18 = vsel %vm1799_vm8, %v3353_v24, %v5318_v38  ;;  %v3386_v39 = vsel %vm1799_vm8, %v3354_v3, %v5319_v10  ;;  %4026 = vmatprep.subr.msk.bf16.mxu1 %vm6650_vm10, %v4024_v16 }
 0x2b3   :  { %v4027_v42 = vpack.c.bf16 %v3386_v39, %v3385_v18 }
 0x2b5   :  { %4029 = vmatpush3.bf16.xpose.msk.msra.mxu1 %vm6650_vm10, %v4027_v42 }
 0x2bc   :  { %3933 = vmatmul.mubr.msk.f32.vlgmr.msra.gmra.mrb[0].mxu1 %vm3404_vm9, %v5354_v48 }
 0x380   :  { %v3666_v29 = vpop.f32.mrb[0].mxu0 }
 0x381   :  { %v3668_v62 = vpop.f32.mrb[1].mxu0 }
 0x382   :  { %v3742_v56 = vadd.f32 %v3668_v62, %v3666_v29 }
 0x38f   :  { %v3737_v61 = vpop.f32.mrb[0].mxu1 }
 0x390   :  { %v3743_v37 = vadd.f32 %v3742_v56, %v3737_v61  ;;  %v3739_v7 = vpop.f32.mrb[1].mxu1 }
 0x392   :  { %v3744_v26 = vadd.f32 %v3743_v37, %v3739_v7 }
 0x394   :  { %3745 = vadd.xlane.f32.xlu0 %v3744_v26 }
 0x421   :  { %v3746_v19 = vpop.xlane.xlu0 %3745 }
 0x422   :  { %v3747_v43 = vmul.f32 0.001953125, %v3746_v19 }
 0x424   :  { %v3748_v46 = vsub.f32 %v3666_v29, %v3747_v43  ;;  %v3749_v45 = vsub.f32 %v3668_v62, %v3747_v43  ;;  %v3750_v17 = vsub.f32 %v3737_v61, %v3747_v43  ;;  %v3751_v2 = vsub.f32 %v3739_v7, %v3747_v43 }
 0x426   :  { %v3752_v23 = vmul.f32 %v3748_v46, %v3748_v46  ;;  %v3753_v12 = vmul.f32 %v3749_v45, %v3749_v45  ;;  %v3754_v31 = vmul.f32 %v3750_v17, %v3750_v17  ;;  %v3755_v44 = vmul.f32 %v3751_v2, %v3751_v2 }
 0x428   :  { %v3756_v49 = vadd.f32 %v3753_v12, %v3752_v23 }
 0x42a   :  { %v3757_v58 = vadd.f32 %v3756_v49, %v3754_v31 }
 0x42c   :  { %v3758_v52 = vadd.f32 %v3757_v58, %v3755_v44 }
 0x42e   :  { %3759 = vadd.xlane.f32.xlu1 %v3758_v52 }
 0x43f   :  { %3778 = vperm.xlu1 %5321, %v3775_v41  }
 0x4bb   :  { %v3760_v21 = vpop.xlane.xlu1 %3759 }
 0x4bc   :  { %v3761_v35 = vmul.f32 0.001953125, %v3760_v21 }
 0x4be   :  { %v3763_v34 = vadd.f32 1e-05, %v3761_v35 }
 0x4bf   :  { %v3779_v47 = vpop.permute.xlu1 %3778 }
 0x4c0   :  { %5322 = vrsqrt.f32 %v3763_v34 }
 0x4ca   :  { %v5323_v50 = vpop.eup %5322 }
 0x4cb   :  { %v3765_v30 = vmul.f32 %v5323_v50, %v3762_v5 }
 0x4cd   :  { %3768 = vperm.xlu0 %5320, %v3765_v30  }
 0x54c   :  { %v3769_v53 = vpop.permute.xlu0 %3768 }
 0x54d   :  { %v3771_v1 = vmul.f32 %v3769_v53, %v3748_v46  ;;  %v3772_v55 = vmul.f32 %v3769_v53, %v3749_v45  ;;  %v3773_v28 = vmul.f32 %v3769_v53, %v3750_v17  ;;  %v3774_v63 = vmul.f32 %v3769_v53, %v3751_v2 }
 0x54f   :  { %v3781_v59 = vadd.f32 %v3779_v47, %v3771_v1  ;;  %v3782_v27 = vadd.f32 %v3779_v47, %v3772_v55  ;;  %v3783_v14 = vadd.f32 %v3779_v47, %v3773_v28  ;;  %v3784_v51 = vadd.f32 %v3779_v47, %v3774_v63 }
 0x551   :  { %v3785_v15 = vmax.f32 %v3781_v59, 0.0  ;;  %v3786_v36 = vmax.f32 %v3782_v27, 0.0  ;;  %v3787_v60 = vmax.f32 %v3783_v14, 0.0  ;;  %v3788_v33 = vmax.f32 %v3784_v51, 0.0 }
 0x553   :  { %3789 = vst [vmem:[%s8027_s4] sm:$0xff] %v3785_v15  ;;  %3790 = vst [vmem:[%s8027_s4 + $0x8] sm:$0xff] %v3786_v36 }
 0x554   :  { %3864 = vst [vmem:[%s8027_s4 + $0x10] sm:$0xff] %v3787_v60  ;;  %3865 = vst [vmem:[%s8027_s4 + $0x18] sm:$0xff] %v3788_v33 }

</bundles_post_ra>
